<compile_context>
chip_gen: v7x
topology: tpu7x:2x2x1
jax: 0.10.0
libtpu: 0.0.40
codegen_flags: <defaults>
</compile_context>

<pallas_src>
import functools

import jax
import jax.numpy as jnp
from jax import lax
from jax.experimental import pallas as pl
from jax.experimental.pallas import tpu as pltpu

K = 7            # conv kernel size
PAD = K // 2     # "same" padding


def _lane_shift(m, dw, H, W):
    """s[:, w] = m[:, w + dw], zero-filled outside [0, W). dw is static."""
    if dw == 0:
        return m
    z = jnp.zeros((H, abs(dw)), jnp.float32)
    if dw > 0:
        return jnp.concatenate([m[:, dw:], z], axis=1)
    return jnp.concatenate([z, m[:, :W + dw]], axis=1)


def _spatial_attention_kernel(x_ref, params_ref, o_ref,
                              max_ref, sum_ref, shift_ref,
                              *, C, TC, H, W):
    """Grid = (B, C // TC); one batch element per outer step.

    x_ref     : (TC, H, W)            VMEM  channel-block of the input
    params_ref: (2*K*K + 1,)          SMEM  flat conv weights + bias
    o_ref     : (H, W)                VMEM  output attention map (resident
                                            across the C axis)
    max_ref   : (H, W) f32            VMEM  running channel max
    sum_ref   : (H, W) f32            VMEM  running channel sum
    shift_ref : (2*K, H+2*PAD, W) f32 VMEM  lane-shifted, row-padded pooled maps
    """
    c_blk = pl.program_id(1)

    @pl.when(c_blk == 0)
    def _init():
        max_ref[...] = jnp.full((H, W), -jnp.inf, dtype=jnp.float32)
        sum_ref[...] = jnp.zeros((H, W), dtype=jnp.float32)

    # Stream the channel reduction: only two (H, W) f32 tiles stay live.
    def chan_body(i, carry):
        mx, sm = carry
        xi = x_ref[i].astype(jnp.float32)          # (H, W)
        return jnp.maximum(mx, xi), sm + xi

    mx, sm = lax.fori_loop(0, TC, chan_body,
                           (max_ref[...], sum_ref[...]),
                           unroll=min(TC, 8))
    max_ref[...] = mx
    sum_ref[...] = sm

    @pl.when(c_blk == pl.num_programs(1) - 1)
    def _finalize():
        pooled = (max_ref[...], sum_ref[...] * (1.0 / C))   # (max, mean)

        # Hoist the 7 lane-direction shifts per pooled channel out of the
        # 98-tap loop: 14 shifted copies with zero rows above/below for the
        # row-direction "same" padding.
        shift_ref[...] = jnp.zeros(shift_ref.shape, jnp.float32)
        for ci in range(2):
            for kw in range(K):
                idx = ci * K + kw
                shift_ref[idx, PAD:PAD + H, :] = _lane_shift(
                    pooled[ci], kw - PAD, H, W)

        # 7x7 conv (in=2, out=1) + bias: inner loop is row-offset
        # (lane-aligned) loads and VPU mul-adds with scalar SMEM weights.
        acc = jnp.full((H, W), params_ref[2 * K * K], dtype=jnp.float32)
        for ci in range(2):
            for kh in range(K):
                for kw in range(K):
                    wgt = params_ref[ci * K * K + kh * K + kw]
                    acc = acc + shift_ref[ci * K + kw, kh:kh + H, :] * wgt

        o_ref[...] = jax.nn.sigmoid(acc).astype(o_ref.dtype)


def _pick_c_tile(C, H, W, itemsize, target_block_bytes=4 << 20):
    """Largest divisor of C whose (TC, H, W) block stays under the target."""
    per_chan = max(1, H * W * itemsize)
    cap = max(1, min(C, target_block_bytes // per_chan))
    for t in range(int(cap), 0, -1):
        if C % t == 0:
            return t
    return 1


def spatial_attention(x, weight, bias):
    """x: (B, C, H, W) NCHW. weight: (1, 2, 7, 7) OIHW. bias: (1,)."""
    B, C, H, W = x.shape
    itemsize = jnp.dtype(x.dtype).itemsize

    # Flatten conv params into one small SMEM array: [98 weights, 1 bias].
    params = jnp.concatenate([
        weight.reshape(-1).astype(jnp.float32),
        bias.reshape(-1).astype(jnp.float32),
    ])

    TC = _pick_c_tile(C, H, W, itemsize)
    n_c = C // TC

    # VMEM budget: double-buffered input block + resident output + scratch.
    in_block = TC * H * W * itemsize
    out_block = H * W * itemsize
    scratch_bytes = 4 * (2 * H * W + 2 * K * (H + 2 * PAD) * W)
    est = 2 * in_block + 2 * out_block + scratch_bytes + (2 << 20)
    vmem_limit = int(min(48 << 20, max(16 << 20, 2 * est)))

    kernel = functools.partial(_spatial_attention_kernel,
                               C=C, TC=TC, H=H, W=W)

    return pl.pallas_call(
        kernel,
        out_shape=jax.ShapeDtypeStruct((B, 1, H, W), x.dtype),
        grid=(B, n_c),
        in_specs=[
            # (TC, H, W) channel-block per step; batch dim squeezed.
            pl.BlockSpec((None, TC, H, W), lambda b, c: (b, c, 0, 0)),
            # tiny conv params live in SMEM (scalar reads in the tap loop)
            pl.BlockSpec(memory_space=pltpu.MemorySpace.SMEM),
        ],
        # Output block is resident across the C axis; written at finalize.
        out_specs=pl.BlockSpec((None, None, H, W), lambda b, c: (b, 0, 0, 0)),
        scratch_shapes=[
            pltpu.VMEM((H, W), jnp.float32),                       # running max
            pltpu.VMEM((H, W), jnp.float32),                       # running sum
            pltpu.VMEM((2 * K, H + 2 * PAD, W), jnp.float32),      # shifted maps
        ],
        compiler_params=pltpu.CompilerParams(
            dimension_semantics=("parallel", "arbitrary"),
            vmem_limit_bytes=vmem_limit),
    )(x, params)


def _reference(x, weight, bias):
    """Pure-JAX reference matching the PyTorch forward."""
    pooled = jnp.concatenate(
        [jnp.max(x, axis=1, keepdims=True), jnp.mean(x, axis=1, keepdims=True)],
        axis=1)
    y = lax.conv_general_dilated(
        pooled, weight, window_strides=(1, 1),
        padding=[(PAD, PAD), (PAD, PAD)],
        dimension_numbers=("NCHW", "OIHW", "NCHW"))
    y = y + bias.reshape(1, 1, 1, 1)
    return jax.nn.sigmoid(y)


if __name__ == "__main__":
    key = jax.random.PRNGKey(0)
    kx, kw, kb, kx2 = jax.random.split(key, 4)

    # Deterministic Conv2d(2, 1, 7) init (PyTorch-style uniform bound).
    fan_in = 2 * K * K
    bound = 1.0 / jnp.sqrt(fan_in)
    weight = jax.random.uniform(kw, (1, 2, K, K), jnp.float32, -bound, bound)
    bias = jax.random.uniform(kb, (1,), jnp.float32, -bound, bound)

    # Test 1: canonical small shape.
    B, C, H, W = 2, 4, 16, 16
    x = jax.random.normal(kx, (B, C, H, W), dtype=jnp.float32)
    out = jax.block_until_ready(spatial_attention(x, weight, bias))
    ref = _reference(x, weight, bias)
    assert out.shape == (B, 1, H, W)
    assert jnp.allclose(out, ref, atol=1e-5, rtol=1e-5), "mismatch vs reference"

    # Test 2: odd channel count / non-square spatial (exercises C tiling).
    B2, C2, H2, W2 = 1, 5, 12, 20
    x2 = jax.random.normal(kx2, (B2, C2, H2, W2), dtype=jnp.float32)
    out2 = jax.block_until_ready(spatial_attention(x2, weight, bias))
    ref2 = _reference(x2, weight, bias)
    assert out2.shape == (B2, 1, H2, W2)
    assert jnp.allclose(out2, ref2, atol=1e-5, rtol=1e-5), "mismatch vs reference (2)"

    print("KERNEL_OK")
</pallas_src>

<mosaic_0001>
module attributes {stable_mosaic.version = 11 : i64} {
  func.func @_spatial_attention_kernel(%arg0: i32, %arg1: i32, %arg2: memref<1x4x16x16xf32, #tpu.memory_space<vmem>>, %arg3: memref<99xf32, #tpu.memory_space<smem>>, %arg4: memref<1x1x16x16xf32, #tpu.memory_space<vmem>>, %arg5: memref<16x16xf32, #tpu.memory_space<vmem>>, %arg6: memref<16x16xf32, #tpu.memory_space<vmem>>, %arg7: memref<14x22x16xf32, #tpu.memory_space<vmem>>) attributes {dimension_semantics = [#tpu.dimension_semantics<parallel>, #tpu.dimension_semantics<arbitrary>], iteration_bounds = array<i64: 2, 1>, scalar_prefetch = 0 : i64, scratch_operands = 3 : i64, tpu.core_type = #tpu.core_type<tc>, window_params = [{transform_indices = @transform_0, window_bounds = array<i64: 1, 4, 16, 16>}, {transform_indices = @transform_1, window_bounds = array<i64: 99>}, {transform_indices = @transform_2, window_bounds = array<i64: 1, 1, 16, 16>}]} {
    %c0_i32 = arith.constant 0 : i32
    %0 = arith.cmpi eq, %arg1, %c0_i32 : i32
    %1 = arith.extui %0 : i1 to i32
    %c0_i32_0 = arith.constant 0 : i32
    %2 = arith.cmpi ne, %1, %c0_i32_0 : i32
    scf.if %2 {
      %cst = arith.constant 0xFF800000 : f32
      %30 = vector.broadcast %cst : f32 to vector<16x16xf32>
      %c0_23 = arith.constant 0 : index
      %c0_24 = arith.constant 0 : index
      %31 = vector.load %arg5[%c0_23, %c0_24] : memref<16x16xf32, #tpu.memory_space<vmem>>, vector<16x16xf32>
      tpu.vector_store %arg5[%c0_23, %c0_24], %30 {strides = array<i32>} : memref<16x16xf32, #tpu.memory_space<vmem>>, vector<16x16xf32>,
      %cst_25 = arith.constant 0.000000e+00 : f32
      %32 = vector.broadcast %cst_25 : f32 to vector<16x16xf32>
      %c0_26 = arith.constant 0 : index
      %c0_27 = arith.constant 0 : index
      %33 = vector.load %arg6[%c0_26, %c0_27] : memref<16x16xf32, #tpu.memory_space<vmem>>, vector<16x16xf32>
      tpu.vector_store %arg6[%c0_26, %c0_27], %32 {strides = array<i32>} : memref<16x16xf32, #tpu.memory_space<vmem>>, vector<16x16xf32>,
    } else {
    }
    %c0 = arith.constant 0 : index
    %c0_1 = arith.constant 0 : index
    %3 = vector.load %arg5[%c0, %c0_1] : memref<16x16xf32, #tpu.memory_space<vmem>>, vector<16x16xf32>
    %c0_2 = arith.constant 0 : index
    %c0_3 = arith.constant 0 : index
    %4 = vector.load %arg6[%c0_2, %c0_3] : memref<16x16xf32, #tpu.memory_space<vmem>>, vector<16x16xf32>
    %c0_i32_4 = arith.constant 0 : i32
    %c0_5 = arith.constant 0 : index
    %5 = arith.index_cast %c0_i32_4 : i32 to index
    %c0_6 = arith.constant 0 : index
    %c0_7 = arith.constant 0 : index
    %6 = vector.load %arg2[%c0_5, %5, %c0_6, %c0_7] : memref<1x4x16x16xf32, #tpu.memory_space<vmem>>, vector<1x1x16x16xf32>
    %7 = vector.shape_cast %6 : vector<1x1x16x16xf32> to vector<16x16xf32>
    %8 = arith.maximumf %3, %7 : vector<16x16xf32>
    %9 = arith.addf %4, %7 : vector<16x16xf32>
    %c1_i32 = arith.constant 1 : i32
    %c0_8 = arith.constant 0 : index
    %10 = arith.index_cast %c1_i32 : i32 to index
    %c0_9 = arith.constant 0 : index
    %c0_10 = arith.constant 0 : index
    %11 = vector.load %arg2[%c0_8, %10, %c0_9, %c0_10] : memref<1x4x16x16xf32, #tpu.memory_space<vmem>>, vector<1x1x16x16xf32>
    %12 = vector.shape_cast %11 : vector<1x1x16x16xf32> to vector<16x16xf32>
    %13 = arith.maximumf %8, %12 : vector<16x16xf32>
    %14 = arith.addf %9, %12 : vector<16x16xf32>
    %c2_i32 = arith.constant 2 : i32
    %c0_11 = arith.constant 0 : index
    %15 = arith.index_cast %c2_i32 : i32 to index
    %c0_12 = arith.constant 0 : index
    %c0_13 = arith.constant 0 : index
    %16 = vector.load %arg2[%c0_11, %15, %c0_12, %c0_13] : memref<1x4x16x16xf32, #tpu.memory_space<vmem>>, vector<1x1x16x16xf32>
    %17 = vector.shape_cast %16 : vector<1x1x16x16xf32> to vector<16x16xf32>
    %18 = arith.maximumf %13, %17 : vector<16x16xf32>
    %19 = arith.addf %14, %17 : vector<16x16xf32>
    %c3_i32 = arith.constant 3 : i32
    %c0_14 = arith.constant 0 : index
    %20 = arith.index_cast %c3_i32 : i32 to index
    %c0_15 = arith.constant 0 : index
    %c0_16 = arith.constant 0 : index
    %21 = vector.load %arg2[%c0_14, %20, %c0_15, %c0_16] : memref<1x4x16x16xf32, #tpu.memory_space<vmem>>, vector<1x1x16x16xf32>
    %22 = vector.shape_cast %21 : vector<1x1x16x16xf32> to vector<16x16xf32>
    %23 = arith.maximumf %18, %22 : vector<16x16xf32>
    %24 = arith.addf %19, %22 : vector<16x16xf32>
    %c4_i32 = arith.constant 4 : i32
    %c0_17 = arith.constant 0 : index
    %c0_18 = arith.constant 0 : index
    %25 = vector.load %arg5[%c0_17, %c0_18] : memref<16x16xf32, #tpu.memory_space<vmem>>, vector<16x16xf32>
    tpu.vector_store %arg5[%c0_17, %c0_18], %23 {strides = array<i32>} : memref<16x16xf32, #tpu.memory_space<vmem>>, vector<16x16xf32>,
    %c0_19 = arith.constant 0 : index
    %c0_20 = arith.constant 0 : index
    %26 = vector.load %arg6[%c0_19, %c0_20] : memref<16x16xf32, #tpu.memory_space<vmem>>, vector<16x16xf32>
    tpu.vector_store %arg6[%c0_19, %c0_20], %24 {strides = array<i32>} : memref<16x16xf32, #tpu.memory_space<vmem>>, vector<16x16xf32>,
    %c0_i32_21 = arith.constant 0 : i32
    %27 = arith.cmpi eq, %arg1, %c0_i32_21 : i32
    %28 = arith.extui %27 : i1 to i32
    %c0_i32_22 = arith.constant 0 : i32
    %29 = arith.cmpi ne, %28, %c0_i32_22 : i32
    scf.if %29 {
      %c0_23 = arith.constant 0 : index
      %c0_24 = arith.constant 0 : index
      %30 = vector.load %arg5[%c0_23, %c0_24] : memref<16x16xf32, #tpu.memory_space<vmem>>, vector<16x16xf32>
      %c0_25 = arith.constant 0 : index
      %c0_26 = arith.constant 0 : index
      %31 = vector.load %arg6[%c0_25, %c0_26] : memref<16x16xf32, #tpu.memory_space<vmem>>, vector<16x16xf32>
      %cst = arith.constant 2.500000e-01 : f32
      %32 = vector.broadcast %cst : f32 to vector<16x16xf32>
      %33 = arith.mulf %31, %32 : vector<16x16xf32>
      %cst_27 = arith.constant 0.000000e+00 : f32
      %34 = vector.broadcast %cst_27 : f32 to vector<14x22x16xf32>
      %c0_28 = arith.constant 0 : index
      %c0_29 = arith.constant 0 : index
      %c0_30 = arith.constant 0 : index
      %35 = vector.load %arg7[%c0_28, %c0_29, %c0_30] : memref<14x22x16xf32, #tpu.memory_space<vmem>>, vector<14x22x16xf32>
      tpu.vector_store %arg7[%c0_28, %c0_29, %c0_30], %34 {strides = array<i32>} : memref<14x22x16xf32, #tpu.memory_space<vmem>>, vector<14x22x16xf32>,
      %cst_31 = arith.constant 0.000000e+00 : f32
      %36 = vector.broadcast %cst_31 : f32 to vector<16x3xf32>
      %37 = vector.extract_strided_slice %30 {offsets = [0, 0], sizes = [16, 13], strides = [1, 1]} : vector<16x16xf32> to vector<16x13xf32>
      %38 = tpu.concatenate %36, %37 in 1 : vector<16x3xf32>, vector<16x13xf32> -> vector<16x16xf32>
      %c0_32 = arith.constant 0 : index
      %c3 = arith.constant 3 : index
      %c0_33 = arith.constant 0 : index
      %39 = vector.load %arg7[%c0_32, %c3, %c0_33] : memref<14x22x16xf32, #tpu.memory_space<vmem>>, vector<1x16x16xf32>
      %40 = vector.shape_cast %39 : vector<1x16x16xf32> to vector<16x16xf32>
      %41 = vector.shape_cast %38 : vector<16x16xf32> to vector<1x16x16xf32>
      tpu.vector_store %arg7[%c0_32, %c3, %c0_33], %41 {strides = array<i32>} : memref<14x22x16xf32, #tpu.memory_space<vmem>>, vector<1x16x16xf32>,
      %cst_34 = arith.constant 0.000000e+00 : f32
      %42 = vector.broadcast %cst_34 : f32 to vector<16x2xf32>
      %43 = vector.extract_strided_slice %30 {offsets = [0, 0], sizes = [16, 14], strides = [1, 1]} : vector<16x16xf32> to vector<16x14xf32>
      %44 = tpu.concatenate %42, %43 in 1 : vector<16x2xf32>, vector<16x14xf32> -> vector<16x16xf32>
      %c1 = arith.constant 1 : index
      %c3_35 = arith.constant 3 : index
      %c0_36 = arith.constant 0 : index
      %45 = vector.load %arg7[%c1, %c3_35, %c0_36] : memref<14x22x16xf32, #tpu.memory_space<vmem>>, vector<1x16x16xf32>
      %46 = vector.shape_cast %45 : vector<1x16x16xf32> to vector<16x16xf32>
      %47 = vector.shape_cast %44 : vector<16x16xf32> to vector<1x16x16xf32>
      tpu.vector_store %arg7[%c1, %c3_35, %c0_36], %47 {strides = array<i32>} : memref<14x22x16xf32, #tpu.memory_space<vmem>>, vector<1x16x16xf32>,
      %cst_37 = arith.constant 0.000000e+00 : f32
      %48 = vector.broadcast %cst_37 : f32 to vector<16x1xf32>
      %49 = vector.extract_strided_slice %30 {offsets = [0, 0], sizes = [16, 15], strides = [1, 1]} : vector<16x16xf32> to vector<16x15xf32>
      %50 = tpu.concatenate %48, %49 in 1 : vector<16x1xf32>, vector<16x15xf32> -> vector<16x16xf32>
      %c2 = arith.constant 2 : index
      %c3_38 = arith.constant 3 : index
      %c0_39 = arith.constant 0 : index
      %51 = vector.load %arg7[%c2, %c3_38, %c0_39] : memref<14x22x16xf32, #tpu.memory_space<vmem>>, vector<1x16x16xf32>
      %52 = vector.shape_cast %51 : vector<1x16x16xf32> to vector<16x16xf32>
      %53 = vector.shape_cast %50 : vector<16x16xf32> to vector<1x16x16xf32>
      tpu.vector_store %arg7[%c2, %c3_38, %c0_39], %53 {strides = array<i32>} : memref<14x22x16xf32, #tpu.memory_space<vmem>>, vector<1x16x16xf32>,
      %c3_40 = arith.constant 3 : index
      %c3_41 = arith.constant 3 : index
      %c0_42 = arith.constant 0 : index
      %54 = vector.load %arg7[%c3_40, %c3_41, %c0_42] : memref<14x22x16xf32, #tpu.memory_space<vmem>>, vector<1x16x16xf32>
      %55 = vector.shape_cast %54 : vector<1x16x16xf32> to vector<16x16xf32>
      %56 = vector.shape_cast %30 : vector<16x16xf32> to vector<1x16x16xf32>
      tpu.vector_store %arg7[%c3_40, %c3_41, %c0_42], %56 {strides = array<i32>} : memref<14x22x16xf32, #tpu.memory_space<vmem>>, vector<1x16x16xf32>,
      %cst_43 = arith.constant 0.000000e+00 : f32
      %57 = vector.broadcast %cst_43 : f32 to vector<16x1xf32>
      %58 = vector.extract_strided_slice %30 {offsets = [0, 1], sizes = [16, 15], strides = [1, 1]} : vector<16x16xf32> to vector<16x15xf32>
      %59 = tpu.concatenate %58, %57 in 1 : vector<16x15xf32>, vector<16x1xf32> -> vector<16x16xf32>
      %c4 = arith.constant 4 : index
      %c3_44 = arith.constant 3 : index
      %c0_45 = arith.constant 0 : index
      %60 = vector.load %arg7[%c4, %c3_44, %c0_45] : memref<14x22x16xf32, #tpu.memory_space<vmem>>, vector<1x16x16xf32>
      %61 = vector.shape_cast %60 : vector<1x16x16xf32> to vector<16x16xf32>
      %62 = vector.shape_cast %59 : vector<16x16xf32> to vector<1x16x16xf32>
      tpu.vector_store %arg7[%c4, %c3_44, %c0_45], %62 {strides = array<i32>} : memref<14x22x16xf32, #tpu.memory_space<vmem>>, vector<1x16x16xf32>,
      %cst_46 = arith.constant 0.000000e+00 : f32
      %63 = vector.broadcast %cst_46 : f32 to vector<16x2xf32>
      %64 = vector.extract_strided_slice %30 {offsets = [0, 2], sizes = [16, 14], strides = [1, 1]} : vector<16x16xf32> to vector<16x14xf32>
      %65 = tpu.concatenate %64, %63 in 1 : vector<16x14xf32>, vector<16x2xf32> -> vector<16x16xf32>
      %c5 = arith.constant 5 : index
      %c3_47 = arith.constant 3 : index
      %c0_48 = arith.constant 0 : index
      %66 = vector.load %arg7[%c5, %c3_47, %c0_48] : memref<14x22x16xf32, #tpu.memory_space<vmem>>, vector<1x16x16xf32>
      %67 = vector.shape_cast %66 : vector<1x16x16xf32> to vector<16x16xf32>
      %68 = vector.shape_cast %65 : vector<16x16xf32> to vector<1x16x16xf32>
      tpu.vector_store %arg7[%c5, %c3_47, %c0_48], %68 {strides = array<i32>} : memref<14x22x16xf32, #tpu.memory_space<vmem>>, vector<1x16x16xf32>,
      %cst_49 = arith.constant 0.000000e+00 : f32
      %69 = vector.broadcast %cst_49 : f32 to vector<16x3xf32>
      %70 = vector.extract_strided_slice %30 {offsets = [0, 3], sizes = [16, 13], strides = [1, 1]} : vector<16x16xf32> to vector<16x13xf32>
      %71 = tpu.concatenate %70, %69 in 1 : vector<16x13xf32>, vector<16x3xf32> -> vector<16x16xf32>
      %c6 = arith.constant 6 : index
      %c3_50 = arith.constant 3 : index
      %c0_51 = arith.constant 0 : index
      %72 = vector.load %arg7[%c6, %c3_50, %c0_51] : memref<14x22x16xf32, #tpu.memory_space<vmem>>, vector<1x16x16xf32>
      %73 = vector.shape_cast %72 : vector<1x16x16xf32> to vector<16x16xf32>
      %74 = vector.shape_cast %71 : vector<16x16xf32> to vector<1x16x16xf32>
      tpu.vector_store %arg7[%c6, %c3_50, %c0_51], %74 {strides = array<i32>} : memref<14x22x16xf32, #tpu.memory_space<vmem>>, vector<1x16x16xf32>,
      %cst_52 = arith.constant 0.000000e+00 : f32
      %75 = vector.broadcast %cst_52 : f32 to vector<16x3xf32>
      %76 = vector.extract_strided_slice %33 {offsets = [0, 0], sizes = [16, 13], strides = [1, 1]} : vector<16x16xf32> to vector<16x13xf32>
      %77 = tpu.concatenate %75, %76 in 1 : vector<16x3xf32>, vector<16x13xf32> -> vector<16x16xf32>
      %c7 = arith.constant 7 : index
      %c3_53 = arith.constant 3 : index
      %c0_54 = arith.constant 0 : index
      %78 = vector.load %arg7[%c7, %c3_53, %c0_54] : memref<14x22x16xf32, #tpu.memory_space<vmem>>, vector<1x16x16xf32>
      %79 = vector.shape_cast %78 : vector<1x16x16xf32> to vector<16x16xf32>
      %80 = vector.shape_cast %77 : vector<16x16xf32> to vector<1x16x16xf32>
      tpu.vector_store %arg7[%c7, %c3_53, %c0_54], %80 {strides = array<i32>} : memref<14x22x16xf32, #tpu.memory_space<vmem>>, vector<1x16x16xf32>,
      %cst_55 = arith.constant 0.000000e+00 : f32
      %81 = vector.broadcast %cst_55 : f32 to vector<16x2xf32>
      %82 = vector.extract_strided_slice %33 {offsets = [0, 0], sizes = [16, 14], strides = [1, 1]} : vector<16x16xf32> to vector<16x14xf32>
      %83 = tpu.concatenate %81, %82 in 1 : vector<16x2xf32>, vector<16x14xf32> -> vector<16x16xf32>
      %c8 = arith.constant 8 : index
      %c3_56 = arith.constant 3 : index
      %c0_57 = arith.constant 0 : index
      %84 = vector.load %arg7[%c8, %c3_56, %c0_57] : memref<14x22x16xf32, #tpu.memory_space<vmem>>, vector<1x16x16xf32>
      %85 = vector.shape_cast %84 : vector<1x16x16xf32> to vector<16x16xf32>
      %86 = vector.shape_cast %83 : vector<16x16xf32> to vector<1x16x16xf32>
      tpu.vector_store %arg7[%c8, %c3_56, %c0_57], %86 {strides = array<i32>} : memref<14x22x16xf32, #tpu.memory_space<vmem>>, vector<1x16x16xf32>,
      %cst_58 = arith.constant 0.000000e+00 : f32
      %87 = vector.broadcast %cst_58 : f32 to vector<16x1xf32>
      %88 = vector.extract_strided_slice %33 {offsets = [0, 0], sizes = [16, 15], strides = [1, 1]} : vector<16x16xf32> to vector<16x15xf32>
      %89 = tpu.concatenate %87, %88 in 1 : vector<16x1xf32>, vector<16x15xf32> -> vector<16x16xf32>
      %c9 = arith.constant 9 : index
      %c3_59 = arith.constant 3 : index
      %c0_60 = arith.constant 0 : index
      %90 = vector.load %arg7[%c9, %c3_59, %c0_60] : memref<14x22x16xf32, #tpu.memory_space<vmem>>, vector<1x16x16xf32>
      %91 = vector.shape_cast %90 : vector<1x16x16xf32> to vector<16x16xf32>
      %92 = vector.shape_cast %89 : vector<16x16xf32> to vector<1x16x16xf32>
      tpu.vector_store %arg7[%c9, %c3_59, %c0_60], %92 {strides = array<i32>} : memref<14x22x16xf32, #tpu.memory_space<vmem>>, vector<1x16x16xf32>,
      %c10 = arith.constant 10 : index
      %c3_61 = arith.constant 3 : index
      %c0_62 = arith.constant 0 : index
      %93 = vector.load %arg7[%c10, %c3_61, %c0_62] : memref<14x22x16xf32, #tpu.memory_space<vmem>>, vector<1x16x16xf32>
      %94 = vector.shape_cast %93 : vector<1x16x16xf32> to vector<16x16xf32>
      %95 = vector.shape_cast %33 : vector<16x16xf32> to vector<1x16x16xf32>
      tpu.vector_store %arg7[%c10, %c3_61, %c0_62], %95 {strides = array<i32>} : memref<14x22x16xf32, #tpu.memory_space<vmem>>, vector<1x16x16xf32>,
      %cst_63 = arith.constant 0.000000e+00 : f32
      %96 = vector.broadcast %cst_63 : f32 to vector<16x1xf32>
      %97 = vector.extract_strided_slice %33 {offsets = [0, 1], sizes = [16, 15], strides = [1, 1]} : vector<16x16xf32> to vector<16x15xf32>
      %98 = tpu.concatenate %97, %96 in 1 : vector<16x15xf32>, vector<16x1xf32> -> vector<16x16xf32>
      %c11 = arith.constant 11 : index
      %c3_64 = arith.constant 3 : index
      %c0_65 = arith.constant 0 : index
      %99 = vector.load %arg7[%c11, %c3_64, %c0_65] : memref<14x22x16xf32, #tpu.memory_space<vmem>>, vector<1x16x16xf32>
      %100 = vector.shape_cast %99 : vector<1x16x16xf32> to vector<16x16xf32>
      %101 = vector.shape_cast %98 : vector<16x16xf32> to vector<1x16x16xf32>
      tpu.vector_store %arg7[%c11, %c3_64, %c0_65], %101 {strides = array<i32>} : memref<14x22x16xf32, #tpu.memory_space<vmem>>, vector<1x16x16xf32>,
      %cst_66 = arith.constant 0.000000e+00 : f32
      %102 = vector.broadcast %cst_66 : f32 to vector<16x2xf32>
      %103 = vector.extract_strided_slice %33 {offsets = [0, 2], sizes = [16, 14], strides = [1, 1]} : vector<16x16xf32> to vector<16x14xf32>
      %104 = tpu.concatenate %103, %102 in 1 : vector<16x14xf32>, vector<16x2xf32> -> vector<16x16xf32>
      %c12 = arith.constant 12 : index
      %c3_67 = arith.constant 3 : index
      %c0_68 = arith.constant 0 : index
      %105 = vector.load %arg7[%c12, %c3_67, %c0_68] : memref<14x22x16xf32, #tpu.memory_space<vmem>>, vector<1x16x16xf32>
      %106 = vector.shape_cast %105 : vector<1x16x16xf32> to vector<16x16xf32>
      %107 = vector.shape_cast %104 : vector<16x16xf32> to vector<1x16x16xf32>
      tpu.vector_store %arg7[%c12, %c3_67, %c0_68], %107 {strides = array<i32>} : memref<14x22x16xf32, #tpu.memory_space<vmem>>, vector<1x16x16xf32>,
      %cst_69 = arith.constant 0.000000e+00 : f32
      %108 = vector.broadcast %cst_69 : f32 to vector<16x3xf32>
      %109 = vector.extract_strided_slice %33 {offsets = [0, 3], sizes = [16, 13], strides = [1, 1]} : vector<16x16xf32> to vector<16x13xf32>
      %110 = tpu.concatenate %109, %108 in 1 : vector<16x13xf32>, vector<16x3xf32> -> vector<16x16xf32>
      %c13 = arith.constant 13 : index
      %c3_70 = arith.constant 3 : index
      %c0_71 = arith.constant 0 : index
      %111 = vector.load %arg7[%c13, %c3_70, %c0_71] : memref<14x22x16xf32, #tpu.memory_space<vmem>>, vector<1x16x16xf32>
      %112 = vector.shape_cast %111 : vector<1x16x16xf32> to vector<16x16xf32>
      %113 = vector.shape_cast %110 : vector<16x16xf32> to vector<1x16x16xf32>
      tpu.vector_store %arg7[%c13, %c3_70, %c0_71], %113 {strides = array<i32>} : memref<14x22x16xf32, #tpu.memory_space<vmem>>, vector<1x16x16xf32>,
      %c98 = arith.constant 98 : index
      %114 = memref.load %arg3[%c98] : memref<99xf32, #tpu.memory_space<smem>>
      %115 = vector.broadcast %114 : f32 to vector<16x16xf32>
      %c0_72 = arith.constant 0 : index
      %116 = memref.load %arg3[%c0_72] : memref<99xf32, #tpu.memory_space<smem>>
      %c0_73 = arith.constant 0 : index
      %c0_74 = arith.constant 0 : index
      %c0_75 = arith.constant 0 : index
      %117 = vector.load %arg7[%c0_73, %c0_74, %c0_75] : memref<14x22x16xf32, #tpu.memory_space<vmem>>, vector<1x16x16xf32>
      %118 = vector.shape_cast %117 : vector<1x16x16xf32> to vector<16x16xf32>
      %119 = vector.broadcast %116 : f32 to vector<16x16xf32>
      %120 = arith.mulf %118, %119 : vector<16x16xf32>
      %121 = arith.addf %115, %120 : vector<16x16xf32>
      %c1_76 = arith.constant 1 : index
      %122 = memref.load %arg3[%c1_76] : memref<99xf32, #tpu.memory_space<smem>>
      %c1_77 = arith.constant 1 : index
      %c0_78 = arith.constant 0 : index
      %c0_79 = arith.constant 0 : index
      %123 = vector.load %arg7[%c1_77, %c0_78, %c0_79] : memref<14x22x16xf32, #tpu.memory_space<vmem>>, vector<1x16x16xf32>
      %124 = vector.shape_cast %123 : vector<1x16x16xf32> to vector<16x16xf32>
      %125 = vector.broadcast %122 : f32 to vector<16x16xf32>
      %126 = arith.mulf %124, %125 : vector<16x16xf32>
      %127 = arith.addf %121, %126 : vector<16x16xf32>
      %c2_80 = arith.constant 2 : index
      %128 = memref.load %arg3[%c2_80] : memref<99xf32, #tpu.memory_space<smem>>
      %c2_81 = arith.constant 2 : index
      %c0_82 = arith.constant 0 : index
      %c0_83 = arith.constant 0 : index
      %129 = vector.load %arg7[%c2_81, %c0_82, %c0_83] : memref<14x22x16xf32, #tpu.memory_space<vmem>>, vector<1x16x16xf32>
      %130 = vector.shape_cast %129 : vector<1x16x16xf32> to vector<16x16xf32>
      %131 = vector.broadcast %128 : f32 to vector<16x16xf32>
      %132 = arith.mulf %130, %131 : vector<16x16xf32>
      %133 = arith.addf %127, %132 : vector<16x16xf32>
      %c3_84 = arith.constant 3 : index
      %134 = memref.load %arg3[%c3_84] : memref<99xf32, #tpu.memory_space<smem>>
      %c3_85 = arith.constant 3 : index
      %c0_86 = arith.constant 0 : index
      %c0_87 = arith.constant 0 : index
      %135 = vector.load %arg7[%c3_85, %c0_86, %c0_87] : memref<14x22x16xf32, #tpu.memory_space<vmem>>, vector<1x16x16xf32>
      %136 = vector.shape_cast %135 : vector<1x16x16xf32> to vector<16x16xf32>
      %137 = vector.broadcast %134 : f32 to vector<16x16xf32>
      %138 = arith.mulf %136, %137 : vector<16x16xf32>
      %139 = arith.addf %133, %138 : vector<16x16xf32>
      %c4_88 = arith.constant 4 : index
      %140 = memref.load %arg3[%c4_88] : memref<99xf32, #tpu.memory_space<smem>>
      %c4_89 = arith.constant 4 : index
      %c0_90 = arith.constant 0 : index
      %c0_91 = arith.constant 0 : index
      %141 = vector.load %arg7[%c4_89, %c0_90, %c0_91] : memref<14x22x16xf32, #tpu.memory_space<vmem>>, vector<1x16x16xf32>
      %142 = vector.shape_cast %141 : vector<1x16x16xf32> to vector<16x16xf32>
      %143 = vector.broadcast %140 : f32 to vector<16x16xf32>
      %144 = arith.mulf %142, %143 : vector<16x16xf32>
      %145 = arith.addf %139, %144 : vector<16x16xf32>
      %c5_92 = arith.constant 5 : index
      %146 = memref.load %arg3[%c5_92] : memref<99xf32, #tpu.memory_space<smem>>
      %c5_93 = arith.constant 5 : index
      %c0_94 = arith.constant 0 : index
      %c0_95 = arith.constant 0 : index
      %147 = vector.load %arg7[%c5_93, %c0_94, %c0_95] : memref<14x22x16xf32, #tpu.memory_space<vmem>>, vector<1x16x16xf32>
      %148 = vector.shape_cast %147 : vector<1x16x16xf32> to vector<16x16xf32>
      %149 = vector.broadcast %146 : f32 to vector<16x16xf32>
      %150 = arith.mulf %148, %149 : vector<16x16xf32>
      %151 = arith.addf %145, %150 : vector<16x16xf32>
      %c6_96 = arith.constant 6 : index
      %152 = memref.load %arg3[%c6_96] : memref<99xf32, #tpu.memory_space<smem>>
      %c6_97 = arith.constant 6 : index
      %c0_98 = arith.constant 0 : index
      %c0_99 = arith.constant 0 : index
      %153 = vector.load %arg7[%c6_97, %c0_98, %c0_99] : memref<14x22x16xf32, #tpu.memory_space<vmem>>, vector<1x16x16xf32>
      %154 = vector.shape_cast %153 : vector<1x16x16xf32> to vector<16x16xf32>
      %155 = vector.broadcast %152 : f32 to vector<16x16xf32>
      %156 = arith.mulf %154, %155 : vector<16x16xf32>
      %157 = arith.addf %151, %156 : vector<16x16xf32>
      %c7_100 = arith.constant 7 : index
      %158 = memref.load %arg3[%c7_100] : memref<99xf32, #tpu.memory_space<smem>>
      %c0_101 = arith.constant 0 : index
      %c1_102 = arith.constant 1 : index
      %c0_103 = arith.constant 0 : index
      %159 = vector.load %arg7[%c0_101, %c1_102, %c0_103] : memref<14x22x16xf32, #tpu.memory_space<vmem>>, vector<1x16x16xf32>
      %160 = vector.shape_cast %159 : vector<1x16x16xf32> to vector<16x16xf32>
      %161 = vector.broadcast %158 : f32 to vector<16x16xf32>
      %162 = arith.mulf %160, %161 : vector<16x16xf32>
      %163 = arith.addf %157, %162 : vector<16x16xf32>
      %c8_104 = arith.constant 8 : index
      %164 = memref.load %arg3[%c8_104] : memref<99xf32, #tpu.memory_space<smem>>
      %c1_105 = arith.constant 1 : index
      %c1_106 = arith.constant 1 : index
      %c0_107 = arith.constant 0 : index
      %165 = vector.load %arg7[%c1_105, %c1_106, %c0_107] : memref<14x22x16xf32, #tpu.memory_space<vmem>>, vector<1x16x16xf32>
      %166 = vector.shape_cast %165 : vector<1x16x16xf32> to vector<16x16xf32>
      %167 = vector.broadcast %164 : f32 to vector<16x16xf32>
      %168 = arith.mulf %166, %167 : vector<16x16xf32>
      %169 = arith.addf %163, %168 : vector<16x16xf32>
      %c9_108 = arith.constant 9 : index
      %170 = memref.load %arg3[%c9_108] : memref<99xf32, #tpu.memory_space<smem>>
      %c2_109 = arith.constant 2 : index
      %c1_110 = arith.constant 1 : index
      %c0_111 = arith.constant 0 : index
      %171 = vector.load %arg7[%c2_109, %c1_110, %c0_111] : memref<14x22x16xf32, #tpu.memory_space<vmem>>, vector<1x16x16xf32>
      %172 = vector.shape_cast %171 : vector<1x16x16xf32> to vector<16x16xf32>
      %173 = vector.broadcast %170 : f32 to vector<16x16xf32>
      %174 = arith.mulf %172, %173 : vector<16x16xf32>
      %175 = arith.addf %169, %174 : vector<16x16xf32>
      %c10_112 = arith.constant 10 : index
      %176 = memref.load %arg3[%c10_112] : memref<99xf32, #tpu.memory_space<smem>>
      %c3_113 = arith.constant 3 : index
      %c1_114 = arith.constant 1 : index
      %c0_115 = arith.constant 0 : index
      %177 = vector.load %arg7[%c3_113, %c1_114, %c0_115] : memref<14x22x16xf32, #tpu.memory_space<vmem>>, vector<1x16x16xf32>
      %178 = vector.shape_cast %177 : vector<1x16x16xf32> to vector<16x16xf32>
      %179 = vector.broadcast %176 : f32 to vector<16x16xf32>
      %180 = arith.mulf %178, %179 : vector<16x16xf32>
      %181 = arith.addf %175, %180 : vector<16x16xf32>
      %c11_116 = arith.constant 11 : index
      %182 = memref.load %arg3[%c11_116] : memref<99xf32, #tpu.memory_space<smem>>
      %c4_117 = arith.constant 4 : index
      %c1_118 = arith.constant 1 : index
      %c0_119 = arith.constant 0 : index
      %183 = vector.load %arg7[%c4_117, %c1_118, %c0_119] : memref<14x22x16xf32, #tpu.memory_space<vmem>>, vector<1x16x16xf32>
      %184 = vector.shape_cast %183 : vector<1x16x16xf32> to vector<16x16xf32>
      %185 = vector.broadcast %182 : f32 to vector<16x16xf32>
      %186 = arith.mulf %184, %185 : vector<16x16xf32>
      %187 = arith.addf %181, %186 : vector<16x16xf32>
      %c12_120 = arith.constant 12 : index
      %188 = memref.load %arg3[%c12_120] : memref<99xf32, #tpu.memory_space<smem>>
      %c5_121 = arith.constant 5 : index
      %c1_122 = arith.constant 1 : index
      %c0_123 = arith.constant 0 : index
      %189 = vector.load %arg7[%c5_121, %c1_122, %c0_123] : memref<14x22x16xf32, #tpu.memory_space<vmem>>, vector<1x16x16xf32>
      %190 = vector.shape_cast %189 : vector<1x16x16xf32> to vector<16x16xf32>
      %191 = vector.broadcast %188 : f32 to vector<16x16xf32>
      %192 = arith.mulf %190, %191 : vector<16x16xf32>
      %193 = arith.addf %187, %192 : vector<16x16xf32>
      %c13_124 = arith.constant 13 : index
      %194 = memref.load %arg3[%c13_124] : memref<99xf32, #tpu.memory_space<smem>>
      %c6_125 = arith.constant 6 : index
      %c1_126 = arith.constant 1 : index
      %c0_127 = arith.constant 0 : index
      %195 = vector.load %arg7[%c6_125, %c1_126, %c0_127] : memref<14x22x16xf32, #tpu.memory_space<vmem>>, vector<1x16x16xf32>
      %196 = vector.shape_cast %195 : vector<1x16x16xf32> to vector<16x16xf32>
      %197 = vector.broadcast %194 : f32 to vector<16x16xf32>
      %198 = arith.mulf %196, %197 : vector<16x16xf32>
      %199 = arith.addf %193, %198 : vector<16x16xf32>
      %c14 = arith.constant 14 : index
      %200 = memref.load %arg3[%c14] : memref<99xf32, #tpu.memory_space<smem>>
      %c0_128 = arith.constant 0 : index
      %c2_129 = arith.constant 2 : index
      %c0_130 = arith.constant 0 : index
      %201 = vector.load %arg7[%c0_128, %c2_129, %c0_130] : memref<14x22x16xf32, #tpu.memory_space<vmem>>, vector<1x16x16xf32>
      %202 = vector.shape_cast %201 : vector<1x16x16xf32> to vector<16x16xf32>
      %203 = vector.broadcast %200 : f32 to vector<16x16xf32>
      %204 = arith.mulf %202, %203 : vector<16x16xf32>
      %205 = arith.addf %199, %204 : vector<16x16xf32>
      %c15 = arith.constant 15 : index
      %206 = memref.load %arg3[%c15] : memref<99xf32, #tpu.memory_space<smem>>
      %c1_131 = arith.constant 1 : index
      %c2_132 = arith.constant 2 : index
      %c0_133 = arith.constant 0 : index
      %207 = vector.load %arg7[%c1_131, %c2_132, %c0_133] : memref<14x22x16xf32, #tpu.memory_space<vmem>>, vector<1x16x16xf32>
      %208 = vector.shape_cast %207 : vector<1x16x16xf32> to vector<16x16xf32>
      %209 = vector.broadcast %206 : f32 to vector<16x16xf32>
      %210 = arith.mulf %208, %209 : vector<16x16xf32>
      %211 = arith.addf %205, %210 : vector<16x16xf32>
      %c16 = arith.constant 16 : index
      %212 = memref.load %arg3[%c16] : memref<99xf32, #tpu.memory_space<smem>>
      %c2_134 = arith.constant 2 : index
      %c2_135 = arith.constant 2 : index
      %c0_136 = arith.constant 0 : index
      %213 = vector.load %arg7[%c2_134, %c2_135, %c0_136] : memref<14x22x16xf32, #tpu.memory_space<vmem>>, vector<1x16x16xf32>
      %214 = vector.shape_cast %213 : vector<1x16x16xf32> to vector<16x16xf32>
      %215 = vector.broadcast %212 : f32 to vector<16x16xf32>
      %216 = arith.mulf %214, %215 : vector<16x16xf32>
      %217 = arith.addf %211, %216 : vector<16x16xf32>
      %c17 = arith.constant 17 : index
      %218 = memref.load %arg3[%c17] : memref<99xf32, #tpu.memory_space<smem>>
      %c3_137 = arith.constant 3 : index
      %c2_138 = arith.constant 2 : index
      %c0_139 = arith.constant 0 : index
      %219 = vector.load %arg7[%c3_137, %c2_138, %c0_139] : memref<14x22x16xf32, #tpu.memory_space<vmem>>, vector<1x16x16xf32>
      %220 = vector.shape_cast %219 : vector<1x16x16xf32> to vector<16x16xf32>
      %221 = vector.broadcast %218 : f32 to vector<16x16xf32>
      %222 = arith.mulf %220, %221 : vector<16x16xf32>
      %223 = arith.addf %217, %222 : vector<16x16xf32>
      %c18 = arith.constant 18 : index
      %224 = memref.load %arg3[%c18] : memref<99xf32, #tpu.memory_space<smem>>
      %c4_140 = arith.constant 4 : index
      %c2_141 = arith.constant 2 : index
      %c0_142 = arith.constant 0 : index
      %225 = vector.load %arg7[%c4_140, %c2_141, %c0_142] : memref<14x22x16xf32, #tpu.memory_space<vmem>>, vector<1x16x16xf32>
      %226 = vector.shape_cast %225 : vector<1x16x16xf32> to vector<16x16xf32>
      %227 = vector.broadcast %224 : f32 to vector<16x16xf32>
      %228 = arith.mulf %226, %227 : vector<16x16xf32>
      %229 = arith.addf %223, %228 : vector<16x16xf32>
      %c19 = arith.constant 19 : index
      %230 = memref.load %arg3[%c19] : memref<99xf32, #tpu.memory_space<smem>>
      %c5_143 = arith.constant 5 : index
      %c2_144 = arith.constant 2 : index
      %c0_145 = arith.constant 0 : index
      %231 = vector.load %arg7[%c5_143, %c2_144, %c0_145] : memref<14x22x16xf32, #tpu.memory_space<vmem>>, vector<1x16x16xf32>
      %232 = vector.shape_cast %231 : vector<1x16x16xf32> to vector<16x16xf32>
      %233 = vector.broadcast %230 : f32 to vector<16x16xf32>
      %234 = arith.mulf %232, %233 : vector<16x16xf32>
      %235 = arith.addf %229, %234 : vector<16x16xf32>
      %c20 = arith.constant 20 : index
      %236 = memref.load %arg3[%c20] : memref<99xf32, #tpu.memory_space<smem>>
      %c6_146 = arith.constant 6 : index
      %c2_147 = arith.constant 2 : index
      %c0_148 = arith.constant 0 : index
      %237 = vector.load %arg7[%c6_146, %c2_147, %c0_148] : memref<14x22x16xf32, #tpu.memory_space<vmem>>, vector<1x16x16xf32>
      %238 = vector.shape_cast %237 : vector<1x16x16xf32> to vector<16x16xf32>
      %239 = vector.broadcast %236 : f32 to vector<16x16xf32>
      %240 = arith.mulf %238, %239 : vector<16x16xf32>
      %241 = arith.addf %235, %240 : vector<16x16xf32>
      %c21 = arith.constant 21 : index
      %242 = memref.load %arg3[%c21] : memref<99xf32, #tpu.memory_space<smem>>
      %c0_149 = arith.constant 0 : index
      %c3_150 = arith.constant 3 : index
      %c0_151 = arith.constant 0 : index
      %243 = vector.load %arg7[%c0_149, %c3_150, %c0_151] : memref<14x22x16xf32, #tpu.memory_space<vmem>>, vector<1x16x16xf32>
      %244 = vector.shape_cast %243 : vector<1x16x16xf32> to vector<16x16xf32>
      %245 = vector.broadcast %242 : f32 to vector<16x16xf32>
      %246 = arith.mulf %244, %245 : vector<16x16xf32>
      %247 = arith.addf %241, %246 : vector<16x16xf32>
      %c22 = arith.constant 22 : index
      %248 = memref.load %arg3[%c22] : memref<99xf32, #tpu.memory_space<smem>>
      %c1_152 = arith.constant 1 : index
      %c3_153 = arith.constant 3 : index
      %c0_154 = arith.constant 0 : index
      %249 = vector.load %arg7[%c1_152, %c3_153, %c0_154] : memref<14x22x16xf32, #tpu.memory_space<vmem>>, vector<1x16x16xf32>
      %250 = vector.shape_cast %249 : vector<1x16x16xf32> to vector<16x16xf32>
      %251 = vector.broadcast %248 : f32 to vector<16x16xf32>
      %252 = arith.mulf %250, %251 : vector<16x16xf32>
      %253 = arith.addf %247, %252 : vector<16x16xf32>
      %c23 = arith.constant 23 : index
      %254 = memref.load %arg3[%c23] : memref<99xf32, #tpu.memory_space<smem>>
      %c2_155 = arith.constant 2 : index
      %c3_156 = arith.constant 3 : index
      %c0_157 = arith.constant 0 : index
      %255 = vector.load %arg7[%c2_155, %c3_156, %c0_157] : memref<14x22x16xf32, #tpu.memory_space<vmem>>, vector<1x16x16xf32>
      %256 = vector.shape_cast %255 : vector<1x16x16xf32> to vector<16x16xf32>
      %257 = vector.broadcast %254 : f32 to vector<16x16xf32>
      %258 = arith.mulf %256, %257 : vector<16x16xf32>
      %259 = arith.addf %253, %258 : vector<16x16xf32>
      %c24 = arith.constant 24 : index
      %260 = memref.load %arg3[%c24] : memref<99xf32, #tpu.memory_space<smem>>
      %c3_158 = arith.constant 3 : index
      %c3_159 = arith.constant 3 : index
      %c0_160 = arith.constant 0 : index
      %261 = vector.load %arg7[%c3_158, %c3_159, %c0_160] : memref<14x22x16xf32, #tpu.memory_space<vmem>>, vector<1x16x16xf32>
      %262 = vector.shape_cast %261 : vector<1x16x16xf32> to vector<16x16xf32>
      %263 = vector.broadcast %260 : f32 to vector<16x16xf32>
      %264 = arith.mulf %262, %263 : vector<16x16xf32>
      %265 = arith.addf %259, %264 : vector<16x16xf32>
      %c25 = arith.constant 25 : index
      %266 = memref.load %arg3[%c25] : memref<99xf32, #tpu.memory_space<smem>>
      %c4_161 = arith.constant 4 : index
      %c3_162 = arith.constant 3 : index
      %c0_163 = arith.constant 0 : index
      %267 = vector.load %arg7[%c4_161, %c3_162, %c0_163] : memref<14x22x16xf32, #tpu.memory_space<vmem>>, vector<1x16x16xf32>
      %268 = vector.shape_cast %267 : vector<1x16x16xf32> to vector<16x16xf32>
      %269 = vector.broadcast %266 : f32 to vector<16x16xf32>
      %270 = arith.mulf %268, %269 : vector<16x16xf32>
      %271 = arith.addf %265, %270 : vector<16x16xf32>
      %c26 = arith.constant 26 : index
      %272 = memref.load %arg3[%c26] : memref<99xf32, #tpu.memory_space<smem>>
      %c5_164 = arith.constant 5 : index
      %c3_165 = arith.constant 3 : index
      %c0_166 = arith.constant 0 : index
      %273 = vector.load %arg7[%c5_164, %c3_165, %c0_166] : memref<14x22x16xf32, #tpu.memory_space<vmem>>, vector<1x16x16xf32>
      %274 = vector.shape_cast %273 : vector<1x16x16xf32> to vector<16x16xf32>
      %275 = vector.broadcast %272 : f32 to vector<16x16xf32>
      %276 = arith.mulf %274, %275 : vector<16x16xf32>
      %277 = arith.addf %271, %276 : vector<16x16xf32>
      %c27 = arith.constant 27 : index
      %278 = memref.load %arg3[%c27] : memref<99xf32, #tpu.memory_space<smem>>
      %c6_167 = arith.constant 6 : index
      %c3_168 = arith.constant 3 : index
      %c0_169 = arith.constant 0 : index
      %279 = vector.load %arg7[%c6_167, %c3_168, %c0_169] : memref<14x22x16xf32, #tpu.memory_space<vmem>>, vector<1x16x16xf32>
      %280 = vector.shape_cast %279 : vector<1x16x16xf32> to vector<16x16xf32>
      %281 = vector.broadcast %278 : f32 to vector<16x16xf32>
      %282 = arith.mulf %280, %281 : vector<16x16xf32>
      %283 = arith.addf %277, %282 : vector<16x16xf32>
      %c28 = arith.constant 28 : index
      %284 = memref.load %arg3[%c28] : memref<99xf32, #tpu.memory_space<smem>>
      %c0_170 = arith.constant 0 : index
      %c4_171 = arith.constant 4 : index
      %c0_172 = arith.constant 0 : index
      %285 = vector.load %arg7[%c0_170, %c4_171, %c0_172] : memref<14x22x16xf32, #tpu.memory_space<vmem>>, vector<1x16x16xf32>
      %286 = vector.shape_cast %285 : vector<1x16x16xf32> to vector<16x16xf32>
      %287 = vector.broadcast %284 : f32 to vector<16x16xf32>
      %288 = arith.mulf %286, %287 : vector<16x16xf32>
      %289 = arith.addf %283, %288 : vector<16x16xf32>
      %c29 = arith.constant 29 : index
      %290 = memref.load %arg3[%c29] : memref<99xf32, #tpu.memory_space<smem>>
      %c1_173 = arith.constant 1 : index
      %c4_174 = arith.constant 4 : index
      %c0_175 = arith.constant 0 : index
      %291 = vector.load %arg7[%c1_173, %c4_174, %c0_175] : memref<14x22x16xf32, #tpu.memory_space<vmem>>, vector<1x16x16xf32>
      %292 = vector.shape_cast %291 : vector<1x16x16xf32> to vector<16x16xf32>
      %293 = vector.broadcast %290 : f32 to vector<16x16xf32>
      %294 = arith.mulf %292, %293 : vector<16x16xf32>
      %295 = arith.addf %289, %294 : vector<16x16xf32>
      %c30 = arith.constant 30 : index
      %296 = memref.load %arg3[%c30] : memref<99xf32, #tpu.memory_space<smem>>
      %c2_176 = arith.constant 2 : index
      %c4_177 = arith.constant 4 : index
      %c0_178 = arith.constant 0 : index
      %297 = vector.load %arg7[%c2_176, %c4_177, %c0_178] : memref<14x22x16xf32, #tpu.memory_space<vmem>>, vector<1x16x16xf32>
      %298 = vector.shape_cast %297 : vector<1x16x16xf32> to vector<16x16xf32>
      %299 = vector.broadcast %296 : f32 to vector<16x16xf32>
      %300 = arith.mulf %298, %299 : vector<16x16xf32>
      %301 = arith.addf %295, %300 : vector<16x16xf32>
      %c31 = arith.constant 31 : index
      %302 = memref.load %arg3[%c31] : memref<99xf32, #tpu.memory_space<smem>>
      %c3_179 = arith.constant 3 : index
      %c4_180 = arith.constant 4 : index
      %c0_181 = arith.constant 0 : index
      %303 = vector.load %arg7[%c3_179, %c4_180, %c0_181] : memref<14x22x16xf32, #tpu.memory_space<vmem>>, vector<1x16x16xf32>
      %304 = vector.shape_cast %303 : vector<1x16x16xf32> to vector<16x16xf32>
      %305 = vector.broadcast %302 : f32 to vector<16x16xf32>
      %306 = arith.mulf %304, %305 : vector<16x16xf32>
      %307 = arith.addf %301, %306 : vector<16x16xf32>
      %c32 = arith.constant 32 : index
      %308 = memref.load %arg3[%c32] : memref<99xf32, #tpu.memory_space<smem>>
      %c4_182 = arith.constant 4 : index
      %c4_183 = arith.constant 4 : index
      %c0_184 = arith.constant 0 : index
      %309 = vector.load %arg7[%c4_182, %c4_183, %c0_184] : memref<14x22x16xf32, #tpu.memory_space<vmem>>, vector<1x16x16xf32>
      %310 = vector.shape_cast %309 : vector<1x16x16xf32> to vector<16x16xf32>
      %311 = vector.broadcast %308 : f32 to vector<16x16xf32>
      %312 = arith.mulf %310, %311 : vector<16x16xf32>
      %313 = arith.addf %307, %312 : vector<16x16xf32>
      %c33 = arith.constant 33 : index
      %314 = memref.load %arg3[%c33] : memref<99xf32, #tpu.memory_space<smem>>
      %c5_185 = arith.constant 5 : index
      %c4_186 = arith.constant 4 : index
      %c0_187 = arith.constant 0 : index
      %315 = vector.load %arg7[%c5_185, %c4_186, %c0_187] : memref<14x22x16xf32, #tpu.memory_space<vmem>>, vector<1x16x16xf32>
      %316 = vector.shape_cast %315 : vector<1x16x16xf32> to vector<16x16xf32>
      %317 = vector.broadcast %314 : f32 to vector<16x16xf32>
      %318 = arith.mulf %316, %317 : vector<16x16xf32>
      %319 = arith.addf %313, %318 : vector<16x16xf32>
      %c34 = arith.constant 34 : index
      %320 = memref.load %arg3[%c34] : memref<99xf32, #tpu.memory_space<smem>>
      %c6_188 = arith.constant 6 : index
      %c4_189 = arith.constant 4 : index
      %c0_190 = arith.constant 0 : index
      %321 = vector.load %arg7[%c6_188, %c4_189, %c0_190] : memref<14x22x16xf32, #tpu.memory_space<vmem>>, vector<1x16x16xf32>
      %322 = vector.shape_cast %321 : vector<1x16x16xf32> to vector<16x16xf32>
      %323 = vector.broadcast %320 : f32 to vector<16x16xf32>
      %324 = arith.mulf %322, %323 : vector<16x16xf32>
      %325 = arith.addf %319, %324 : vector<16x16xf32>
      %c35 = arith.constant 35 : index
      %326 = memref.load %arg3[%c35] : memref<99xf32, #tpu.memory_space<smem>>
      %c0_191 = arith.constant 0 : index
      %c5_192 = arith.constant 5 : index
      %c0_193 = arith.constant 0 : index
      %327 = vector.load %arg7[%c0_191, %c5_192, %c0_193] : memref<14x22x16xf32, #tpu.memory_space<vmem>>, vector<1x16x16xf32>
      %328 = vector.shape_cast %327 : vector<1x16x16xf32> to vector<16x16xf32>
      %329 = vector.broadcast %326 : f32 to vector<16x16xf32>
      %330 = arith.mulf %328, %329 : vector<16x16xf32>
      %331 = arith.addf %325, %330 : vector<16x16xf32>
      %c36 = arith.constant 36 : index
      %332 = memref.load %arg3[%c36] : memref<99xf32, #tpu.memory_space<smem>>
      %c1_194 = arith.constant 1 : index
      %c5_195 = arith.constant 5 : index
      %c0_196 = arith.constant 0 : index
      %333 = vector.load %arg7[%c1_194, %c5_195, %c0_196] : memref<14x22x16xf32, #tpu.memory_space<vmem>>, vector<1x16x16xf32>
      %334 = vector.shape_cast %333 : vector<1x16x16xf32> to vector<16x16xf32>
      %335 = vector.broadcast %332 : f32 to vector<16x16xf32>
      %336 = arith.mulf %334, %335 : vector<16x16xf32>
      %337 = arith.addf %331, %336 : vector<16x16xf32>
      %c37 = arith.constant 37 : index
      %338 = memref.load %arg3[%c37] : memref<99xf32, #tpu.memory_space<smem>>
      %c2_197 = arith.constant 2 : index
      %c5_198 = arith.constant 5 : index
      %c0_199 = arith.constant 0 : index
      %339 = vector.load %arg7[%c2_197, %c5_198, %c0_199] : memref<14x22x16xf32, #tpu.memory_space<vmem>>, vector<1x16x16xf32>
      %340 = vector.shape_cast %339 : vector<1x16x16xf32> to vector<16x16xf32>
      %341 = vector.broadcast %338 : f32 to vector<16x16xf32>
      %342 = arith.mulf %340, %341 : vector<16x16xf32>
      %343 = arith.addf %337, %342 : vector<16x16xf32>
      %c38 = arith.constant 38 : index
      %344 = memref.load %arg3[%c38] : memref<99xf32, #tpu.memory_space<smem>>
      %c3_200 = arith.constant 3 : index
      %c5_201 = arith.constant 5 : index
      %c0_202 = arith.constant 0 : index
      %345 = vector.load %arg7[%c3_200, %c5_201, %c0_202] : memref<14x22x16xf32, #tpu.memory_space<vmem>>, vector<1x16x16xf32>
      %346 = vector.shape_cast %345 : vector<1x16x16xf32> to vector<16x16xf32>
      %347 = vector.broadcast %344 : f32 to vector<16x16xf32>
      %348 = arith.mulf %346, %347 : vector<16x16xf32>
      %349 = arith.addf %343, %348 : vector<16x16xf32>
      %c39 = arith.constant 39 : index
      %350 = memref.load %arg3[%c39] : memref<99xf32, #tpu.memory_space<smem>>
      %c4_203 = arith.constant 4 : index
      %c5_204 = arith.constant 5 : index
      %c0_205 = arith.constant 0 : index
      %351 = vector.load %arg7[%c4_203, %c5_204, %c0_205] : memref<14x22x16xf32, #tpu.memory_space<vmem>>, vector<1x16x16xf32>
      %352 = vector.shape_cast %351 : vector<1x16x16xf32> to vector<16x16xf32>
      %353 = vector.broadcast %350 : f32 to vector<16x16xf32>
      %354 = arith.mulf %352, %353 : vector<16x16xf32>
      %355 = arith.addf %349, %354 : vector<16x16xf32>
      %c40 = arith.constant 40 : index
      %356 = memref.load %arg3[%c40] : memref<99xf32, #tpu.memory_space<smem>>
      %c5_206 = arith.constant 5 : index
      %c5_207 = arith.constant 5 : index
      %c0_208 = arith.constant 0 : index
      %357 = vector.load %arg7[%c5_206, %c5_207, %c0_208] : memref<14x22x16xf32, #tpu.memory_space<vmem>>, vector<1x16x16xf32>
      %358 = vector.shape_cast %357 : vector<1x16x16xf32> to vector<16x16xf32>
      %359 = vector.broadcast %356 : f32 to vector<16x16xf32>
      %360 = arith.mulf %358, %359 : vector<16x16xf32>
      %361 = arith.addf %355, %360 : vector<16x16xf32>
      %c41 = arith.constant 41 : index
      %362 = memref.load %arg3[%c41] : memref<99xf32, #tpu.memory_space<smem>>
      %c6_209 = arith.constant 6 : index
      %c5_210 = arith.constant 5 : index
      %c0_211 = arith.constant 0 : index
      %363 = vector.load %arg7[%c6_209, %c5_210, %c0_211] : memref<14x22x16xf32, #tpu.memory_space<vmem>>, vector<1x16x16xf32>
      %364 = vector.shape_cast %363 : vector<1x16x16xf32> to vector<16x16xf32>
      %365 = vector.broadcast %362 : f32 to vector<16x16xf32>
      %366 = arith.mulf %364, %365 : vector<16x16xf32>
      %367 = arith.addf %361, %366 : vector<16x16xf32>
      %c42 = arith.constant 42 : index
      %368 = memref.load %arg3[%c42] : memref<99xf32, #tpu.memory_space<smem>>
      %c0_212 = arith.constant 0 : index
      %c6_213 = arith.constant 6 : index
      %c0_214 = arith.constant 0 : index
      %369 = vector.load %arg7[%c0_212, %c6_213, %c0_214] : memref<14x22x16xf32, #tpu.memory_space<vmem>>, vector<1x16x16xf32>
      %370 = vector.shape_cast %369 : vector<1x16x16xf32> to vector<16x16xf32>
      %371 = vector.broadcast %368 : f32 to vector<16x16xf32>
      %372 = arith.mulf %370, %371 : vector<16x16xf32>
      %373 = arith.addf %367, %372 : vector<16x16xf32>
      %c43 = arith.constant 43 : index
      %374 = memref.load %arg3[%c43] : memref<99xf32, #tpu.memory_space<smem>>
      %c1_215 = arith.constant 1 : index
      %c6_216 = arith.constant 6 : index
      %c0_217 = arith.constant 0 : index
      %375 = vector.load %arg7[%c1_215, %c6_216, %c0_217] : memref<14x22x16xf32, #tpu.memory_space<vmem>>, vector<1x16x16xf32>
      %376 = vector.shape_cast %375 : vector<1x16x16xf32> to vector<16x16xf32>
      %377 = vector.broadcast %374 : f32 to vector<16x16xf32>
      %378 = arith.mulf %376, %377 : vector<16x16xf32>
      %379 = arith.addf %373, %378 : vector<16x16xf32>
      %c44 = arith.constant 44 : index
      %380 = memref.load %arg3[%c44] : memref<99xf32, #tpu.memory_space<smem>>
      %c2_218 = arith.constant 2 : index
      %c6_219 = arith.constant 6 : index
      %c0_220 = arith.constant 0 : index
      %381 = vector.load %arg7[%c2_218, %c6_219, %c0_220] : memref<14x22x16xf32, #tpu.memory_space<vmem>>, vector<1x16x16xf32>
      %382 = vector.shape_cast %381 : vector<1x16x16xf32> to vector<16x16xf32>
      %383 = vector.broadcast %380 : f32 to vector<16x16xf32>
      %384 = arith.mulf %382, %383 : vector<16x16xf32>
      %385 = arith.addf %379, %384 : vector<16x16xf32>
      %c45 = arith.constant 45 : index
      %386 = memref.load %arg3[%c45] : memref<99xf32, #tpu.memory_space<smem>>
      %c3_221 = arith.constant 3 : index
      %c6_222 = arith.constant 6 : index
      %c0_223 = arith.constant 0 : index
      %387 = vector.load %arg7[%c3_221, %c6_222, %c0_223] : memref<14x22x16xf32, #tpu.memory_space<vmem>>, vector<1x16x16xf32>
      %388 = vector.shape_cast %387 : vector<1x16x16xf32> to vector<16x16xf32>
      %389 = vector.broadcast %386 : f32 to vector<16x16xf32>
      %390 = arith.mulf %388, %389 : vector<16x16xf32>
      %391 = arith.addf %385, %390 : vector<16x16xf32>
      %c46 = arith.constant 46 : index
      %392 = memref.load %arg3[%c46] : memref<99xf32, #tpu.memory_space<smem>>
      %c4_224 = arith.constant 4 : index
      %c6_225 = arith.constant 6 : index
      %c0_226 = arith.constant 0 : index
      %393 = vector.load %arg7[%c4_224, %c6_225, %c0_226] : memref<14x22x16xf32, #tpu.memory_space<vmem>>, vector<1x16x16xf32>
      %394 = vector.shape_cast %393 : vector<1x16x16xf32> to vector<16x16xf32>
      %395 = vector.broadcast %392 : f32 to vector<16x16xf32>
      %396 = arith.mulf %394, %395 : vector<16x16xf32>
      %397 = arith.addf %391, %396 : vector<16x16xf32>
      %c47 = arith.constant 47 : index
      %398 = memref.load %arg3[%c47] : memref<99xf32, #tpu.memory_space<smem>>
      %c5_227 = arith.constant 5 : index
      %c6_228 = arith.constant 6 : index
      %c0_229 = arith.constant 0 : index
      %399 = vector.load %arg7[%c5_227, %c6_228, %c0_229] : memref<14x22x16xf32, #tpu.memory_space<vmem>>, vector<1x16x16xf32>
      %400 = vector.shape_cast %399 : vector<1x16x16xf32> to vector<16x16xf32>
      %401 = vector.broadcast %398 : f32 to vector<16x16xf32>
      %402 = arith.mulf %400, %401 : vector<16x16xf32>
      %403 = arith.addf %397, %402 : vector<16x16xf32>
      %c48 = arith.constant 48 : index
      %404 = memref.load %arg3[%c48] : memref<99xf32, #tpu.memory_space<smem>>
      %c6_230 = arith.constant 6 : index
      %c6_231 = arith.constant 6 : index
      %c0_232 = arith.constant 0 : index
      %405 = vector.load %arg7[%c6_230, %c6_231, %c0_232] : memref<14x22x16xf32, #tpu.memory_space<vmem>>, vector<1x16x16xf32>
      %406 = vector.shape_cast %405 : vector<1x16x16xf32> to vector<16x16xf32>
      %407 = vector.broadcast %404 : f32 to vector<16x16xf32>
      %408 = arith.mulf %406, %407 : vector<16x16xf32>
      %409 = arith.addf %403, %408 : vector<16x16xf32>
      %c49 = arith.constant 49 : index
      %410 = memref.load %arg3[%c49] : memref<99xf32, #tpu.memory_space<smem>>
      %c7_233 = arith.constant 7 : index
      %c0_234 = arith.constant 0 : index
      %c0_235 = arith.constant 0 : index
      %411 = vector.load %arg7[%c7_233, %c0_234, %c0_235] : memref<14x22x16xf32, #tpu.memory_space<vmem>>, vector<1x16x16xf32>
      %412 = vector.shape_cast %411 : vector<1x16x16xf32> to vector<16x16xf32>
      %413 = vector.broadcast %410 : f32 to vector<16x16xf32>
      %414 = arith.mulf %412, %413 : vector<16x16xf32>
      %415 = arith.addf %409, %414 : vector<16x16xf32>
      %c50 = arith.constant 50 : index
      %416 = memref.load %arg3[%c50] : memref<99xf32, #tpu.memory_space<smem>>
      %c8_236 = arith.constant 8 : index
      %c0_237 = arith.constant 0 : index
      %c0_238 = arith.constant 0 : index
      %417 = vector.load %arg7[%c8_236, %c0_237, %c0_238] : memref<14x22x16xf32, #tpu.memory_space<vmem>>, vector<1x16x16xf32>
      %418 = vector.shape_cast %417 : vector<1x16x16xf32> to vector<16x16xf32>
      %419 = vector.broadcast %416 : f32 to vector<16x16xf32>
      %420 = arith.mulf %418, %419 : vector<16x16xf32>
      %421 = arith.addf %415, %420 : vector<16x16xf32>
      %c51 = arith.constant 51 : index
      %422 = memref.load %arg3[%c51] : memref<99xf32, #tpu.memory_space<smem>>
      %c9_239 = arith.constant 9 : index
      %c0_240 = arith.constant 0 : index
      %c0_241 = arith.constant 0 : index
      %423 = vector.load %arg7[%c9_239, %c0_240, %c0_241] : memref<14x22x16xf32, #tpu.memory_space<vmem>>, vector<1x16x16xf32>
      %424 = vector.shape_cast %423 : vector<1x16x16xf32> to vector<16x16xf32>
      %425 = vector.broadcast %422 : f32 to vector<16x16xf32>
      %426 = arith.mulf %424, %425 : vector<16x16xf32>
      %427 = arith.addf %421, %426 : vector<16x16xf32>
      %c52 = arith.constant 52 : index
      %428 = memref.load %arg3[%c52] : memref<99xf32, #tpu.memory_space<smem>>
      %c10_242 = arith.constant 10 : index
      %c0_243 = arith.constant 0 : index
      %c0_244 = arith.constant 0 : index
      %429 = vector.load %arg7[%c10_242, %c0_243, %c0_244] : memref<14x22x16xf32, #tpu.memory_space<vmem>>, vector<1x16x16xf32>
      %430 = vector.shape_cast %429 : vector<1x16x16xf32> to vector<16x16xf32>
      %431 = vector.broadcast %428 : f32 to vector<16x16xf32>
      %432 = arith.mulf %430, %431 : vector<16x16xf32>
      %433 = arith.addf %427, %432 : vector<16x16xf32>
      %c53 = arith.constant 53 : index
      %434 = memref.load %arg3[%c53] : memref<99xf32, #tpu.memory_space<smem>>
      %c11_245 = arith.constant 11 : index
      %c0_246 = arith.constant 0 : index
      %c0_247 = arith.constant 0 : index
      %435 = vector.load %arg7[%c11_245, %c0_246, %c0_247] : memref<14x22x16xf32, #tpu.memory_space<vmem>>, vector<1x16x16xf32>
      %436 = vector.shape_cast %435 : vector<1x16x16xf32> to vector<16x16xf32>
      %437 = vector.broadcast %434 : f32 to vector<16x16xf32>
      %438 = arith.mulf %436, %437 : vector<16x16xf32>
      %439 = arith.addf %433, %438 : vector<16x16xf32>
      %c54 = arith.constant 54 : index
      %440 = memref.load %arg3[%c54] : memref<99xf32, #tpu.memory_space<smem>>
      %c12_248 = arith.constant 12 : index
      %c0_249 = arith.constant 0 : index
      %c0_250 = arith.constant 0 : index
      %441 = vector.load %arg7[%c12_248, %c0_249, %c0_250] : memref<14x22x16xf32, #tpu.memory_space<vmem>>, vector<1x16x16xf32>
      %442 = vector.shape_cast %441 : vector<1x16x16xf32> to vector<16x16xf32>
      %443 = vector.broadcast %440 : f32 to vector<16x16xf32>
      %444 = arith.mulf %442, %443 : vector<16x16xf32>
      %445 = arith.addf %439, %444 : vector<16x16xf32>
      %c55 = arith.constant 55 : index
      %446 = memref.load %arg3[%c55] : memref<99xf32, #tpu.memory_space<smem>>
      %c13_251 = arith.constant 13 : index
      %c0_252 = arith.constant 0 : index
      %c0_253 = arith.constant 0 : index
      %447 = vector.load %arg7[%c13_251, %c0_252, %c0_253] : memref<14x22x16xf32, #tpu.memory_space<vmem>>, vector<1x16x16xf32>
      %448 = vector.shape_cast %447 : vector<1x16x16xf32> to vector<16x16xf32>
      %449 = vector.broadcast %446 : f32 to vector<16x16xf32>
      %450 = arith.mulf %448, %449 : vector<16x16xf32>
      %451 = arith.addf %445, %450 : vector<16x16xf32>
      %c56 = arith.constant 56 : index
      %452 = memref.load %arg3[%c56] : memref<99xf32, #tpu.memory_space<smem>>
      %c7_254 = arith.constant 7 : index
      %c1_255 = arith.constant 1 : index
      %c0_256 = arith.constant 0 : index
      %453 = vector.load %arg7[%c7_254, %c1_255, %c0_256] : memref<14x22x16xf32, #tpu.memory_space<vmem>>, vector<1x16x16xf32>
      %454 = vector.shape_cast %453 : vector<1x16x16xf32> to vector<16x16xf32>
      %455 = vector.broadcast %452 : f32 to vector<16x16xf32>
      %456 = arith.mulf %454, %455 : vector<16x16xf32>
      %457 = arith.addf %451, %456 : vector<16x16xf32>
      %c57 = arith.constant 57 : index
      %458 = memref.load %arg3[%c57] : memref<99xf32, #tpu.memory_space<smem>>
      %c8_257 = arith.constant 8 : index
      %c1_258 = arith.constant 1 : index
      %c0_259 = arith.constant 0 : index
      %459 = vector.load %arg7[%c8_257, %c1_258, %c0_259] : memref<14x22x16xf32, #tpu.memory_space<vmem>>, vector<1x16x16xf32>
      %460 = vector.shape_cast %459 : vector<1x16x16xf32> to vector<16x16xf32>
      %461 = vector.broadcast %458 : f32 to vector<16x16xf32>
      %462 = arith.mulf %460, %461 : vector<16x16xf32>
      %463 = arith.addf %457, %462 : vector<16x16xf32>
      %c58 = arith.constant 58 : index
      %464 = memref.load %arg3[%c58] : memref<99xf32, #tpu.memory_space<smem>>
      %c9_260 = arith.constant 9 : index
      %c1_261 = arith.constant 1 : index
      %c0_262 = arith.constant 0 : index
      %465 = vector.load %arg7[%c9_260, %c1_261, %c0_262] : memref<14x22x16xf32, #tpu.memory_space<vmem>>, vector<1x16x16xf32>
      %466 = vector.shape_cast %465 : vector<1x16x16xf32> to vector<16x16xf32>
      %467 = vector.broadcast %464 : f32 to vector<16x16xf32>
      %468 = arith.mulf %466, %467 : vector<16x16xf32>
      %469 = arith.addf %463, %468 : vector<16x16xf32>
      %c59 = arith.constant 59 : index
      %470 = memref.load %arg3[%c59] : memref<99xf32, #tpu.memory_space<smem>>
      %c10_263 = arith.constant 10 : index
      %c1_264 = arith.constant 1 : index
      %c0_265 = arith.constant 0 : index
      %471 = vector.load %arg7[%c10_263, %c1_264, %c0_265] : memref<14x22x16xf32, #tpu.memory_space<vmem>>, vector<1x16x16xf32>
      %472 = vector.shape_cast %471 : vector<1x16x16xf32> to vector<16x16xf32>
      %473 = vector.broadcast %470 : f32 to vector<16x16xf32>
      %474 = arith.mulf %472, %473 : vector<16x16xf32>
      %475 = arith.addf %469, %474 : vector<16x16xf32>
      %c60 = arith.constant 60 : index
      %476 = memref.load %arg3[%c60] : memref<99xf32, #tpu.memory_space<smem>>
      %c11_266 = arith.constant 11 : index
      %c1_267 = arith.constant 1 : index
      %c0_268 = arith.constant 0 : index
      %477 = vector.load %arg7[%c11_266, %c1_267, %c0_268] : memref<14x22x16xf32, #tpu.memory_space<vmem>>, vector<1x16x16xf32>
      %478 = vector.shape_cast %477 : vector<1x16x16xf32> to vector<16x16xf32>
      %479 = vector.broadcast %476 : f32 to vector<16x16xf32>
      %480 = arith.mulf %478, %479 : vector<16x16xf32>
      %481 = arith.addf %475, %480 : vector<16x16xf32>
      %c61 = arith.constant 61 : index
      %482 = memref.load %arg3[%c61] : memref<99xf32, #tpu.memory_space<smem>>
      %c12_269 = arith.constant 12 : index
      %c1_270 = arith.constant 1 : index
      %c0_271 = arith.constant 0 : index
      %483 = vector.load %arg7[%c12_269, %c1_270, %c0_271] : memref<14x22x16xf32, #tpu.memory_space<vmem>>, vector<1x16x16xf32>
      %484 = vector.shape_cast %483 : vector<1x16x16xf32> to vector<16x16xf32>
      %485 = vector.broadcast %482 : f32 to vector<16x16xf32>
      %486 = arith.mulf %484, %485 : vector<16x16xf32>
      %487 = arith.addf %481, %486 : vector<16x16xf32>
      %c62 = arith.constant 62 : index
      %488 = memref.load %arg3[%c62] : memref<99xf32, #tpu.memory_space<smem>>
      %c13_272 = arith.constant 13 : index
      %c1_273 = arith.constant 1 : index
      %c0_274 = arith.constant 0 : index
      %489 = vector.load %arg7[%c13_272, %c1_273, %c0_274] : memref<14x22x16xf32, #tpu.memory_space<vmem>>, vector<1x16x16xf32>
      %490 = vector.shape_cast %489 : vector<1x16x16xf32> to vector<16x16xf32>
      %491 = vector.broadcast %488 : f32 to vector<16x16xf32>
      %492 = arith.mulf %490, %491 : vector<16x16xf32>
      %493 = arith.addf %487, %492 : vector<16x16xf32>
      %c63 = arith.constant 63 : index
      %494 = memref.load %arg3[%c63] : memref<99xf32, #tpu.memory_space<smem>>
      %c7_275 = arith.constant 7 : index
      %c2_276 = arith.constant 2 : index
      %c0_277 = arith.constant 0 : index
      %495 = vector.load %arg7[%c7_275, %c2_276, %c0_277] : memref<14x22x16xf32, #tpu.memory_space<vmem>>, vector<1x16x16xf32>
      %496 = vector.shape_cast %495 : vector<1x16x16xf32> to vector<16x16xf32>
      %497 = vector.broadcast %494 : f32 to vector<16x16xf32>
      %498 = arith.mulf %496, %497 : vector<16x16xf32>
      %499 = arith.addf %493, %498 : vector<16x16xf32>
      %c64 = arith.constant 64 : index
      %500 = memref.load %arg3[%c64] : memref<99xf32, #tpu.memory_space<smem>>
      %c8_278 = arith.constant 8 : index
      %c2_279 = arith.constant 2 : index
      %c0_280 = arith.constant 0 : index
      %501 = vector.load %arg7[%c8_278, %c2_279, %c0_280] : memref<14x22x16xf32, #tpu.memory_space<vmem>>, vector<1x16x16xf32>
      %502 = vector.shape_cast %501 : vector<1x16x16xf32> to vector<16x16xf32>
      %503 = vector.broadcast %500 : f32 to vector<16x16xf32>
      %504 = arith.mulf %502, %503 : vector<16x16xf32>
      %505 = arith.addf %499, %504 : vector<16x16xf32>
      %c65 = arith.constant 65 : index
      %506 = memref.load %arg3[%c65] : memref<99xf32, #tpu.memory_space<smem>>
      %c9_281 = arith.constant 9 : index
      %c2_282 = arith.constant 2 : index
      %c0_283 = arith.constant 0 : index
      %507 = vector.load %arg7[%c9_281, %c2_282, %c0_283] : memref<14x22x16xf32, #tpu.memory_space<vmem>>, vector<1x16x16xf32>
      %508 = vector.shape_cast %507 : vector<1x16x16xf32> to vector<16x16xf32>
      %509 = vector.broadcast %506 : f32 to vector<16x16xf32>
      %510 = arith.mulf %508, %509 : vector<16x16xf32>
      %511 = arith.addf %505, %510 : vector<16x16xf32>
      %c66 = arith.constant 66 : index
      %512 = memref.load %arg3[%c66] : memref<99xf32, #tpu.memory_space<smem>>
      %c10_284 = arith.constant 10 : index
      %c2_285 = arith.constant 2 : index
      %c0_286 = arith.constant 0 : index
      %513 = vector.load %arg7[%c10_284, %c2_285, %c0_286] : memref<14x22x16xf32, #tpu.memory_space<vmem>>, vector<1x16x16xf32>
      %514 = vector.shape_cast %513 : vector<1x16x16xf32> to vector<16x16xf32>
      %515 = vector.broadcast %512 : f32 to vector<16x16xf32>
      %516 = arith.mulf %514, %515 : vector<16x16xf32>
      %517 = arith.addf %511, %516 : vector<16x16xf32>
      %c67 = arith.constant 67 : index
      %518 = memref.load %arg3[%c67] : memref<99xf32, #tpu.memory_space<smem>>
      %c11_287 = arith.constant 11 : index
      %c2_288 = arith.constant 2 : index
      %c0_289 = arith.constant 0 : index
      %519 = vector.load %arg7[%c11_287, %c2_288, %c0_289] : memref<14x22x16xf32, #tpu.memory_space<vmem>>, vector<1x16x16xf32>
      %520 = vector.shape_cast %519 : vector<1x16x16xf32> to vector<16x16xf32>
      %521 = vector.broadcast %518 : f32 to vector<16x16xf32>
      %522 = arith.mulf %520, %521 : vector<16x16xf32>
      %523 = arith.addf %517, %522 : vector<16x16xf32>
      %c68 = arith.constant 68 : index
      %524 = memref.load %arg3[%c68] : memref<99xf32, #tpu.memory_space<smem>>
      %c12_290 = arith.constant 12 : index
      %c2_291 = arith.constant 2 : index
      %c0_292 = arith.constant 0 : index
      %525 = vector.load %arg7[%c12_290, %c2_291, %c0_292] : memref<14x22x16xf32, #tpu.memory_space<vmem>>, vector<1x16x16xf32>
      %526 = vector.shape_cast %525 : vector<1x16x16xf32> to vector<16x16xf32>
      %527 = vector.broadcast %524 : f32 to vector<16x16xf32>
      %528 = arith.mulf %526, %527 : vector<16x16xf32>
      %529 = arith.addf %523, %528 : vector<16x16xf32>
      %c69 = arith.constant 69 : index
      %530 = memref.load %arg3[%c69] : memref<99xf32, #tpu.memory_space<smem>>
      %c13_293 = arith.constant 13 : index
      %c2_294 = arith.constant 2 : index
      %c0_295 = arith.constant 0 : index
      %531 = vector.load %arg7[%c13_293, %c2_294, %c0_295] : memref<14x22x16xf32, #tpu.memory_space<vmem>>, vector<1x16x16xf32>
      %532 = vector.shape_cast %531 : vector<1x16x16xf32> to vector<16x16xf32>
      %533 = vector.broadcast %530 : f32 to vector<16x16xf32>
      %534 = arith.mulf %532, %533 : vector<16x16xf32>
      %535 = arith.addf %529, %534 : vector<16x16xf32>
      %c70 = arith.constant 70 : index
      %536 = memref.load %arg3[%c70] : memref<99xf32, #tpu.memory_space<smem>>
      %c7_296 = arith.constant 7 : index
      %c3_297 = arith.constant 3 : index
      %c0_298 = arith.constant 0 : index
      %537 = vector.load %arg7[%c7_296, %c3_297, %c0_298] : memref<14x22x16xf32, #tpu.memory_space<vmem>>, vector<1x16x16xf32>
      %538 = vector.shape_cast %537 : vector<1x16x16xf32> to vector<16x16xf32>
      %539 = vector.broadcast %536 : f32 to vector<16x16xf32>
      %540 = arith.mulf %538, %539 : vector<16x16xf32>
      %541 = arith.addf %535, %540 : vector<16x16xf32>
      %c71 = arith.constant 71 : index
      %542 = memref.load %arg3[%c71] : memref<99xf32, #tpu.memory_space<smem>>
      %c8_299 = arith.constant 8 : index
      %c3_300 = arith.constant 3 : index
      %c0_301 = arith.constant 0 : index
      %543 = vector.load %arg7[%c8_299, %c3_300, %c0_301] : memref<14x22x16xf32, #tpu.memory_space<vmem>>, vector<1x16x16xf32>
      %544 = vector.shape_cast %543 : vector<1x16x16xf32> to vector<16x16xf32>
      %545 = vector.broadcast %542 : f32 to vector<16x16xf32>
      %546 = arith.mulf %544, %545 : vector<16x16xf32>
      %547 = arith.addf %541, %546 : vector<16x16xf32>
      %c72 = arith.constant 72 : index
      %548 = memref.load %arg3[%c72] : memref<99xf32, #tpu.memory_space<smem>>
      %c9_302 = arith.constant 9 : index
      %c3_303 = arith.constant 3 : index
      %c0_304 = arith.constant 0 : index
      %549 = vector.load %arg7[%c9_302, %c3_303, %c0_304] : memref<14x22x16xf32, #tpu.memory_space<vmem>>, vector<1x16x16xf32>
      %550 = vector.shape_cast %549 : vector<1x16x16xf32> to vector<16x16xf32>
      %551 = vector.broadcast %548 : f32 to vector<16x16xf32>
      %552 = arith.mulf %550, %551 : vector<16x16xf32>
      %553 = arith.addf %547, %552 : vector<16x16xf32>
      %c73 = arith.constant 73 : index
      %554 = memref.load %arg3[%c73] : memref<99xf32, #tpu.memory_space<smem>>
      %c10_305 = arith.constant 10 : index
      %c3_306 = arith.constant 3 : index
      %c0_307 = arith.constant 0 : index
      %555 = vector.load %arg7[%c10_305, %c3_306, %c0_307] : memref<14x22x16xf32, #tpu.memory_space<vmem>>, vector<1x16x16xf32>
      %556 = vector.shape_cast %555 : vector<1x16x16xf32> to vector<16x16xf32>
      %557 = vector.broadcast %554 : f32 to vector<16x16xf32>
      %558 = arith.mulf %556, %557 : vector<16x16xf32>
      %559 = arith.addf %553, %558 : vector<16x16xf32>
      %c74 = arith.constant 74 : index
      %560 = memref.load %arg3[%c74] : memref<99xf32, #tpu.memory_space<smem>>
      %c11_308 = arith.constant 11 : index
      %c3_309 = arith.constant 3 : index
      %c0_310 = arith.constant 0 : index
      %561 = vector.load %arg7[%c11_308, %c3_309, %c0_310] : memref<14x22x16xf32, #tpu.memory_space<vmem>>, vector<1x16x16xf32>
      %562 = vector.shape_cast %561 : vector<1x16x16xf32> to vector<16x16xf32>
      %563 = vector.broadcast %560 : f32 to vector<16x16xf32>
      %564 = arith.mulf %562, %563 : vector<16x16xf32>
      %565 = arith.addf %559, %564 : vector<16x16xf32>
      %c75 = arith.constant 75 : index
      %566 = memref.load %arg3[%c75] : memref<99xf32, #tpu.memory_space<smem>>
      %c12_311 = arith.constant 12 : index
      %c3_312 = arith.constant 3 : index
      %c0_313 = arith.constant 0 : index
      %567 = vector.load %arg7[%c12_311, %c3_312, %c0_313] : memref<14x22x16xf32, #tpu.memory_space<vmem>>, vector<1x16x16xf32>
      %568 = vector.shape_cast %567 : vector<1x16x16xf32> to vector<16x16xf32>
      %569 = vector.broadcast %566 : f32 to vector<16x16xf32>
      %570 = arith.mulf %568, %569 : vector<16x16xf32>
      %571 = arith.addf %565, %570 : vector<16x16xf32>
      %c76 = arith.constant 76 : index
      %572 = memref.load %arg3[%c76] : memref<99xf32, #tpu.memory_space<smem>>
      %c13_314 = arith.constant 13 : index
      %c3_315 = arith.constant 3 : index
      %c0_316 = arith.constant 0 : index
      %573 = vector.load %arg7[%c13_314, %c3_315, %c0_316] : memref<14x22x16xf32, #tpu.memory_space<vmem>>, vector<1x16x16xf32>
      %574 = vector.shape_cast %573 : vector<1x16x16xf32> to vector<16x16xf32>
      %575 = vector.broadcast %572 : f32 to vector<16x16xf32>
      %576 = arith.mulf %574, %575 : vector<16x16xf32>
      %577 = arith.addf %571, %576 : vector<16x16xf32>
      %c77 = arith.constant 77 : index
      %578 = memref.load %arg3[%c77] : memref<99xf32, #tpu.memory_space<smem>>
      %c7_317 = arith.constant 7 : index
      %c4_318 = arith.constant 4 : index
      %c0_319 = arith.constant 0 : index
      %579 = vector.load %arg7[%c7_317, %c4_318, %c0_319] : memref<14x22x16xf32, #tpu.memory_space<vmem>>, vector<1x16x16xf32>
      %580 = vector.shape_cast %579 : vector<1x16x16xf32> to vector<16x16xf32>
      %581 = vector.broadcast %578 : f32 to vector<16x16xf32>
      %582 = arith.mulf %580, %581 : vector<16x16xf32>
      %583 = arith.addf %577, %582 : vector<16x16xf32>
      %c78 = arith.constant 78 : index
      %584 = memref.load %arg3[%c78] : memref<99xf32, #tpu.memory_space<smem>>
      %c8_320 = arith.constant 8 : index
      %c4_321 = arith.constant 4 : index
      %c0_322 = arith.constant 0 : index
      %585 = vector.load %arg7[%c8_320, %c4_321, %c0_322] : memref<14x22x16xf32, #tpu.memory_space<vmem>>, vector<1x16x16xf32>
      %586 = vector.shape_cast %585 : vector<1x16x16xf32> to vector<16x16xf32>
      %587 = vector.broadcast %584 : f32 to vector<16x16xf32>
      %588 = arith.mulf %586, %587 : vector<16x16xf32>
      %589 = arith.addf %583, %588 : vector<16x16xf32>
      %c79 = arith.constant 79 : index
      %590 = memref.load %arg3[%c79] : memref<99xf32, #tpu.memory_space<smem>>
      %c9_323 = arith.constant 9 : index
      %c4_324 = arith.constant 4 : index
      %c0_325 = arith.constant 0 : index
      %591 = vector.load %arg7[%c9_323, %c4_324, %c0_325] : memref<14x22x16xf32, #tpu.memory_space<vmem>>, vector<1x16x16xf32>
      %592 = vector.shape_cast %591 : vector<1x16x16xf32> to vector<16x16xf32>
      %593 = vector.broadcast %590 : f32 to vector<16x16xf32>
      %594 = arith.mulf %592, %593 : vector<16x16xf32>
      %595 = arith.addf %589, %594 : vector<16x16xf32>
      %c80 = arith.constant 80 : index
      %596 = memref.load %arg3[%c80] : memref<99xf32, #tpu.memory_space<smem>>
      %c10_326 = arith.constant 10 : index
      %c4_327 = arith.constant 4 : index
      %c0_328 = arith.constant 0 : index
      %597 = vector.load %arg7[%c10_326, %c4_327, %c0_328] : memref<14x22x16xf32, #tpu.memory_space<vmem>>, vector<1x16x16xf32>
      %598 = vector.shape_cast %597 : vector<1x16x16xf32> to vector<16x16xf32>
      %599 = vector.broadcast %596 : f32 to vector<16x16xf32>
      %600 = arith.mulf %598, %599 : vector<16x16xf32>
      %601 = arith.addf %595, %600 : vector<16x16xf32>
      %c81 = arith.constant 81 : index
      %602 = memref.load %arg3[%c81] : memref<99xf32, #tpu.memory_space<smem>>
      %c11_329 = arith.constant 11 : index
      %c4_330 = arith.constant 4 : index
      %c0_331 = arith.constant 0 : index
      %603 = vector.load %arg7[%c11_329, %c4_330, %c0_331] : memref<14x22x16xf32, #tpu.memory_space<vmem>>, vector<1x16x16xf32>
      %604 = vector.shape_cast %603 : vector<1x16x16xf32> to vector<16x16xf32>
      %605 = vector.broadcast %602 : f32 to vector<16x16xf32>
      %606 = arith.mulf %604, %605 : vector<16x16xf32>
      %607 = arith.addf %601, %606 : vector<16x16xf32>
      %c82 = arith.constant 82 : index
      %608 = memref.load %arg3[%c82] : memref<99xf32, #tpu.memory_space<smem>>
      %c12_332 = arith.constant 12 : index
      %c4_333 = arith.constant 4 : index
      %c0_334 = arith.constant 0 : index
      %609 = vector.load %arg7[%c12_332, %c4_333, %c0_334] : memref<14x22x16xf32, #tpu.memory_space<vmem>>, vector<1x16x16xf32>
      %610 = vector.shape_cast %609 : vector<1x16x16xf32> to vector<16x16xf32>
      %611 = vector.broadcast %608 : f32 to vector<16x16xf32>
      %612 = arith.mulf %610, %611 : vector<16x16xf32>
      %613 = arith.addf %607, %612 : vector<16x16xf32>
      %c83 = arith.constant 83 : index
      %614 = memref.load %arg3[%c83] : memref<99xf32, #tpu.memory_space<smem>>
      %c13_335 = arith.constant 13 : index
      %c4_336 = arith.constant 4 : index
      %c0_337 = arith.constant 0 : index
      %615 = vector.load %arg7[%c13_335, %c4_336, %c0_337] : memref<14x22x16xf32, #tpu.memory_space<vmem>>, vector<1x16x16xf32>
      %616 = vector.shape_cast %615 : vector<1x16x16xf32> to vector<16x16xf32>
      %617 = vector.broadcast %614 : f32 to vector<16x16xf32>
      %618 = arith.mulf %616, %617 : vector<16x16xf32>
      %619 = arith.addf %613, %618 : vector<16x16xf32>
      %c84 = arith.constant 84 : index
      %620 = memref.load %arg3[%c84] : memref<99xf32, #tpu.memory_space<smem>>
      %c7_338 = arith.constant 7 : index
      %c5_339 = arith.constant 5 : index
      %c0_340 = arith.constant 0 : index
      %621 = vector.load %arg7[%c7_338, %c5_339, %c0_340] : memref<14x22x16xf32, #tpu.memory_space<vmem>>, vector<1x16x16xf32>
      %622 = vector.shape_cast %621 : vector<1x16x16xf32> to vector<16x16xf32>
      %623 = vector.broadcast %620 : f32 to vector<16x16xf32>
      %624 = arith.mulf %622, %623 : vector<16x16xf32>
      %625 = arith.addf %619, %624 : vector<16x16xf32>
      %c85 = arith.constant 85 : index
      %626 = memref.load %arg3[%c85] : memref<99xf32, #tpu.memory_space<smem>>
      %c8_341 = arith.constant 8 : index
      %c5_342 = arith.constant 5 : index
      %c0_343 = arith.constant 0 : index
      %627 = vector.load %arg7[%c8_341, %c5_342, %c0_343] : memref<14x22x16xf32, #tpu.memory_space<vmem>>, vector<1x16x16xf32>
      %628 = vector.shape_cast %627 : vector<1x16x16xf32> to vector<16x16xf32>
      %629 = vector.broadcast %626 : f32 to vector<16x16xf32>
      %630 = arith.mulf %628, %629 : vector<16x16xf32>
      %631 = arith.addf %625, %630 : vector<16x16xf32>
      %c86 = arith.constant 86 : index
      %632 = memref.load %arg3[%c86] : memref<99xf32, #tpu.memory_space<smem>>
      %c9_344 = arith.constant 9 : index
      %c5_345 = arith.constant 5 : index
      %c0_346 = arith.constant 0 : index
      %633 = vector.load %arg7[%c9_344, %c5_345, %c0_346] : memref<14x22x16xf32, #tpu.memory_space<vmem>>, vector<1x16x16xf32>
      %634 = vector.shape_cast %633 : vector<1x16x16xf32> to vector<16x16xf32>
      %635 = vector.broadcast %632 : f32 to vector<16x16xf32>
      %636 = arith.mulf %634, %635 : vector<16x16xf32>
      %637 = arith.addf %631, %636 : vector<16x16xf32>
      %c87 = arith.constant 87 : index
      %638 = memref.load %arg3[%c87] : memref<99xf32, #tpu.memory_space<smem>>
      %c10_347 = arith.constant 10 : index
      %c5_348 = arith.constant 5 : index
      %c0_349 = arith.constant 0 : index
      %639 = vector.load %arg7[%c10_347, %c5_348, %c0_349] : memref<14x22x16xf32, #tpu.memory_space<vmem>>, vector<1x16x16xf32>
      %640 = vector.shape_cast %639 : vector<1x16x16xf32> to vector<16x16xf32>
      %641 = vector.broadcast %638 : f32 to vector<16x16xf32>
      %642 = arith.mulf %640, %641 : vector<16x16xf32>
      %643 = arith.addf %637, %642 : vector<16x16xf32>
      %c88 = arith.constant 88 : index
      %644 = memref.load %arg3[%c88] : memref<99xf32, #tpu.memory_space<smem>>
      %c11_350 = arith.constant 11 : index
      %c5_351 = arith.constant 5 : index
      %c0_352 = arith.constant 0 : index
      %645 = vector.load %arg7[%c11_350, %c5_351, %c0_352] : memref<14x22x16xf32, #tpu.memory_space<vmem>>, vector<1x16x16xf32>
      %646 = vector.shape_cast %645 : vector<1x16x16xf32> to vector<16x16xf32>
      %647 = vector.broadcast %644 : f32 to vector<16x16xf32>
      %648 = arith.mulf %646, %647 : vector<16x16xf32>
      %649 = arith.addf %643, %648 : vector<16x16xf32>
      %c89 = arith.constant 89 : index
      %650 = memref.load %arg3[%c89] : memref<99xf32, #tpu.memory_space<smem>>
      %c12_353 = arith.constant 12 : index
      %c5_354 = arith.constant 5 : index
      %c0_355 = arith.constant 0 : index
      %651 = vector.load %arg7[%c12_353, %c5_354, %c0_355] : memref<14x22x16xf32, #tpu.memory_space<vmem>>, vector<1x16x16xf32>
      %652 = vector.shape_cast %651 : vector<1x16x16xf32> to vector<16x16xf32>
      %653 = vector.broadcast %650 : f32 to vector<16x16xf32>
      %654 = arith.mulf %652, %653 : vector<16x16xf32>
      %655 = arith.addf %649, %654 : vector<16x16xf32>
      %c90 = arith.constant 90 : index
      %656 = memref.load %arg3[%c90] : memref<99xf32, #tpu.memory_space<smem>>
      %c13_356 = arith.constant 13 : index
      %c5_357 = arith.constant 5 : index
      %c0_358 = arith.constant 0 : index
      %657 = vector.load %arg7[%c13_356, %c5_357, %c0_358] : memref<14x22x16xf32, #tpu.memory_space<vmem>>, vector<1x16x16xf32>
      %658 = vector.shape_cast %657 : vector<1x16x16xf32> to vector<16x16xf32>
      %659 = vector.broadcast %656 : f32 to vector<16x16xf32>
      %660 = arith.mulf %658, %659 : vector<16x16xf32>
      %661 = arith.addf %655, %660 : vector<16x16xf32>
      %c91 = arith.constant 91 : index
      %662 = memref.load %arg3[%c91] : memref<99xf32, #tpu.memory_space<smem>>
      %c7_359 = arith.constant 7 : index
      %c6_360 = arith.constant 6 : index
      %c0_361 = arith.constant 0 : index
      %663 = vector.load %arg7[%c7_359, %c6_360, %c0_361] : memref<14x22x16xf32, #tpu.memory_space<vmem>>, vector<1x16x16xf32>
      %664 = vector.shape_cast %663 : vector<1x16x16xf32> to vector<16x16xf32>
      %665 = vector.broadcast %662 : f32 to vector<16x16xf32>
      %666 = arith.mulf %664, %665 : vector<16x16xf32>
      %667 = arith.addf %661, %666 : vector<16x16xf32>
      %c92 = arith.constant 92 : index
      %668 = memref.load %arg3[%c92] : memref<99xf32, #tpu.memory_space<smem>>
      %c8_362 = arith.constant 8 : index
      %c6_363 = arith.constant 6 : index
      %c0_364 = arith.constant 0 : index
      %669 = vector.load %arg7[%c8_362, %c6_363, %c0_364] : memref<14x22x16xf32, #tpu.memory_space<vmem>>, vector<1x16x16xf32>
      %670 = vector.shape_cast %669 : vector<1x16x16xf32> to vector<16x16xf32>
      %671 = vector.broadcast %668 : f32 to vector<16x16xf32>
      %672 = arith.mulf %670, %671 : vector<16x16xf32>
      %673 = arith.addf %667, %672 : vector<16x16xf32>
      %c93 = arith.constant 93 : index
      %674 = memref.load %arg3[%c93] : memref<99xf32, #tpu.memory_space<smem>>
      %c9_365 = arith.constant 9 : index
      %c6_366 = arith.constant 6 : index
      %c0_367 = arith.constant 0 : index
      %675 = vector.load %arg7[%c9_365, %c6_366, %c0_367] : memref<14x22x16xf32, #tpu.memory_space<vmem>>, vector<1x16x16xf32>
      %676 = vector.shape_cast %675 : vector<1x16x16xf32> to vector<16x16xf32>
      %677 = vector.broadcast %674 : f32 to vector<16x16xf32>
      %678 = arith.mulf %676, %677 : vector<16x16xf32>
      %679 = arith.addf %673, %678 : vector<16x16xf32>
      %c94 = arith.constant 94 : index
      %680 = memref.load %arg3[%c94] : memref<99xf32, #tpu.memory_space<smem>>
      %c10_368 = arith.constant 10 : index
      %c6_369 = arith.constant 6 : index
      %c0_370 = arith.constant 0 : index
      %681 = vector.load %arg7[%c10_368, %c6_369, %c0_370] : memref<14x22x16xf32, #tpu.memory_space<vmem>>, vector<1x16x16xf32>
      %682 = vector.shape_cast %681 : vector<1x16x16xf32> to vector<16x16xf32>
      %683 = vector.broadcast %680 : f32 to vector<16x16xf32>
      %684 = arith.mulf %682, %683 : vector<16x16xf32>
      %685 = arith.addf %679, %684 : vector<16x16xf32>
      %c95 = arith.constant 95 : index
      %686 = memref.load %arg3[%c95] : memref<99xf32, #tpu.memory_space<smem>>
      %c11_371 = arith.constant 11 : index
      %c6_372 = arith.constant 6 : index
      %c0_373 = arith.constant 0 : index
      %687 = vector.load %arg7[%c11_371, %c6_372, %c0_373] : memref<14x22x16xf32, #tpu.memory_space<vmem>>, vector<1x16x16xf32>
      %688 = vector.shape_cast %687 : vector<1x16x16xf32> to vector<16x16xf32>
      %689 = vector.broadcast %686 : f32 to vector<16x16xf32>
      %690 = arith.mulf %688, %689 : vector<16x16xf32>
      %691 = arith.addf %685, %690 : vector<16x16xf32>
      %c96 = arith.constant 96 : index
      %692 = memref.load %arg3[%c96] : memref<99xf32, #tpu.memory_space<smem>>
      %c12_374 = arith.constant 12 : index
      %c6_375 = arith.constant 6 : index
      %c0_376 = arith.constant 0 : index
      %693 = vector.load %arg7[%c12_374, %c6_375, %c0_376] : memref<14x22x16xf32, #tpu.memory_space<vmem>>, vector<1x16x16xf32>
      %694 = vector.shape_cast %693 : vector<1x16x16xf32> to vector<16x16xf32>
      %695 = vector.broadcast %692 : f32 to vector<16x16xf32>
      %696 = arith.mulf %694, %695 : vector<16x16xf32>
      %697 = arith.addf %691, %696 : vector<16x16xf32>
      %c97 = arith.constant 97 : index
      %698 = memref.load %arg3[%c97] : memref<99xf32, #tpu.memory_space<smem>>
      %c13_377 = arith.constant 13 : index
      %c6_378 = arith.constant 6 : index
      %c0_379 = arith.constant 0 : index
      %699 = vector.load %arg7[%c13_377, %c6_378, %c0_379] : memref<14x22x16xf32, #tpu.memory_space<vmem>>, vector<1x16x16xf32>
      %700 = vector.shape_cast %699 : vector<1x16x16xf32> to vector<16x16xf32>
      %701 = vector.broadcast %698 : f32 to vector<16x16xf32>
      %702 = arith.mulf %700, %701 : vector<16x16xf32>
      %703 = arith.addf %697, %702 : vector<16x16xf32>
      %704 = arith.negf %703 : vector<16x16xf32>
      %705 = math.exp %704 : vector<16x16xf32>
      %cst_380 = arith.constant 1.000000e+00 : f32
      %706 = vector.broadcast %cst_380 : f32 to vector<16x16xf32>
      %707 = arith.addf %706, %705 : vector<16x16xf32>
      %708 = arith.divf %706, %707 : vector<16x16xf32>
      %c0_381 = arith.constant 0 : index
      %c0_382 = arith.constant 0 : index
      %c0_383 = arith.constant 0 : index
      %c0_384 = arith.constant 0 : index
      %709 = vector.load %arg4[%c0_381, %c0_382, %c0_383, %c0_384] : memref<1x1x16x16xf32, #tpu.memory_space<vmem>>, vector<1x1x16x16xf32>
      %710 = vector.shape_cast %709 : vector<1x1x16x16xf32> to vector<16x16xf32>
      %711 = vector.shape_cast %708 : vector<16x16xf32> to vector<1x1x16x16xf32>
      tpu.vector_store %arg4[%c0_381, %c0_382, %c0_383, %c0_384], %711 {strides = array<i32>} : memref<1x1x16x16xf32, #tpu.memory_space<vmem>>, vector<1x1x16x16xf32>,
    } else {
    }
    return
  }
  func.func @transform_0(%arg0: i32, %arg1: i32) -> (i32, i32, i32, i32) {
    %c0_i32 = arith.constant 0 : i32
    %c0_i32_0 = arith.constant 0 : i32
    %c0_i32_1 = arith.constant 0 : i32
    return %arg0, %arg1, %c0_i32, %c0_i32_0 : i32, i32, i32, i32
  }
  func.func @transform_1(%arg0: i32, %arg1: i32) -> i32 {
    %c0_i32 = arith.constant 0 : i32
    %c0_i32_0 = arith.constant 0 : i32
    return %c0_i32 : i32
  }
  func.func @transform_2(%arg0: i32, %arg1: i32) -> (i32, i32, i32, i32) {
    %c0_i32 = arith.constant 0 : i32
    %c0_i32_0 = arith.constant 0 : i32
    %c0_i32_1 = arith.constant 0 : i32
    %c0_i32_2 = arith.constant 0 : i32
    return %arg0, %c0_i32, %c0_i32_0, %c0_i32_1 : i32, i32, i32, i32
  }
}

</mosaic_0001>

<bundles_post_ra>
// kernel: tpu_custom_call.1
= control target key start
LH: loop header
LB: loop body
LE: loop exit
PB: predicated region body
PF: predicated region fallthrough
CT: control target
= control target key end

     0   :  { %7 = vsyncpa [#allocation6], 0  ;;  %s2339_s0 = inlined_call_operand.hbm [shape: f32[2,4,16,16], index: 0, kind: input, shape index: {}]   ;;  %s2340_s1 = inlined_call_operand.vmem [shape: f32[99], index: 1, kind: input, shape index: {}]   ;;  %s2341_s2 = inlined_call_operand.hbm [shape: f32[2,1,16,16], index: 2, kind: output, shape index: {}]  }
   0x1   :  { %9 = vsyncpa [#allocation6 + $0x1], 0 }
   0x2   :  { %10 = vsyncpa [#allocation8], 0 }
   0x3   :  { %11 = vsyncpa [#allocation7], 0 }
   0x4   :  { %13 = vsyncpa [#allocation7 + $0x1], 0  ;;  %s1729_s9 = smov 0   ;;  %s1731_s10 = smov 0  }
   0x5   :  { %s1733_s11 = smov 0   ;;  %s1735_s12 = smov 0  }
   0x6   :  { %s1737_s13 = smov 0   ;;  %s1739_s14 = smov 0  }
   0x7 LB: > { %s1348_s15 = sadd.s32 4294967295, %s1697_s14   ;;  %s1349_s16 = sadd.s32 4294967294, %s1697_s14   ;;  %s1697_s14 = sphi %s1739_s14, %s19_s14   ;;  %s1693_s13 = sphi %s1737_s13, %s2364_s13   ;;  %s1689_s12 = sphi %s1735_s12, %s2363_s12   ;;  %s1685_s11 = sphi %s1733_s11, %s2362_s11   ;;  %s1681_s10 = sphi %s1731_s10, %s2361_s10   ;;  %s1677_s9 = sphi %s1729_s9, %s2360_s9  }
   0x8   : > { %s40_s17 = sadd.s32 1, %s1685_s11  ;;  %p47_p0 = scmp.ne.s32.totalorder %s1685_s11, %s1681_s10 }
   0x9   : > { %p48_p1 = scmp.eq.s32.totalorder %s1697_s14, 0  ;;  %p53_p2 = scmp.ne.s32.totalorder %s1681_s10, %s1677_s9 }
   0xa   : > { %p1767_p3 = scmp.eq.s32.totalorder %s1348_s15, 0  ;;  %p98_p4 = scmp.eq.s32.totalorder %s1348_s15, 1 }
   0xb   : > { %p1771_p5 = por %p48_p1, %p47_p0  ;;  %p104_p6 = scmp.eq.s32.totalorder %s1349_s16, 1 }
   0xc   : > { %s2346_s18 = scalar_select %p1767_p3, 1, 0 }
   0xd   : > { %p1777_p7 = por %p1767_p3, %p53_p2  ;;  %p1781_p8 = por %p98_p4, %p47_p0 }
   0xe   : > { %p1785_p9 = por %p104_p6, %p53_p2  ;;  %p1350_p10 = scmp.ge.s32.totalorder %s1697_s14, 1 }
   0xf   : > { %s2348_s20 = scalar_select %p1777_p7, 1, 0 }
  0x10   : > { %s2349_s21 = scalar_select %p1781_p8, 1, 0 }
  0x11   : > { %s2350_s22 = scalar_select %p1785_p9, 1, 0 }
  0x12   : > { %p111_p11 = scmp.lt.s32.totalorder %s1697_s14, 3  ;;  %s124_s25 = sshll.u32 %s2340_s1, 4  ;;  %s125_s25 = int_to_ptr.vmem [resolvable:$true] %s124_s25 }
  0x13   : > { %p1494_p0 = scmp.lt.s32.totalorder %s1697_s14, 2  ;;  %s31_s29 = sadd.s32 1, %s1693_s13 }
  0x14   : > { %p1794_p12 = pnand %p1350_p10, %p111_p11  ;;  %p1815_p6 = scmp.ge.s32.totalorder %s31_s29, 2 }
  0x15   : > { %p1804_p2 = pnand %p1494_p0, %p1771_p5  ;;  %s135_s3 = sand.u32 1, %s1685_s11  }
  0x16   : > { %p1481_p1 = pneg %p1794_p12  ;;  %s1566_s4 = scalar_lea.vmem %s125_s25, 16 }
  0x17   : > { %p1567_p10 = scmp.ne.s32.totalorder %s125_s25, %s1566_s4  ;;  %p1574_p13 = scmp.lt.s32.totalorder %s125_s25, %s125_s25 }
  0x18   : > { %p1810_p4 = pnand %p1481_p1, %p1767_p3  ;;  %p1575_p9 = scmp.lt.s32.totalorder %s1566_s4, %s1566_s4 }
  0x1a   : > { %p1568_p11 = pneg %p1810_p4  ;;  %p1576_p8 = por %p1575_p9, %p1574_p13 }
  0x1c   : > { %p1569_p5 = pnand %p1568_p11, %p1567_p10 }
  0x1e   : > { %p1570_p0 = pneg %p1569_p5 }
  0x20   : > { %p1577_p1 = pnand %p1576_p8, %p1570_p0 }
  0x22   : > { %1580 = shalt.err (!%p1577_p1)
}
  0x23   : > { %s1699_s5 = smov [#allocation9]   ;;  %s2366_s29 = smov (%p1815_p6, %s31_s29), 0 }
  0x24   : > { %1484 = dma.vmem_to_smem (!%p1810_p4), %s125_s25, 16, %s1699_s5, [#allocation8]  }
  0x25   : > { %s1353_s6 = sshll.u32 %s135_s3, 6  ;;  %s35_s7 = ssub.s32 %s1693_s13, %s2366_s29 }
  0x26   : > { %p38_p9 = scmp.eq.s32.totalorder %s35_s7, 0  ;;  %s1471_s8 = sshll.u32 %s1693_s13, 10 }
  0x27   : > { %s1834_s19 = scalar_lea.hbm %s2339_s0, %s1471_s8  ;;  %s139_s23 = scalar_lea.vmem [#allocation5], %s1353_s6 }
  0x28   : > { %s149_s24 = sshll.u32 %s139_s23, 4  ;;  %s1843_s28 = scalar_lea.sflag [#allocation6], %s135_s3  ;;  %s1841_s24 = int_to_ptr.vmem [resolvable:$true] %s149_s24 }
  0x29   : > { %s1839_s25 = scalar_select %p38_p9, %s1685_s11, %s40_s17  }
  0x2a   : > { %s1581_s30 = scalar_lea.hbm %s1834_s19, 1024  ;;  %p1583_p13 = pneg %p1804_p2 }
  0x2b   : > { %p1582_p8 = scmp.ne.s32.totalorder %s1834_s19, %s1581_s30  ;;  %s1586_s6 = scalar_lea.hbm %s2339_s0, 2048 }
  0x2c   : > { %p1587_p10 = scmp.lt.u32.totalorder %s1834_s19, %s2339_s0  ;;  %p1588_p11 = scmp.lt.u32.totalorder %s1586_s6, %s1581_s30 }
  0x2d   : > { %p1584_p4 = pnand %p1583_p13, %p1582_p8  ;;  %p1590_p0 = scmp.lt.u32.totalorder %s1581_s30, %s1834_s19 }
  0x2e   : > { %p1589_p5 = por %p1588_p11, %p1587_p10 }
  0x2f   : > { %p1585_p6 = pneg %p1584_p4 }
  0x30   : > { %p1591_p1 = por %p1590_p0, %p1589_p5 }
  0x32   : > { %p1592_p9 = pnand %p1591_p1, %p1585_p6 }
  0x34   : > { %1595 = shalt.err (!%p1592_p9)
}
  0x35   : > { %s1596_s17 = scalar_lea.vmem %s1841_s24, 1024  ;;  %s1700_s3 = smov [#allocation5]  }
  0x36   : > { %p1597_p8 = scmp.ne.s32.totalorder %s1841_s24, %s1596_s17  ;;  %s1601_s15 = sshll.u32 %s1700_s3, 4  ;;  %s1602_s15 = int_to_ptr.vmem [resolvable:$false] %s1601_s15 }
  0x37   : > { %s1603_s16 = scalar_lea.vmem %s1602_s15, 2048  ;;  %p1604_p7 = scmp.lt.s32.totalorder %s1841_s24, %s1602_s15 }
  0x38   : > { %p1599_p4 = pnand %p1597_p8, %p1583_p13  ;;  %p1605_p10 = scmp.lt.s32.totalorder %s1603_s16, %s1596_s17 }
  0x3a   : > { %p1600_p3 = pneg %p1599_p4  ;;  %p1606_p11 = por %p1605_p10, %p1604_p7 }
  0x3c   : > { %p1607_p5 = pnand %p1606_p11, %p1600_p3 }
  0x3e   : > { %1610 = shalt.err (!%p1607_p5)
}
  0x3f   : > { %s1701_s23 = smov 128   ;;  %s1702_s30 = smov 8  }
  0x40   : > { %1488 = dma.hbm_to_vmem [thread:$0]  (!%p1804_p2), %s1834_s19, 1024, %s1841_s24, %s1843_s28, %s1701_s23, %s1701_s23, %s1702_s30  }
  0x41   : > { %161 = sbr.rel (%p1794_p12) target bundleno = 482 (0x1e2), region = 28  ;;  %s1874_s4 = sand.u32 (!%p1794_p12), 1, %s1681_s10  }
  0x42   : > { %s1357_s5 = sshll.u32 (!%p1794_p12), %s1874_s4, 6  ;;  %s164_s6 = scalar_lea.sflag (!%p1794_p12), [#allocation6], %s1874_s4 }
  0x43   : > { %s1878_s7 = scalar_lea.vmem (!%p1794_p12), [#allocation5], %s1357_s5  ;;  %p2355_p3 = scmp.ne.s32.totalorder (!%p1794_p12), %s2348_s20, 0 }
  0x48   : > { %1664 = dma.done.wait (%p2355_p3), %s164_s6, 1024  }
  0x49   : > { %1666 = vsyncadd (%p2355_p3), %s164_s6, 4294966272  ;;  %p2356_p7 = scmp.ne.s32.totalorder %s2346_s18, 0 }
  0x4b   : > { %1668 = dma.done.wait (%p2356_p7), [#allocation8], 16  }
  0x4c   : > { %1670 = vsyncadd (%p2356_p7), [#allocation8], 4294967280 }
  0x4d   : > { %176 = sfence }
  0x4e   : > { %vm198_vm0 = vcmask 130048   ;;  %v1703_v0 = vmov -inf   ;;  %v1704_v1 = vmov 0.0   ;;  %vm250_vm1 = vcmask 128000   ;;  %v207_v2 = vld [vmem:[%s1878_s7] sm:$0xff]  ;;  %v208_v3 = vld [vmem:[%s1878_s7 + $0x8] sm:$0xff] }
  0x4f   : > { %199 = vst.msk [vmem:[#allocation2] sm:$0xff] %vm198_vm0, %v1703_v0  ;;  %201 = vst.msk [vmem:[#allocation3] sm:$0xff] %vm198_vm0, %v1704_v1  ;;  %v1360_v4 = vld [vmem:[%s1878_s7 + $0x10] sm:$0xff]  ;;  %v1361_v5 = vld [vmem:[%s1878_s7 + $0x18] sm:$0xff]  ;;  %s1705_s18 = smov 2   ;;  %s1706_s20 = smov 3  }
  0x50   : > { %258 = vst.msk [vmem:[#allocation4 + $0x48] sm:$0xff] %vm198_vm0, %v1704_v1  ;;  %259 = vst.msk [vmem:[#allocation4 + $0x50] sm:$0xff] %vm198_vm0, %v1704_v1  ;;  %v1362_v13 = vld [vmem:[%s1878_s7 + $0x20] sm:$0xff]  ;;  %v1363_v15 = vld [vmem:[%s1878_s7 + $0x28] sm:$0xff]  ;;  %s1707_s26 = smov 1   ;;  %s1708_s27 = smov 127  }
  0x51   : > { %200 = vst.msk [vmem:[#allocation2 + $0x8] sm:$0xff] %vm198_vm0, %v1703_v0  ;;  %202 = vst.msk [vmem:[#allocation3 + $0x8] sm:$0xff] %vm198_vm0, %v1704_v1  ;;  %v1364_v19 = vld [vmem:[%s1878_s7 + $0x30] sm:$0xff]  ;;  %v1365_v21 = vld [vmem:[%s1878_s7 + $0x38] sm:$0xff]  ;;  %s1709_s19 = smov 126   ;;  %s1710_s24 = smov 125  }
  0x52   : > { %248 = vst.msk [vmem:[#allocation4] sm:$0xff] %vm198_vm0, %v1704_v1  ;;  %249 = vst.msk [vmem:[#allocation4 + $0x8] sm:$0xff] %vm198_vm0, %v1704_v1  ;;  %vm310_vm2 = vcmask 15360   ;;  %vm299_vm3 = vcmask 23552   ;;  %s1940_s28 = sld [smem:[#allocation9]]  ;;  %vm322_vm4 = vcmask 7168  }
  0x53   : > { %252 = vst.msk [vmem:[#allocation4 + $0x18] sm:$0xff] %vm198_vm0, %v1704_v1  ;;  %253 = vst.msk [vmem:[#allocation4 + $0x20] sm:$0xff] %vm198_vm0, %v1704_v1  ;;  %s1946_s8 = sld [smem:[#allocation9 + $0x62]]  ;;  %s1950_s17 = sld [smem:[#allocation9 + $0x1]]  ;;  %vm337_vm5 = vcmask 121856   ;;  %vm349_vm6 = vcmask 113664  }
  0x54   : > { %255 = vst.msk [vmem:[#allocation4 + $0x30] sm:$0xff] %vm198_vm0, %v1704_v1  ;;  %256 = vst.msk [vmem:[#allocation4 + $0x38] sm:$0xff] %vm198_vm0, %v1704_v1  ;;  %s1954_s3 = sld [smem:[#allocation9 + $0x2]]  ;;  %s1958_s15 = sld [smem:[#allocation9 + $0x3]]  ;;  %vm361_vm7 = vcmask 105472  }
  0x55   : > { %261 = vst.msk [vmem:[#allocation4 + $0x60] sm:$0xff] %vm198_vm0, %v1704_v1  ;;  %262 = vst.msk [vmem:[#allocation4 + $0x68] sm:$0xff] %vm198_vm0, %v1704_v1  ;;  %s1966_s16 = sld [smem:[#allocation9 + $0x4]]  ;;  %s1972_s23 = sld [smem:[#allocation9 + $0x5]] }
  0x56   : > { %264 = vst.msk [vmem:[#allocation4 + $0x78] sm:$0xff] %vm198_vm0, %v1704_v1  ;;  %265 = vst.msk [vmem:[#allocation4 + $0x80] sm:$0xff] %vm198_vm0, %v1704_v1  ;;  %v203_v6 = vld [vmem:[#allocation2] sm:$0xff]  ;;  %v205_v7 = vld [vmem:[#allocation3] sm:$0xff]  ;;  %s1979_s30 = sld [smem:[#allocation9 + $0x6]]  ;;  %s1982_s5 = sld [smem:[#allocation9 + $0x7]] }
  0x57   : > { %267 = vst.msk [vmem:[#allocation4 + $0x90] sm:$0xff] %vm198_vm0, %v1704_v1  ;;  %268 = vst.msk [vmem:[#allocation4 + $0x98] sm:$0xff] %vm198_vm0, %v1704_v1  ;;  %v209_v9 = vmax.f32 %v203_v6, %v207_v2  ;;  %v211_v10 = vadd.f32 %v207_v2, %v205_v7  ;;  %s1986_s6 = sld [smem:[#allocation9 + $0x8]]  ;;  %s1988_s7 = sld [smem:[#allocation9 + $0xa]] }
  0x58   : > { %270 = vst.msk [vmem:[#allocation4 + $0xa8] sm:$0xff] %vm198_vm0, %v1704_v1  ;;  %271 = vst.msk [vmem:[#allocation4 + $0xb0] sm:$0xff] %vm198_vm0, %v1704_v1  ;;  %v204_v8 = vld [vmem:[#allocation2 + $0x8] sm:$0xff]  ;;  %v206_v11 = vld [vmem:[#allocation3 + $0x8] sm:$0xff]  ;;  %v443_v48 = vstv %s1940_s28  ;;  %s2018_s28 = sld [smem:[#allocation9 + $0x10]]  ;;  %p2357_p2 = scmp.ne.s32.totalorder %s2349_s21, 0 }
  0x59   : > { %273 = vst.msk [vmem:[#allocation4 + $0xc0] sm:$0xff] %vm198_vm0, %v1704_v1  ;;  %274 = vst.msk [vmem:[#allocation4 + $0xc8] sm:$0xff] %vm198_vm0, %v1704_v1  ;;  %v210_v12 = vmax.f32 %v204_v8, %v208_v3  ;;  %v212_v14 = vadd.f32 %v208_v3, %v206_v11  ;;  %v216_v16 = vmax.f32 %v209_v9, %v1360_v4  ;;  %v439_v55 = vstv %s1946_s8  ;;  %s2021_s8 = sld [smem:[#allocation9 + $0x11]] }
  0x5a   : > { %276 = vst.msk [vmem:[#allocation4 + $0xd8] sm:$0xff] %vm198_vm0, %v1704_v1  ;;  %277 = vst.msk [vmem:[#allocation4 + $0xe0] sm:$0xff] %vm198_vm0, %v1704_v1  ;;  %v218_v17 = vadd.f32 %v1360_v4, %v211_v10  ;;  %v451_v62 = vstv %s1950_s17  ;;  %v459_v3 = vstv %s1954_s3  ;;  %v467_v10 = vstv %s1958_s15  ;;  %s2027_s17 = sld [smem:[#allocation9 + $0x12]]  ;;  %s2030_s3 = sld [smem:[#allocation9 + $0x13]] }
  0x5b   : > { %279 = vst.msk [vmem:[#allocation4 + $0xf0] sm:$0xff] %vm198_vm0, %v1704_v1  ;;  %280 = vst.msk [vmem:[#allocation4 + $0xf8] sm:$0xff] %vm198_vm0, %v1704_v1  ;;  %v217_v18 = vmax.f32 %v210_v12, %v1361_v5  ;;  %v219_v20 = vadd.f32 %v1361_v5, %v212_v14  ;;  %v223_v22 = vmax.f32 %v216_v16, %v1362_v13  ;;  %s2033_s15 = sld [smem:[#allocation9 + $0x14]] }
  0x5c   : > { %282 = vst.msk [vmem:[#allocation4 + $0x108] sm:$0xff] %vm198_vm0, %v1704_v1  ;;  %283 = vst.msk [vmem:[#allocation4 + $0x110] sm:$0xff] %vm198_vm0, %v1704_v1  ;;  %v225_v23 = vadd.f32 %v1362_v13, %v218_v17 }
  0x5d   : > { %285 = vst.msk [vmem:[#allocation4 + $0x120] sm:$0xff] %vm198_vm0, %v1704_v1  ;;  %286 = vst.msk [vmem:[#allocation4 + $0x128] sm:$0xff] %vm198_vm0, %v1704_v1  ;;  %v224_v24 = vmax.f32 %v217_v18, %v1363_v15  ;;  %v226_v25 = vadd.f32 %v1363_v15, %v219_v20  ;;  %v230_v26 = vmax.f32 %v223_v22, %v1364_v19 }
  0x5e   : > { %288 = vst.msk [vmem:[#allocation4 + $0x138] sm:$0xff] %vm198_vm0, %v1704_v1  ;;  %289 = vst.msk [vmem:[#allocation4 + $0x140] sm:$0xff] %vm198_vm0, %v1704_v1  ;;  %v232_v27 = vadd.f32 %v1364_v19, %v225_v23 }
  0x5f   : > { %260 = vst.msk [vmem:[#allocation4 + $0x58] sm:$0x3f] %vm250_vm1, %v1704_v1  ;;  %251 = vst.msk [vmem:[#allocation4 + $0x10] sm:$0x3f] %vm250_vm1, %v1704_v1  ;;  %v231_v28 = vmax.f32 %v224_v24, %v1365_v21  ;;  %v233_v29 = vadd.f32 %v1365_v21, %v226_v25  ;;  %v475_v24 = vstv %s1966_s16  ;;  %s2041_s16 = sld [smem:[#allocation9 + $0x15]] }
  0x60   : > { %254 = vst.msk [vmem:[#allocation4 + $0x28] sm:$0x3f] %vm250_vm1, %v1704_v1  ;;  %257 = vst.msk [vmem:[#allocation4 + $0x40] sm:$0x3f] %vm250_vm1, %v1704_v1 }
  0x61   : > { %263 = vst.msk [vmem:[#allocation4 + $0x70] sm:$0x3f] %vm250_vm1, %v1704_v1  ;;  %266 = vst.msk [vmem:[#allocation4 + $0x88] sm:$0x3f] %vm250_vm1, %v1704_v1 }
  0x62   : > { %269 = vst.msk [vmem:[#allocation4 + $0xa0] sm:$0x3f] %vm250_vm1, %v1704_v1  ;;  %272 = vst.msk [vmem:[#allocation4 + $0xb8] sm:$0x3f] %vm250_vm1, %v1704_v1 }
  0x63   : > { %275 = vst.msk [vmem:[#allocation4 + $0xd0] sm:$0x3f] %vm250_vm1, %v1704_v1  ;;  %278 = vst.msk [vmem:[#allocation4 + $0xe8] sm:$0x3f] %vm250_vm1, %v1704_v1 }
  0x64   : > { %281 = vst.msk [vmem:[#allocation4 + $0x100] sm:$0x3f] %vm250_vm1, %v1704_v1  ;;  %284 = vst.msk [vmem:[#allocation4 + $0x118] sm:$0x3f] %vm250_vm1, %v1704_v1 }
  0x65   : > { %287 = vst.msk [vmem:[#allocation4 + $0x130] sm:$0x3f] %vm250_vm1, %v1704_v1  ;;  %290 = vst.msk [vmem:[#allocation4 + $0x148] sm:$0x3f] %vm250_vm1, %v1704_v1 }
  0x66   : > { %235 = vst.msk [vmem:[#allocation2] sm:$0xff] %vm198_vm0, %v230_v26  ;;  %237 = vst.msk [vmem:[#allocation3] sm:$0xff] %vm198_vm0, %v232_v27 }
  0x67   : > { %236 = vst.msk [vmem:[#allocation2 + $0x8] sm:$0xff] %vm198_vm0, %v231_v28  ;;  %238 = vst.msk [vmem:[#allocation3 + $0x8] sm:$0xff] %vm198_vm0, %v233_v29  ;;  %v483_v28 = vstv %s1972_s23  ;;  %s2047_s23 = sld [smem:[#allocation9 + $0x16]] }
  0x6d   : > { %v242_v30 = vld [vmem:[#allocation2] sm:$0xff]  ;;  %v244_v32 = vld [vmem:[#allocation3] sm:$0xff] }
  0x6e   : > { %v243_v31 = vld [vmem:[#allocation2 + $0x8] sm:$0xff]  ;;  %304 = vrot.lane.b32.xlu1 %v242_v30, %s1705_s18  ;;  %329 = vst.msk [vmem:[#allocation4 + $0x4b] sm:$0xff] %vm198_vm0, %v242_v30  ;;  %293 = vrot.lane.b32.xlu0 %v242_v30, %s1706_s20  ;;  %v245_v33 = vld [vmem:[#allocation3 + $0x8] sm:$0xff]  ;;  %v246_v34 = vmul.f32 0.25, %v244_v32 }
  0x6f   : > { %330 = vst.msk [vmem:[#allocation4 + $0x53] sm:$0xff] %vm198_vm0, %v243_v31  ;;  %v247_v35 = vmul.f32 0.25, %v245_v33 }
  0x70   : > { %403 = vst.msk [vmem:[#allocation4 + $0xf3] sm:$0xff] %vm198_vm0, %v246_v34 }
  0x71   : > { %404 = vst.msk [vmem:[#allocation4 + $0xfb] sm:$0xff] %vm198_vm0, %v247_v35 }
  0x72   : > { %306 = vrot.lane.b32.xlu1 %v243_v31, %s1705_s18  ;;  %295 = vrot.lane.b32.xlu0 %v243_v31, %s1706_s20 }
  0x75   : > { %v465_v14 = vld [vmem:[#allocation4 + $0x48] sm:$0xff] }
  0x76   : > { %318 = vrot.lane.b32.xlu1 %v243_v31, %s1707_s26  ;;  %316 = vrot.lane.b32.xlu0 %v242_v30, %s1707_s26  ;;  %v466_v17 = vld [vmem:[#allocation4 + $0x50] sm:$0xff]  ;;  %v468_v22 = vmul.f32 %v467_v10, %v465_v14 }
  0x77   : > { %v469_v25 = vmul.f32 %v467_v10, %v466_v17 }
  0x7a   : > { %333 = vrot.lane.b32.xlu1 %v243_v31, %s1708_s27  ;;  %331 = vrot.lane.b32.xlu0 %v242_v30, %s1708_s27 }
  0x7e   : > { %345 = vrot.lane.b32.xlu1 %v243_v31, %s1709_s19  ;;  %343 = vrot.lane.b32.xlu0 %v242_v30, %s1709_s19 }
  0x82   : > { %357 = vrot.lane.b32.xlu1 %v243_v31, %s1710_s24  ;;  %355 = vrot.lane.b32.xlu0 %v242_v30, %s1710_s24 }
  0x86   : > { %371 = vrot.lane.b32.xlu1 %v247_v35, %s1706_s20  ;;  %369 = vrot.lane.b32.xlu0 %v246_v34, %s1706_s20  ;;  %s1999_s20 = sld [smem:[#allocation9 + $0xb]] }
  0x8a   : > { %382 = vrot.lane.b32.xlu1 %v247_v35, %s1705_s18  ;;  %380 = vrot.lane.b32.xlu0 %v246_v34, %s1705_s18  ;;  %s1991_s18 = sld [smem:[#allocation9 + $0x9]] }
  0x8e   : > { %393 = vrot.lane.b32.xlu1 %v247_v35, %s1707_s26  ;;  %391 = vrot.lane.b32.xlu0 %v246_v34, %s1707_s26  ;;  %s2005_s26 = sld [smem:[#allocation9 + $0xc]] }
  0x92   : > { %407 = vrot.lane.b32.xlu1 %v247_v35, %s1708_s27  ;;  %405 = vrot.lane.b32.xlu0 %v246_v34, %s1708_s27  ;;  %s2012_s27 = sld [smem:[#allocation9 + $0xd]] }
  0x96   : > { %418 = vrot.lane.b32.xlu1 %v247_v35, %s1709_s19  ;;  %416 = vrot.lane.b32.xlu0 %v246_v34, %s1709_s19  ;;  %s2014_s19 = sld [smem:[#allocation9 + $0xf]] }
  0x9a   : > { %429 = vrot.lane.b32.xlu1 %v247_v35, %s1710_s24  ;;  %427 = vrot.lane.b32.xlu0 %v246_v34, %s1710_s24  ;;  %s2016_s24 = sld [smem:[#allocation9 + $0xe]] }
  0xe0   : > { %v305_v36 = vpop.permute.xlu1 %304  ;;  %v294_v37 = vpop.permute.xlu0 %293 }
  0xe1   : > { %v311_v38 = vsel %vm310_vm2, 0.0, %v305_v36  ;;  %v300_v39 = vsel %vm299_vm3, 0.0, %v294_v37 }
  0xe2   : > { %314 = vst.msk [vmem:[#allocation4 + $0x1b] sm:$0xff] %vm198_vm0, %v311_v38  ;;  %302 = vst.msk [vmem:[#allocation4 + $0x3] sm:$0xff] %vm198_vm0, %v300_v39 }
  0xe4   : > { %v307_v40 = vpop.permute.xlu1 %306  ;;  %v296_v41 = vpop.permute.xlu0 %295 }
  0xe5   : > { %v312_v42 = vsel %vm310_vm2, 0.0, %v307_v40  ;;  %v301_v43 = vsel %vm299_vm3, 0.0, %v296_v41 }
  0xe6   : > { %315 = vst.msk [vmem:[#allocation4 + $0x23] sm:$0xff] %vm198_vm0, %v312_v42  ;;  %303 = vst.msk [vmem:[#allocation4 + $0xb] sm:$0xff] %vm198_vm0, %v301_v43  ;;  %v491_v43 = vstv %s1979_s30  ;;  %s2050_s30 = sld [smem:[#allocation9 + $0x18]] }
  0xe8   : > { %v319_v44 = vpop.permute.xlu1 %318  ;;  %v317_v45 = vpop.permute.xlu0 %316 }
  0xe9   : > { %v324_v46 = vsel %vm322_vm4, 0.0, %v319_v44  ;;  %v323_v47 = vsel %vm322_vm4, 0.0, %v317_v45  ;;  %v441_v49 = vld [vmem:[#allocation4] sm:$0xff]  ;;  %v449_v63 = vld [vmem:[#allocation4 + $0x18] sm:$0xff] }
  0xea   : > { %327 = vst.msk [vmem:[#allocation4 + $0x3b] sm:$0xff] %vm198_vm0, %v324_v46  ;;  %326 = vst.msk [vmem:[#allocation4 + $0x33] sm:$0xff] %vm198_vm0, %v323_v47  ;;  %v444_v54 = vmul.f32 %v443_v48, %v441_v49  ;;  %v452_v7 = vmul.f32 %v451_v62, %v449_v63  ;;  %v497_v45 = vld [vmem:[#allocation4 + $0x1] sm:$0xff] }
  0xec   : > { %v334_v50 = vpop.permute.xlu1 %333  ;;  %v332_v51 = vpop.permute.xlu0 %331  ;;  %v446_v1 = vadd.f32 %v444_v54, %v439_v55 }
  0xed   : > { %v339_v52 = vsel %vm337_vm5, %v334_v50, 0.0  ;;  %v338_v53 = vsel %vm337_vm5, %v332_v51, 0.0  ;;  %v442_v56 = vld [vmem:[#allocation4 + $0x8] sm:$0xff]  ;;  %v450_v59 = vld [vmem:[#allocation4 + $0x20] sm:$0xff] }
  0xee   : > { %342 = vst.msk [vmem:[#allocation4 + $0x6b] sm:$0xff] %vm198_vm0, %v339_v52  ;;  %341 = vst.msk [vmem:[#allocation4 + $0x63] sm:$0xff] %vm198_vm0, %v338_v53  ;;  %v445_v60 = vmul.f32 %v443_v48, %v442_v56  ;;  %v453_v4 = vmul.f32 %v451_v62, %v450_v59  ;;  %v454_v16 = vadd.f32 %v452_v7, %v446_v1  ;;  %v499_v48 = vstv %s1982_s5  ;;  %v498_v49 = vld [vmem:[#allocation4 + $0x9] sm:$0xff]  ;;  %v505_v59 = vld [vmem:[#allocation4 + $0x19] sm:$0xff]  ;;  %s2052_s5 = sld [smem:[#allocation9 + $0x17]] }
  0xef   : > { %v500_v63 = vmul.f32 %v499_v48, %v497_v45  ;;  %v562_v45 = vld [vmem:[#allocation4 + $0x22] sm:$0xff] }
  0xf0   : > { %v346_v57 = vpop.permute.xlu1 %345  ;;  %v344_v58 = vpop.permute.xlu0 %343  ;;  %v447_v2 = vadd.f32 %v445_v60, %v439_v55  ;;  %v506_v60 = vld [vmem:[#allocation4 + $0x21] sm:$0xff] }
  0xf1   : > { %v351_v61 = vsel %vm349_vm6, %v346_v57, 0.0  ;;  %v350_v0 = vsel %vm349_vm6, %v344_v58, 0.0  ;;  %v457_v8 = vld [vmem:[#allocation4 + $0x30] sm:$0xff]  ;;  %v458_v9 = vld [vmem:[#allocation4 + $0x38] sm:$0xff]  ;;  %v507_v58 = vstv %s1986_s6  ;;  %s2059_s6 = sld [smem:[#allocation9 + $0x19]] }
  0xf2   : > { %354 = vst.msk [vmem:[#allocation4 + $0x83] sm:$0xff] %vm198_vm0, %v351_v61  ;;  %353 = vst.msk [vmem:[#allocation4 + $0x7b] sm:$0xff] %vm198_vm0, %v350_v0  ;;  %v455_v11 = vadd.f32 %v453_v4, %v447_v2  ;;  %v460_v12 = vmul.f32 %v459_v3, %v457_v8  ;;  %v461_v13 = vmul.f32 %v459_v3, %v458_v9  ;;  %v523_v61 = vstv %s1988_s7  ;;  %v521_v3 = vld [vmem:[#allocation4 + $0x49] sm:$0xff]  ;;  %v522_v4 = vld [vmem:[#allocation4 + $0x51] sm:$0xff]  ;;  %s2062_s7 = sld [smem:[#allocation9 + $0x1a]] }
  0xf3   : > { %v501_v0 = vmul.f32 %v499_v48, %v498_v49  ;;  %v514_v7 = vld [vmem:[#allocation4 + $0x39] sm:$0xff]  ;;  %v508_v8 = vmul.f32 %v507_v58, %v505_v59  ;;  %v509_v9 = vmul.f32 %v507_v58, %v506_v60  ;;  %v525_v14 = vmul.f32 %v523_v61, %v522_v4 }
  0xf4   : > { %v358_v5 = vpop.permute.xlu1 %357  ;;  %v356_v6 = vpop.permute.xlu0 %355  ;;  %v462_v21 = vadd.f32 %v460_v12, %v454_v16  ;;  %v463_v23 = vadd.f32 %v461_v13, %v455_v11  ;;  %v524_v13 = vmul.f32 %v523_v61, %v521_v3  ;;  %v578_v58 = vld [vmem:[#allocation4 + $0x52] sm:$0xff] }
  0xf5   : > { %v363_v15 = vsel %vm361_vm7, %v358_v5, 0.0  ;;  %v362_v18 = vsel %vm361_vm7, %v356_v6, 0.0  ;;  %v473_v26 = vld [vmem:[#allocation4 + $0x60] sm:$0xff]  ;;  %v474_v27 = vld [vmem:[#allocation4 + $0x68] sm:$0xff]  ;;  %v515_v5 = vstv %s1991_s18  ;;  %v513_v6 = vld [vmem:[#allocation4 + $0x31] sm:$0xff]  ;;  %s2066_s18 = sld [smem:[#allocation9 + $0x1b]] }
  0xf6   : > { %366 = vst.msk [vmem:[#allocation4 + $0x9b] sm:$0xff] %vm198_vm0, %v363_v15  ;;  %365 = vst.msk [vmem:[#allocation4 + $0x93] sm:$0xff] %vm198_vm0, %v362_v18  ;;  %v470_v32 = vadd.f32 %v468_v22, %v462_v21  ;;  %v476_v33 = vmul.f32 %v475_v24, %v473_v26  ;;  %v471_v34 = vadd.f32 %v469_v25, %v463_v23  ;;  %v530_v21 = vld [vmem:[#allocation4 + $0x69] sm:$0xff]  ;;  %v539_v25 = vstv %s2005_s26  ;;  %s2070_s26 = sld [smem:[#allocation9 + $0x1d]] }
  0xf7   : > { %v477_v35 = vmul.f32 %v475_v24, %v474_v27  ;;  %v516_v15 = vmul.f32 %v515_v5, %v513_v6  ;;  %v517_v16 = vmul.f32 %v515_v5, %v514_v7 }
  0xf8   : > { %v372_v19 = vpop.permute.xlu1 %371  ;;  %v370_v20 = vpop.permute.xlu0 %369  ;;  %v478_v42 = vadd.f32 %v476_v33, %v470_v32  ;;  %v547_v33 = vstv %s2012_s27  ;;  %s2073_s27 = sld [smem:[#allocation9 + $0x1f]] }
  0xf9   : > { %v376_v29 = vsel %vm299_vm3, 0.0, %v372_v19  ;;  %v481_v36 = vld [vmem:[#allocation4 + $0x78] sm:$0xff]  ;;  %v482_v37 = vld [vmem:[#allocation4 + $0x80] sm:$0xff]  ;;  %v375_v39 = vsel %vm299_vm3, 0.0, %v370_v20  ;;  %v479_v46 = vadd.f32 %v477_v35, %v471_v34  ;;  %v531_v19 = vstv %s1999_s20  ;;  %s2068_s20 = sld [smem:[#allocation9 + $0x1c]] }
  0xfa   : > { %379 = vst.msk [vmem:[#allocation4 + $0xb3] sm:$0xff] %vm198_vm0, %v376_v29  ;;  %v484_v38 = vmul.f32 %v483_v28, %v481_v36  ;;  %v485_v40 = vmul.f32 %v483_v28, %v482_v37  ;;  %378 = vst.msk [vmem:[#allocation4 + $0xab] sm:$0xff] %vm198_vm0, %v375_v39  ;;  %v529_v20 = vld [vmem:[#allocation4 + $0x61] sm:$0xff]  ;;  %v537_v26 = vld [vmem:[#allocation4 + $0x79] sm:$0xff]  ;;  %v533_v29 = vmul.f32 %v531_v19, %v530_v21 }
  0xfb   : > { %v538_v27 = vld [vmem:[#allocation4 + $0x81] sm:$0xff]  ;;  %v532_v28 = vmul.f32 %v531_v19, %v529_v20  ;;  %v540_v36 = vmul.f32 %v539_v25, %v537_v26  ;;  %v595_v19 = vstv %s2030_s3  ;;  %s2091_s3 = sld [smem:[#allocation9 + $0x24]] }
  0xfc   : > { %v383_v30 = vpop.permute.xlu1 %382  ;;  %v381_v31 = vpop.permute.xlu0 %380  ;;  %v486_v50 = vadd.f32 %v484_v38, %v478_v42  ;;  %v487_v54 = vadd.f32 %v485_v40, %v479_v46  ;;  %v541_v37 = vmul.f32 %v539_v25, %v538_v27  ;;  %v563_v40 = vstv %s2014_s19  ;;  %v553_v42 = vld [vmem:[#allocation4 + $0x2] sm:$0xff]  ;;  %v593_v20 = vld [vmem:[#allocation4 + $0x7a] sm:$0xff]  ;;  %s2075_s19 = sld [smem:[#allocation9 + $0x1e]] }
  0xfd   : > { %v387_v41 = vsel %vm310_vm2, 0.0, %v383_v30  ;;  %v489_v51 = vld [vmem:[#allocation4 + $0x90] sm:$0xff]  ;;  %v490_v52 = vld [vmem:[#allocation4 + $0x98] sm:$0xff]  ;;  %v386_v53 = vsel %vm310_vm2, 0.0, %v381_v31  ;;  %v565_v61 = vmul.f32 %v563_v40, %v562_v45  ;;  %v594_v21 = vld [vmem:[#allocation4 + $0x82] sm:$0xff]  ;;  %v603_v27 = vstv %s2033_s15  ;;  %s2094_s15 = sld [smem:[#allocation9 + $0x26]] }
  0xfe   : > { %390 = vst.msk [vmem:[#allocation4 + $0xcb] sm:$0xff] %vm198_vm0, %v387_v41  ;;  %v492_v55 = vmul.f32 %v491_v43, %v489_v51  ;;  %v493_v56 = vmul.f32 %v491_v43, %v490_v52  ;;  %389 = vst.msk [vmem:[#allocation4 + $0xc3] sm:$0xff] %vm198_vm0, %v386_v53  ;;  %v545_v34 = vld [vmem:[#allocation4 + $0x91] sm:$0xff]  ;;  %v546_v35 = vld [vmem:[#allocation4 + $0x99] sm:$0xff]  ;;  %v555_v41 = vstv %s2016_s24  ;;  %v571_v51 = vstv %s2018_s28  ;;  %s2080_s24 = sld [smem:[#allocation9 + $0x20]]  ;;  %s2083_s28 = sld [smem:[#allocation9 + $0x21]] }
  0xff   : > { %v554_v43 = vld [vmem:[#allocation4 + $0xa] sm:$0xff]  ;;  %v548_v48 = vmul.f32 %v547_v33, %v545_v34  ;;  %v549_v49 = vmul.f32 %v547_v33, %v546_v35  ;;  %v579_v52 = vstv %s2021_s8  ;;  %v556_v53 = vmul.f32 %v555_v41, %v553_v42  ;;  %v617_v42 = vld [vmem:[#allocation4 + $0x1b] sm:$0xff]  ;;  %s2087_s8 = sld [smem:[#allocation9 + $0x22]] }
 0x100   : > { %v394_v44 = vpop.permute.xlu1 %393  ;;  %v392_v47 = vpop.permute.xlu0 %391  ;;  %v494_v1 = vadd.f32 %v492_v55, %v486_v50  ;;  %v495_v2 = vadd.f32 %v493_v56, %v487_v54  ;;  %v557_v54 = vmul.f32 %v555_v41, %v554_v43  ;;  %v581_v7 = vmul.f32 %v579_v52, %v578_v58  ;;  %v609_v35 = vld [vmem:[#allocation4 + $0x3] sm:$0xff] }
 0x101   : > { %v398_v57 = vsel %vm322_vm4, 0.0, %v394_v44  ;;  %v397_v62 = vsel %vm322_vm4, 0.0, %v392_v47  ;;  %v561_v44 = vld [vmem:[#allocation4 + $0x1a] sm:$0xff]  ;;  %v611_v34 = vstv %s2041_s16  ;;  %v619_v41 = vstv %s2047_s23  ;;  %v618_v43 = vld [vmem:[#allocation4 + $0x23] sm:$0xff]  ;;  %s2096_s16 = sld [smem:[#allocation9 + $0x25]]  ;;  %s2101_s23 = sld [smem:[#allocation9 + $0x27]] }
 0x102   : > { %401 = vst.msk [vmem:[#allocation4 + $0xe3] sm:$0xff] %vm198_vm0, %v398_v57  ;;  %400 = vst.msk [vmem:[#allocation4 + $0xdb] sm:$0xff] %vm198_vm0, %v397_v62  ;;  %v502_v10 = vadd.f32 %v500_v63, %v494_v1  ;;  %v503_v11 = vadd.f32 %v501_v0, %v495_v2  ;;  %v577_v57 = vld [vmem:[#allocation4 + $0x4a] sm:$0xff]  ;;  %v564_v60 = vmul.f32 %v563_v40, %v561_v44  ;;  %v569_v62 = vld [vmem:[#allocation4 + $0x32] sm:$0xff]  ;;  %v635_v44 = vstv %s2050_s30  ;;  %s2104_s30 = sld [smem:[#allocation9 + $0x28]] }
 0x103   : > { %v570_v63 = vld [vmem:[#allocation4 + $0x3a] sm:$0xff]  ;;  %v580_v6 = vmul.f32 %v579_v52, %v577_v57  ;;  %v612_v45 = vmul.f32 %v611_v34, %v609_v35  ;;  %v689_v35 = vld [vmem:[#allocation4 + $0x4c] sm:$0xff] }
 0x104   : > { %v408_v12 = vpop.permute.xlu1 %407  ;;  %v510_v17 = vadd.f32 %v508_v8, %v502_v10  ;;  %v511_v18 = vadd.f32 %v509_v9, %v503_v11  ;;  %v406_v24 = vpop.permute.xlu0 %405  ;;  %v572_v9 = vmul.f32 %v571_v51, %v569_v62  ;;  %v573_v10 = vmul.f32 %v571_v51, %v570_v63  ;;  %v626_v52 = vld [vmem:[#allocation4 + $0x3b] sm:$0xff] }
 0x105   : > { %v412_v0 = vsel %vm337_vm5, %v408_v12, 0.0  ;;  %v411_v1 = vsel %vm337_vm5, %v406_v24, 0.0  ;;  %v627_v51 = vstv %s2052_s5  ;;  %s2108_s5 = sld [smem:[#allocation9 + $0x29]] }
 0x106   : > { %v518_v22 = vadd.f32 %v516_v15, %v510_v17  ;;  %v519_v23 = vadd.f32 %v517_v16, %v511_v18  ;;  %415 = vst.msk [vmem:[#allocation4 + $0x113] sm:$0xff] %vm198_vm0, %v412_v0  ;;  %414 = vst.msk [vmem:[#allocation4 + $0x10b] sm:$0xff] %vm198_vm0, %v411_v1  ;;  %v585_v15 = vld [vmem:[#allocation4 + $0x62] sm:$0xff]  ;;  %v586_v16 = vld [vmem:[#allocation4 + $0x6a] sm:$0xff]  ;;  %v643_v0 = vstv %s2059_s6  ;;  %s2110_s6 = sld [smem:[#allocation9 + $0x2a]] }
 0x107   : > { %v642_v1 = vld [vmem:[#allocation4 + $0x6b] sm:$0xff] }
 0x108   : > { %v526_v30 = vadd.f32 %v524_v13, %v518_v22  ;;  %v527_v31 = vadd.f32 %v525_v14, %v519_v23  ;;  %v419_v32 = vpop.permute.xlu1 %418  ;;  %v417_v50 = vpop.permute.xlu0 %416  ;;  %v587_v14 = vstv %s2027_s17  ;;  %s2089_s17 = sld [smem:[#allocation9 + $0x23]] }
 0x109   : > { %v423_v4 = vsel %vm349_vm6, %v419_v32, 0.0  ;;  %v422_v5 = vsel %vm349_vm6, %v417_v50, 0.0  ;;  %v588_v23 = vmul.f32 %v587_v14, %v585_v15  ;;  %v589_v24 = vmul.f32 %v587_v14, %v586_v16  ;;  %v633_v50 = vld [vmem:[#allocation4 + $0x4b] sm:$0xff]  ;;  %v657_v14 = vld [vmem:[#allocation4 + $0x93] sm:$0xff] }
 0x10a   : > { %v534_v38 = vadd.f32 %v532_v28, %v526_v30  ;;  %v535_v39 = vadd.f32 %v533_v29, %v527_v31  ;;  %426 = vst.msk [vmem:[#allocation4 + $0x12b] sm:$0xff] %vm198_vm0, %v423_v4  ;;  %425 = vst.msk [vmem:[#allocation4 + $0x123] sm:$0xff] %vm198_vm0, %v422_v5  ;;  %v601_v28 = vld [vmem:[#allocation4 + $0x92] sm:$0xff]  ;;  %v602_v29 = vld [vmem:[#allocation4 + $0x9a] sm:$0xff]  ;;  %v596_v30 = vmul.f32 %v595_v19, %v593_v20  ;;  %v651_v5 = vstv %s2062_s7  ;;  %s2112_s7 = sld [smem:[#allocation9 + $0x2b]] }
 0x10b   : > { %v597_v31 = vmul.f32 %v595_v19, %v594_v21  ;;  %v605_v40 = vmul.f32 %v603_v27, %v602_v29  ;;  %v667_v19 = vstv %s2068_s20  ;;  %v665_v20 = vld [vmem:[#allocation4 + $0x4] sm:$0xff]  ;;  %v666_v21 = vld [vmem:[#allocation4 + $0xc] sm:$0xff]  ;;  %v691_v29 = vstv %s2073_s27  ;;  %s2117_s20 = sld [smem:[#allocation9 + $0x2c]]  ;;  %s2125_s27 = sld [smem:[#allocation9 + $0x2f]] }
 0x10c   : > { %v542_v46 = vadd.f32 %v540_v36, %v534_v38  ;;  %v543_v47 = vadd.f32 %v541_v37, %v535_v39  ;;  %v430_v59 = vpop.permute.xlu1 %429  ;;  %v428_v13 = vpop.permute.xlu0 %427  ;;  %v610_v36 = vld [vmem:[#allocation4 + $0xb] sm:$0xff]  ;;  %v604_v39 = vmul.f32 %v603_v27, %v601_v28  ;;  %v673_v27 = vld [vmem:[#allocation4 + $0x1c] sm:$0xff] }
 0x10d   : > { %v434_v8 = vsel %vm361_vm7, %v430_v59, 0.0  ;;  %v433_v22 = vsel %vm361_vm7, %v428_v13, 0.0  ;;  %v636_v59 = vmul.f32 %v635_v44, %v633_v50  ;;  %v658_v13 = vld [vmem:[#allocation4 + $0x9b] sm:$0xff]  ;;  %v674_v28 = vld [vmem:[#allocation4 + $0x24] sm:$0xff]  ;;  %v698_v50 = vld [vmem:[#allocation4 + $0x6c] sm:$0xff] }
 0x10e   : > { %v550_v55 = vadd.f32 %v548_v48, %v542_v46  ;;  %v551_v56 = vadd.f32 %v549_v49, %v543_v47  ;;  %437 = vst.msk [vmem:[#allocation4 + $0x143] sm:$0xff] %vm198_vm0, %v434_v8  ;;  %436 = vst.msk [vmem:[#allocation4 + $0x13b] sm:$0xff] %vm198_vm0, %v433_v22  ;;  %v613_v46 = vmul.f32 %v611_v34, %v610_v36  ;;  %v634_v47 = vld [vmem:[#allocation4 + $0x53] sm:$0xff]  ;;  %v683_v36 = vstv %s2075_s19  ;;  %s2129_s19 = sld [smem:[#allocation9 + $0x30]] }
 0x10f   : > { %v637_v58 = vmul.f32 %v635_v44, %v634_v47  ;;  %v645_v8 = vmul.f32 %v643_v0, %v642_v1  ;;  %v692_v44 = vmul.f32 %v691_v29, %v689_v35  ;;  %v754_v35 = vld [vmem:[#allocation4 + $0x6d] sm:$0xff] }
 0x110   : > { %v558_v2 = vadd.f32 %v556_v53, %v550_v55  ;;  %v559_v3 = vadd.f32 %v557_v54, %v551_v56  ;;  %v625_v53 = vld [vmem:[#allocation4 + $0x33] sm:$0xff]  ;;  %v620_v54 = vmul.f32 %v619_v41, %v617_v42  ;;  %v621_v55 = vmul.f32 %v619_v41, %v618_v43 }
 0x112   : > { %v566_v11 = vadd.f32 %v564_v60, %v558_v2  ;;  %v567_v12 = vadd.f32 %v565_v61, %v559_v3  ;;  %v629_v60 = vmul.f32 %v627_v51, %v626_v52  ;;  %v628_v61 = vmul.f32 %v627_v51, %v625_v53  ;;  %v641_v2 = vld [vmem:[#allocation4 + $0x63] sm:$0xff] }
 0x113   : > { %v697_v51 = vld [vmem:[#allocation4 + $0x64] sm:$0xff] }
 0x114   : > { %v574_v17 = vadd.f32 %v572_v9, %v566_v11  ;;  %v575_v18 = vadd.f32 %v573_v10, %v567_v12  ;;  %v644_v9 = vmul.f32 %v643_v0, %v641_v2  ;;  %v659_v12 = vstv %s2066_s18  ;;  %s2115_s18 = sld [smem:[#allocation9 + $0x2d]] }
 0x115   : > { %v661_v22 = vmul.f32 %v659_v12, %v658_v13  ;;  %v730_v13 = vld [vmem:[#allocation4 + $0x25] sm:$0xff] }
 0x116   : > { %v582_v25 = vadd.f32 %v580_v6, %v574_v17  ;;  %v583_v26 = vadd.f32 %v581_v7, %v575_v18  ;;  %v650_v6 = vld [vmem:[#allocation4 + $0x83] sm:$0xff]  ;;  %v649_v7 = vld [vmem:[#allocation4 + $0x7b] sm:$0xff] }
 0x117   : > { %v653_v15 = vmul.f32 %v651_v5, %v650_v6  ;;  %v652_v16 = vmul.f32 %v651_v5, %v649_v7  ;;  %v721_v5 = vld [vmem:[#allocation4 + $0x5] sm:$0xff]  ;;  %v722_v6 = vld [vmem:[#allocation4 + $0xd] sm:$0xff] }
 0x118   : > { %v590_v32 = vadd.f32 %v588_v23, %v582_v25  ;;  %v591_v33 = vadd.f32 %v589_v24, %v583_v26  ;;  %v660_v25 = vmul.f32 %v659_v12, %v657_v14  ;;  %v675_v26 = vstv %s2070_s26  ;;  %v729_v12 = vld [vmem:[#allocation4 + $0x1d] sm:$0xff]  ;;  %s2122_s26 = sld [smem:[#allocation9 + $0x2e]] }
 0x119   : > { %v747_v14 = vstv %s2094_s15  ;;  %s2145_s15 = sld [smem:[#allocation9 + $0x36]] }
 0x11a   : > { %v598_v37 = vadd.f32 %v596_v30, %v590_v32  ;;  %v599_v38 = vadd.f32 %v597_v31, %v591_v33  ;;  %v668_v30 = vmul.f32 %v667_v19, %v665_v20  ;;  %v669_v31 = vmul.f32 %v667_v19, %v666_v21  ;;  %v690_v32 = vld [vmem:[#allocation4 + $0x54] sm:$0xff] }
 0x11b   : > { %v693_v43 = vmul.f32 %v691_v29, %v690_v32  ;;  %v745_v20 = vld [vmem:[#allocation4 + $0x4d] sm:$0xff]  ;;  %v739_v21 = vstv %s2096_s16  ;;  %s2149_s16 = sld [smem:[#allocation9 + $0x37]] }
 0x11c   : > { %v606_v48 = vadd.f32 %v604_v39, %v598_v37  ;;  %v607_v49 = vadd.f32 %v605_v40, %v599_v38  ;;  %v682_v37 = vld [vmem:[#allocation4 + $0x3c] sm:$0xff]  ;;  %v681_v38 = vld [vmem:[#allocation4 + $0x34] sm:$0xff]  ;;  %v676_v39 = vmul.f32 %v675_v26, %v673_v27  ;;  %v677_v40 = vmul.f32 %v675_v26, %v674_v28 }
 0x11d   : > { %v748_v29 = vmul.f32 %v747_v14, %v745_v20  ;;  %v810_v20 = vld [vmem:[#allocation4 + $0x6e] sm:$0xff] }
 0x11e   : > { %v614_v56 = vadd.f32 %v612_v45, %v606_v48  ;;  %v615_v57 = vadd.f32 %v613_v46, %v607_v49  ;;  %v685_v45 = vmul.f32 %v683_v36, %v682_v37  ;;  %v684_v46 = vmul.f32 %v683_v36, %v681_v38  ;;  %v753_v36 = vld [vmem:[#allocation4 + $0x65] sm:$0xff] }
 0x11f   : > { %v699_v49 = vstv %s2080_s24  ;;  %s2131_s24 = sld [smem:[#allocation9 + $0x31]] }
 0x120   : > { %v622_v62 = vadd.f32 %v620_v54, %v614_v56  ;;  %v623_v63 = vadd.f32 %v621_v55, %v615_v57  ;;  %v707_v54 = vstv %s2083_s28  ;;  %v706_v55 = vld [vmem:[#allocation4 + $0x84] sm:$0xff]  ;;  %v705_v56 = vld [vmem:[#allocation4 + $0x7c] sm:$0xff]  ;;  %v701_v57 = vmul.f32 %v699_v49, %v698_v50  ;;  %s2134_s28 = sld [smem:[#allocation9 + $0x32]] }
 0x121   : > { %v709_v0 = vmul.f32 %v707_v54, %v706_v55  ;;  %v708_v1 = vmul.f32 %v707_v54, %v705_v56  ;;  %v777_v54 = vld [vmem:[#allocation4 + $0x6] sm:$0xff]  ;;  %v778_v55 = vld [vmem:[#allocation4 + $0xe] sm:$0xff] }
 0x122   : > { %v630_v3 = vadd.f32 %v628_v61, %v622_v62  ;;  %v631_v4 = vadd.f32 %v629_v60, %v623_v63  ;;  %v715_v61 = vstv %s2087_s8  ;;  %v714_v62 = vld [vmem:[#allocation4 + $0x9c] sm:$0xff]  ;;  %v713_v63 = vld [vmem:[#allocation4 + $0x94] sm:$0xff]  ;;  %s2136_s8 = sld [smem:[#allocation9 + $0x34]] }
 0x123   : > { %v717_v7 = vmul.f32 %v715_v61, %v714_v62  ;;  %v786_v62 = vld [vmem:[#allocation4 + $0x26] sm:$0xff] }
 0x124   : > { %v638_v10 = vadd.f32 %v636_v59, %v630_v3  ;;  %v639_v11 = vadd.f32 %v637_v58, %v631_v4  ;;  %v700_v58 = vmul.f32 %v699_v49, %v697_v51  ;;  %v723_v4 = vstv %s2089_s17  ;;  %s2139_s17 = sld [smem:[#allocation9 + $0x33]] }
 0x126   : > { %v646_v17 = vadd.f32 %v644_v9, %v638_v10  ;;  %v647_v18 = vadd.f32 %v645_v8, %v639_v11  ;;  %v716_v10 = vmul.f32 %v715_v61, %v713_v63  ;;  %v731_v11 = vstv %s2091_s3  ;;  %v785_v61 = vld [vmem:[#allocation4 + $0x1e] sm:$0xff]  ;;  %s2143_s3 = sld [smem:[#allocation9 + $0x35]] }
 0x127   : > { %v803_v63 = vstv %s2115_s18  ;;  %s2167_s18 = sld [smem:[#allocation9 + $0x3d]] }
 0x128   : > { %v654_v23 = vadd.f32 %v652_v16, %v646_v17  ;;  %v655_v24 = vadd.f32 %v653_v15, %v647_v18  ;;  %v724_v15 = vmul.f32 %v723_v4, %v721_v5  ;;  %v725_v16 = vmul.f32 %v723_v4, %v722_v6  ;;  %v746_v17 = vld [vmem:[#allocation4 + $0x55] sm:$0xff] }
 0x129   : > { %v749_v28 = vmul.f32 %v747_v14, %v746_v17  ;;  %v802_v4 = vld [vmem:[#allocation4 + $0x56] sm:$0xff]  ;;  %v795_v6 = vstv %s2117_s20  ;;  %s2171_s20 = sld [smem:[#allocation9 + $0x3e]] }
 0x12a   : > { %v662_v33 = vadd.f32 %v660_v25, %v654_v23  ;;  %v663_v34 = vadd.f32 %v661_v22, %v655_v24  ;;  %v738_v22 = vld [vmem:[#allocation4 + $0x3d] sm:$0xff]  ;;  %v737_v23 = vld [vmem:[#allocation4 + $0x35] sm:$0xff]  ;;  %v732_v24 = vmul.f32 %v731_v11, %v729_v12  ;;  %v733_v25 = vmul.f32 %v731_v11, %v730_v13 }
 0x12b   : > { %v805_v14 = vmul.f32 %v803_v63, %v802_v4 }
 0x12c   : > { %v670_v41 = vadd.f32 %v668_v30, %v662_v33  ;;  %v671_v42 = vadd.f32 %v669_v31, %v663_v34  ;;  %v741_v30 = vmul.f32 %v739_v21, %v738_v22  ;;  %v740_v31 = vmul.f32 %v739_v21, %v737_v23  ;;  %v809_v21 = vld [vmem:[#allocation4 + $0x66] sm:$0xff] }
 0x12d   : > { %v755_v34 = vstv %s2101_s23  ;;  %s2152_s23 = sld [smem:[#allocation9 + $0x38]]  ;;  %v867_v4 = vstv %s2143_s3  ;;  %s2194_s3 = sld [smem:[#allocation9 + $0x46]] }
 0x12e   : > { %v678_v47 = vadd.f32 %v676_v39, %v670_v41  ;;  %v679_v48 = vadd.f32 %v677_v40, %v671_v42  ;;  %v763_v39 = vstv %s2104_s30  ;;  %v762_v40 = vld [vmem:[#allocation4 + $0x85] sm:$0xff]  ;;  %v761_v41 = vld [vmem:[#allocation4 + $0x7d] sm:$0xff]  ;;  %v757_v42 = vmul.f32 %v755_v34, %v754_v35  ;;  %s2154_s30 = sld [smem:[#allocation9 + $0x39]] }
 0x12f   : > { %v765_v49 = vmul.f32 %v763_v39, %v762_v40  ;;  %v764_v50 = vmul.f32 %v763_v39, %v761_v41  ;;  %v833_v39 = vld [vmem:[#allocation4 + $0xa8] sm:$0xff]  ;;  %v834_v40 = vld [vmem:[#allocation4 + $0xb0] sm:$0xff] }
 0x130   : > { %v686_v52 = vadd.f32 %v684_v46, %v678_v47  ;;  %v687_v53 = vadd.f32 %v685_v45, %v679_v48  ;;  %v771_v46 = vstv %s2108_s5  ;;  %v770_v47 = vld [vmem:[#allocation4 + $0x9d] sm:$0xff]  ;;  %v769_v48 = vld [vmem:[#allocation4 + $0x95] sm:$0xff]  ;;  %s2157_s5 = sld [smem:[#allocation9 + $0x3b]] }
 0x131   : > { %v773_v56 = vmul.f32 %v771_v46, %v770_v47  ;;  %v842_v47 = vld [vmem:[#allocation4 + $0xc8] sm:$0xff] }
 0x132   : > { %v694_v59 = vadd.f32 %v692_v44, %v686_v52  ;;  %v695_v60 = vadd.f32 %v693_v43, %v687_v53  ;;  %v756_v43 = vmul.f32 %v755_v34, %v753_v36  ;;  %v779_v53 = vstv %s2110_s6  ;;  %s2160_s6 = sld [smem:[#allocation9 + $0x3a]] }
 0x134   : > { %v702_v2 = vadd.f32 %v700_v58, %v694_v59  ;;  %v703_v3 = vadd.f32 %v701_v57, %v695_v60  ;;  %v772_v59 = vmul.f32 %v771_v46, %v769_v48  ;;  %v787_v60 = vstv %s2112_s7  ;;  %v841_v46 = vld [vmem:[#allocation4 + $0xc0] sm:$0xff]  ;;  %s2164_s7 = sld [smem:[#allocation9 + $0x3c]] }
 0x135   : > { %v859_v48 = vstv %s2136_s8  ;;  %s2188_s8 = sld [smem:[#allocation9 + $0x44]] }
 0x136   : > { %v710_v8 = vadd.f32 %v708_v1, %v702_v2  ;;  %v711_v9 = vadd.f32 %v709_v0, %v703_v3  ;;  %v780_v0 = vmul.f32 %v779_v53, %v777_v54  ;;  %v781_v1 = vmul.f32 %v779_v53, %v778_v55  ;;  %v801_v3 = vld [vmem:[#allocation4 + $0x4e] sm:$0xff]  ;;  %v858_v54 = vld [vmem:[#allocation4 + $0xf8] sm:$0xff] }
 0x137   : > { %v804_v13 = vmul.f32 %v803_v63, %v801_v3  ;;  %v857_v53 = vld [vmem:[#allocation4 + $0xf0] sm:$0xff]  ;;  %v851_v55 = vstv %s2139_s17  ;;  %v861_v63 = vmul.f32 %v859_v48, %v858_v54  ;;  %s2192_s17 = sld [smem:[#allocation9 + $0x45]] }
 0x138   : > { %v718_v18 = vadd.f32 %v716_v10, %v710_v8  ;;  %v719_v19 = vadd.f32 %v717_v7, %v711_v9  ;;  %v794_v7 = vld [vmem:[#allocation4 + $0x3e] sm:$0xff]  ;;  %v793_v8 = vld [vmem:[#allocation4 + $0x36] sm:$0xff]  ;;  %v788_v9 = vmul.f32 %v787_v60, %v785_v61  ;;  %v789_v10 = vmul.f32 %v787_v60, %v786_v62  ;;  %v921_v54 = vld [vmem:[#allocation4 + $0x109] sm:$0xff] }
 0x139   : > { %v860_v62 = vmul.f32 %v859_v48, %v857_v53 }
 0x13a   : > { %v726_v26 = vadd.f32 %v724_v15, %v718_v18  ;;  %v727_v27 = vadd.f32 %v725_v16, %v719_v19  ;;  %v797_v15 = vmul.f32 %v795_v6, %v794_v7  ;;  %v796_v16 = vmul.f32 %v795_v6, %v793_v8  ;;  %v866_v6 = vld [vmem:[#allocation4 + $0x110] sm:$0xff] }
 0x13b   : > { %v811_v19 = vstv %s2122_s26  ;;  %s2173_s26 = sld [smem:[#allocation9 + $0x3f]]  ;;  %v923_v53 = vstv %s2164_s7  ;;  %s2215_s7 = sld [smem:[#allocation9 + $0x4d]] }
 0x13c   : > { %v734_v32 = vadd.f32 %v732_v24, %v726_v26  ;;  %v735_v33 = vadd.f32 %v733_v25, %v727_v27  ;;  %v819_v24 = vstv %s2125_s27  ;;  %v818_v25 = vld [vmem:[#allocation4 + $0x86] sm:$0xff]  ;;  %v817_v26 = vld [vmem:[#allocation4 + $0x7e] sm:$0xff]  ;;  %v813_v27 = vmul.f32 %v811_v19, %v810_v20  ;;  %s2175_s27 = sld [smem:[#allocation9 + $0x40]] }
 0x13d   : > { %v821_v34 = vmul.f32 %v819_v24, %v818_v25  ;;  %v820_v35 = vmul.f32 %v819_v24, %v817_v26  ;;  %v891_v25 = vstv %s2152_s23  ;;  %v889_v26 = vld [vmem:[#allocation4 + $0xa9] sm:$0xff]  ;;  %s2202_s23 = sld [smem:[#allocation9 + $0x49]] }
 0x13e   : > { %v742_v37 = vadd.f32 %v740_v31, %v734_v32  ;;  %v743_v38 = vadd.f32 %v741_v30, %v735_v33  ;;  %v827_v31 = vstv %s2129_s19  ;;  %v826_v32 = vld [vmem:[#allocation4 + $0x9e] sm:$0xff]  ;;  %v825_v33 = vld [vmem:[#allocation4 + $0x96] sm:$0xff]  ;;  %s2178_s19 = sld [smem:[#allocation9 + $0x42]] }
 0x13f   : > { %v829_v41 = vmul.f32 %v827_v31, %v826_v32  ;;  %v898_v32 = vld [vmem:[#allocation4 + $0xc9] sm:$0xff] }
 0x140   : > { %v750_v44 = vadd.f32 %v748_v29, %v742_v37  ;;  %v751_v45 = vadd.f32 %v749_v28, %v743_v38  ;;  %v812_v28 = vmul.f32 %v811_v19, %v809_v21  ;;  %v835_v38 = vstv %s2131_s24  ;;  %s2180_s24 = sld [smem:[#allocation9 + $0x41]] }
 0x142   : > { %v758_v51 = vadd.f32 %v756_v43, %v750_v44  ;;  %v759_v52 = vadd.f32 %v757_v42, %v751_v45  ;;  %v828_v43 = vmul.f32 %v827_v31, %v825_v33  ;;  %v843_v45 = vstv %s2134_s28  ;;  %v897_v31 = vld [vmem:[#allocation4 + $0xc1] sm:$0xff]  ;;  %s2185_s28 = sld [smem:[#allocation9 + $0x43]] }
 0x143   : > { %v844_v60 = vmul.f32 %v843_v45, %v841_v46  ;;  %v845_v61 = vmul.f32 %v843_v45, %v842_v47  ;;  %v915_v33 = vstv %s2157_s5  ;;  %s2210_s5 = sld [smem:[#allocation9 + $0x4b]] }
 0x144   : > { %v766_v57 = vadd.f32 %v764_v50, %v758_v51  ;;  %v767_v58 = vadd.f32 %v765_v49, %v759_v52  ;;  %v836_v51 = vmul.f32 %v835_v38, %v833_v39  ;;  %v837_v52 = vmul.f32 %v835_v38, %v834_v40 }
 0x145   : > { %v907_v40 = vstv %s2160_s6  ;;  %s2212_s6 = sld [smem:[#allocation9 + $0x4c]] }
 0x146   : > { %v774_v2 = vadd.f32 %v772_v59, %v766_v57  ;;  %v775_v5 = vadd.f32 %v773_v56, %v767_v58  ;;  %v849_v56 = vld [vmem:[#allocation4 + $0xd8] sm:$0xff]  ;;  %v850_v57 = vld [vmem:[#allocation4 + $0xe0] sm:$0xff] }
 0x147   : > { %v853_v3 = vmul.f32 %v851_v55, %v850_v57 }
 0x148   : > { %v782_v11 = vadd.f32 %v780_v0, %v774_v2  ;;  %v783_v12 = vadd.f32 %v781_v1, %v775_v5  ;;  %v852_v2 = vmul.f32 %v851_v55, %v849_v56  ;;  %v865_v5 = vld [vmem:[#allocation4 + $0x108] sm:$0xff]  ;;  %v922_v55 = vld [vmem:[#allocation4 + $0x111] sm:$0xff] }
 0x14a   : > { %v790_v17 = vadd.f32 %v788_v9, %v782_v11  ;;  %v791_v18 = vadd.f32 %v789_v10, %v783_v12  ;;  %v875_v9 = vstv %s2145_s15  ;;  %v873_v10 = vld [vmem:[#allocation4 + $0x120] sm:$0xff]  ;;  %v874_v11 = vld [vmem:[#allocation4 + $0x128] sm:$0xff]  ;;  %v883_v12 = vstv %s2149_s16  ;;  %s2196_s15 = sld [smem:[#allocation9 + $0x47]]  ;;  %s2198_s16 = sld [smem:[#allocation9 + $0x48]] }
 0x14b   : > { %v876_v19 = vmul.f32 %v875_v9, %v873_v10  ;;  %v877_v20 = vmul.f32 %v875_v9, %v874_v11  ;;  %v945_v9 = vld [vmem:[#allocation4 + $0xaa] sm:$0xff]  ;;  %v946_v10 = vld [vmem:[#allocation4 + $0xb2] sm:$0xff] }
 0x14c   : > { %v798_v22 = vadd.f32 %v796_v16, %v790_v17  ;;  %v799_v23 = vadd.f32 %v797_v15, %v791_v18  ;;  %v868_v17 = vmul.f32 %v867_v4, %v865_v5  ;;  %v869_v18 = vmul.f32 %v867_v4, %v866_v6 }
 0x14e   : > { %v806_v29 = vadd.f32 %v804_v13, %v798_v22  ;;  %v807_v30 = vadd.f32 %v805_v14, %v799_v23  ;;  %v881_v13 = vld [vmem:[#allocation4 + $0x138] sm:$0xff]  ;;  %v882_v14 = vld [vmem:[#allocation4 + $0x140] sm:$0xff] }
 0x14f   : > { %v884_v23 = vmul.f32 %v883_v12, %v881_v13  ;;  %v885_v24 = vmul.f32 %v883_v12, %v882_v14 }
 0x150   : > { %v814_v36 = vadd.f32 %v812_v28, %v806_v29  ;;  %v815_v37 = vadd.f32 %v813_v27, %v807_v30  ;;  %v890_v27 = vld [vmem:[#allocation4 + $0xb1] sm:$0xff]  ;;  %v899_v30 = vstv %s2154_s30  ;;  %s2206_s30 = sld [smem:[#allocation9 + $0x4a]] }
 0x152   : > { %v822_v42 = vadd.f32 %v820_v35, %v814_v36  ;;  %v823_v44 = vadd.f32 %v821_v34, %v815_v37  ;;  %v892_v34 = vmul.f32 %v891_v25, %v889_v26  ;;  %v893_v35 = vmul.f32 %v891_v25, %v890_v27  ;;  %v913_v36 = vld [vmem:[#allocation4 + $0xf1] sm:$0xff]  ;;  %v914_v37 = vld [vmem:[#allocation4 + $0xf9] sm:$0xff]  ;;  %v962_v27 = vld [vmem:[#allocation4 + $0xe2] sm:$0xff] }
 0x153   : > { %v916_v47 = vmul.f32 %v915_v33, %v913_v36  ;;  %v917_v48 = vmul.f32 %v915_v33, %v914_v37  ;;  %v963_v25 = vstv %s2180_s24  ;;  %v961_v26 = vld [vmem:[#allocation4 + $0xda] sm:$0xff]  ;;  %s2233_s24 = sld [smem:[#allocation9 + $0x53]] }
 0x154   : > { %v830_v49 = vadd.f32 %v828_v43, %v822_v42  ;;  %v831_v50 = vadd.f32 %v829_v41, %v823_v44  ;;  %v905_v41 = vld [vmem:[#allocation4 + $0xd9] sm:$0xff]  ;;  %v906_v42 = vld [vmem:[#allocation4 + $0xe1] sm:$0xff]  ;;  %v900_v43 = vmul.f32 %v899_v30, %v897_v31  ;;  %v901_v44 = vmul.f32 %v899_v30, %v898_v32 }
 0x156   : > { %v838_v58 = vadd.f32 %v836_v51, %v830_v49  ;;  %v839_v59 = vadd.f32 %v837_v52, %v831_v50  ;;  %v908_v49 = vmul.f32 %v907_v40, %v905_v41  ;;  %v909_v50 = vmul.f32 %v907_v40, %v906_v42  ;;  %v978_v40 = vld [vmem:[#allocation4 + $0x112] sm:$0xff] }
 0x158   : > { %v846_v0 = vadd.f32 %v844_v60, %v838_v58  ;;  %v847_v1 = vadd.f32 %v845_v61, %v839_v59  ;;  %v931_v58 = vstv %s2167_s18  ;;  %v929_v59 = vld [vmem:[#allocation4 + $0x121] sm:$0xff]  ;;  %v930_v60 = vld [vmem:[#allocation4 + $0x129] sm:$0xff]  ;;  %v924_v61 = vmul.f32 %v923_v53, %v921_v54  ;;  %s2217_s18 = sld [smem:[#allocation9 + $0x4e]] }
 0x159   : > { %v932_v4 = vmul.f32 %v931_v58, %v929_v59  ;;  %v933_v5 = vmul.f32 %v931_v58, %v930_v60  ;;  %v1002_v58 = vld [vmem:[#allocation4 + $0xb3] sm:$0xff]  ;;  %v1001_v59 = vld [vmem:[#allocation4 + $0xab] sm:$0xff] }
 0x15a   : > { %v854_v7 = vadd.f32 %v852_v2, %v846_v0  ;;  %v855_v8 = vadd.f32 %v853_v3, %v847_v1  ;;  %v939_v1 = vstv %s2171_s20  ;;  %v937_v2 = vld [vmem:[#allocation4 + $0x139] sm:$0xff]  ;;  %v938_v3 = vld [vmem:[#allocation4 + $0x141] sm:$0xff]  ;;  %s2219_s20 = sld [smem:[#allocation9 + $0x4f]] }
 0x15b   : > { %v940_v13 = vmul.f32 %v939_v1, %v937_v2  ;;  %v941_v14 = vmul.f32 %v939_v1, %v938_v3  ;;  %v1010_v1 = vld [vmem:[#allocation4 + $0xcb] sm:$0xff]  ;;  %v1009_v2 = vld [vmem:[#allocation4 + $0xc3] sm:$0xff]  ;;  %v1019_v3 = vstv %s2198_s16  ;;  %s2252_s16 = sld [smem:[#allocation9 + $0x59]] }
 0x15c   : > { %v862_v15 = vadd.f32 %v860_v62, %v854_v7  ;;  %v863_v16 = vadd.f32 %v861_v63, %v855_v8  ;;  %v925_v62 = vmul.f32 %v923_v53, %v922_v55  ;;  %v947_v8 = vstv %s2173_s26  ;;  %s2223_s26 = sld [smem:[#allocation9 + $0x50]] }
 0x15e   : > { %v870_v21 = vadd.f32 %v868_v17, %v862_v15  ;;  %v871_v22 = vadd.f32 %v869_v18, %v863_v16  ;;  %v955_v15 = vstv %s2175_s27  ;;  %v953_v16 = vld [vmem:[#allocation4 + $0xc2] sm:$0xff]  ;;  %v954_v17 = vld [vmem:[#allocation4 + $0xca] sm:$0xff]  ;;  %v971_v18 = vstv %s2178_s19  ;;  %s2227_s27 = sld [smem:[#allocation9 + $0x51]]  ;;  %s2231_s19 = sld [smem:[#allocation9 + $0x52]] }
 0x160   : > { %v878_v28 = vadd.f32 %v876_v19, %v870_v21  ;;  %v879_v29 = vadd.f32 %v877_v20, %v871_v22  ;;  %v948_v19 = vmul.f32 %v947_v8, %v945_v9  ;;  %v949_v20 = vmul.f32 %v947_v8, %v946_v10  ;;  %v969_v21 = vld [vmem:[#allocation4 + $0xf2] sm:$0xff]  ;;  %v970_v22 = vld [vmem:[#allocation4 + $0xfa] sm:$0xff] }
 0x161   : > { %v972_v32 = vmul.f32 %v971_v18, %v969_v21  ;;  %v973_v33 = vmul.f32 %v971_v18, %v970_v22  ;;  %v1025_v10 = vld [vmem:[#allocation4 + $0xf3] sm:$0xff] }
 0x162   : > { %v886_v38 = vadd.f32 %v884_v23, %v878_v28  ;;  %v887_v39 = vadd.f32 %v885_v24, %v879_v29  ;;  %v956_v28 = vmul.f32 %v955_v15, %v953_v16  ;;  %v957_v29 = vmul.f32 %v955_v15, %v954_v17 }
 0x164   : > { %v894_v45 = vadd.f32 %v892_v34, %v886_v38  ;;  %v895_v46 = vadd.f32 %v893_v35, %v887_v39  ;;  %v964_v34 = vmul.f32 %v963_v25, %v961_v26  ;;  %v965_v35 = vmul.f32 %v963_v25, %v962_v27  ;;  %v977_v39 = vld [vmem:[#allocation4 + $0x10a] sm:$0xff] }
 0x165   : > { %v979_v38 = vstv %s2185_s28  ;;  %v1033_v25 = vld [vmem:[#allocation4 + $0x10b] sm:$0xff]  ;;  %s2236_s28 = sld [smem:[#allocation9 + $0x54]] }
 0x166   : > { %v902_v51 = vadd.f32 %v900_v43, %v894_v45  ;;  %v903_v52 = vadd.f32 %v901_v44, %v895_v46  ;;  %v987_v43 = vstv %s2188_s8  ;;  %v985_v44 = vld [vmem:[#allocation4 + $0x122] sm:$0xff]  ;;  %v986_v45 = vld [vmem:[#allocation4 + $0x12a] sm:$0xff]  ;;  %v980_v46 = vmul.f32 %v979_v38, %v977_v39  ;;  %s2238_s8 = sld [smem:[#allocation9 + $0x55]] }
 0x167   : > { %v988_v53 = vmul.f32 %v987_v43, %v985_v44  ;;  %v989_v54 = vmul.f32 %v987_v43, %v986_v45  ;;  %v1058_v43 = vld [vmem:[#allocation4 + $0xb4] sm:$0xff]  ;;  %v1057_v44 = vld [vmem:[#allocation4 + $0xac] sm:$0xff] }
 0x168   : > { %v910_v56 = vadd.f32 %v908_v49, %v902_v51  ;;  %v911_v57 = vadd.f32 %v909_v50, %v903_v52  ;;  %v995_v50 = vstv %s2192_s17  ;;  %v993_v51 = vld [vmem:[#allocation4 + $0x13a] sm:$0xff]  ;;  %v994_v52 = vld [vmem:[#allocation4 + $0x142] sm:$0xff]  ;;  %s2240_s17 = sld [smem:[#allocation9 + $0x56]] }
 0x16a   : > { %v918_v63 = vadd.f32 %v916_v47, %v910_v56  ;;  %v919_v0 = vadd.f32 %v917_v48, %v911_v57  ;;  %v981_v47 = vmul.f32 %v979_v38, %v978_v40  ;;  %v1003_v57 = vstv %s2194_s3  ;;  %s2244_s3 = sld [smem:[#allocation9 + $0x57]] }
 0x16c   : > { %v926_v6 = vadd.f32 %v924_v61, %v918_v63  ;;  %v927_v7 = vadd.f32 %v925_v62, %v919_v0  ;;  %v996_v62 = vmul.f32 %v995_v50, %v993_v51  ;;  %v997_v63 = vmul.f32 %v995_v50, %v994_v52  ;;  %v1066_v50 = vld [vmem:[#allocation4 + $0xcc] sm:$0xff]  ;;  %v1065_v51 = vld [vmem:[#allocation4 + $0xc4] sm:$0xff] }
 0x16d   : > { %v1011_v0 = vstv %s2196_s15  ;;  %v1075_v52 = vstv %s2219_s20  ;;  %s2248_s15 = sld [smem:[#allocation9 + $0x58]] }
 0x16e   : > { %v934_v11 = vadd.f32 %v932_v4, %v926_v6  ;;  %v935_v12 = vadd.f32 %v933_v5, %v927_v7  ;;  %v1005_v4 = vmul.f32 %v1003_v57, %v1002_v58  ;;  %v1004_v5 = vmul.f32 %v1003_v57, %v1001_v59  ;;  %v1018_v6 = vld [vmem:[#allocation4 + $0xe3] sm:$0xff]  ;;  %v1017_v7 = vld [vmem:[#allocation4 + $0xdb] sm:$0xff]  ;;  %s2273_s20 = sld [smem:[#allocation9 + $0x60]] }
 0x16f   : > { %v1021_v17 = vmul.f32 %v1019_v3, %v1018_v6  ;;  %v1020_v18 = vmul.f32 %v1019_v3, %v1017_v7  ;;  %v1081_v59 = vld [vmem:[#allocation4 + $0xf4] sm:$0xff] }
 0x170   : > { %v942_v23 = vadd.f32 %v940_v13, %v934_v11  ;;  %v943_v24 = vadd.f32 %v941_v14, %v935_v12  ;;  %v1026_v11 = vld [vmem:[#allocation4 + $0xfb] sm:$0xff]  ;;  %v1027_v12 = vstv %s2202_s23  ;;  %v1013_v13 = vmul.f32 %v1011_v0, %v1010_v1  ;;  %s2254_s23 = sld [smem:[#allocation9 + $0x5a]] }
 0x171   : > { %v1012_v14 = vmul.f32 %v1011_v0, %v1009_v2 }
 0x172   : > { %v950_v30 = vadd.f32 %v948_v19, %v942_v23  ;;  %v951_v31 = vadd.f32 %v949_v20, %v943_v24  ;;  %v1028_v19 = vmul.f32 %v1027_v12, %v1025_v10  ;;  %v1029_v20 = vmul.f32 %v1027_v12, %v1026_v11  ;;  %v1034_v24 = vld [vmem:[#allocation4 + $0x113] sm:$0xff] }
 0x173   : > { %v1035_v23 = vstv %s2206_s30  ;;  %v1089_v10 = vld [vmem:[#allocation4 + $0x10c] sm:$0xff]  ;;  %s2257_s30 = sld [smem:[#allocation9 + $0x5b]] }
 0x174   : > { %v958_v36 = vadd.f32 %v956_v28, %v950_v30  ;;  %v959_v37 = vadd.f32 %v957_v29, %v951_v31  ;;  %v1043_v28 = vstv %s2210_s5  ;;  %v1042_v29 = vld [vmem:[#allocation4 + $0x12b] sm:$0xff]  ;;  %v1041_v30 = vld [vmem:[#allocation4 + $0x123] sm:$0xff]  ;;  %v1037_v31 = vmul.f32 %v1035_v23, %v1034_v24  ;;  %s2259_s5 = sld [smem:[#allocation9 + $0x5c]] }
 0x175   : > { %v1045_v38 = vmul.f32 %v1043_v28, %v1042_v29  ;;  %v1044_v39 = vmul.f32 %v1043_v28, %v1041_v30  ;;  %v1114_v28 = vld [vmem:[#allocation4 + $0xb5] sm:$0xff]  ;;  %v1113_v29 = vld [vmem:[#allocation4 + $0xad] sm:$0xff] }
 0x176   : > { %v966_v41 = vadd.f32 %v964_v34, %v958_v36  ;;  %v967_v42 = vadd.f32 %v965_v35, %v959_v37  ;;  %v1051_v35 = vstv %s2212_s6  ;;  %v1050_v36 = vld [vmem:[#allocation4 + $0x143] sm:$0xff]  ;;  %v1049_v37 = vld [vmem:[#allocation4 + $0x13b] sm:$0xff]  ;;  %s2261_s6 = sld [smem:[#allocation9 + $0x5d]] }
 0x177   : > { %v1053_v45 = vmul.f32 %v1051_v35, %v1050_v36  ;;  %v1121_v36 = vld [vmem:[#allocation4 + $0xc5] sm:$0xff] }
 0x178   : > { %v974_v48 = vadd.f32 %v972_v32, %v966_v41  ;;  %v975_v49 = vadd.f32 %v973_v33, %v967_v42  ;;  %v1036_v32 = vmul.f32 %v1035_v23, %v1033_v25  ;;  %v1059_v42 = vstv %s2215_s7  ;;  %s2265_s7 = sld [smem:[#allocation9 + $0x5e]] }
 0x17a   : > { %v982_v55 = vadd.f32 %v980_v46, %v974_v48  ;;  %v983_v56 = vadd.f32 %v981_v47, %v975_v49  ;;  %v1052_v48 = vmul.f32 %v1051_v35, %v1049_v37  ;;  %v1067_v49 = vstv %s2217_s18  ;;  %v1122_v35 = vld [vmem:[#allocation4 + $0xcd] sm:$0xff]  ;;  %s2269_s18 = sld [smem:[#allocation9 + $0x5f]] }
 0x17b   : > { %v1131_v37 = vstv %s2240_s17 }
 0x17c   : > { %v990_v60 = vadd.f32 %v988_v53, %v982_v55  ;;  %v991_v61 = vadd.f32 %v989_v54, %v983_v56  ;;  %v1061_v53 = vmul.f32 %v1059_v42, %v1058_v43  ;;  %v1060_v54 = vmul.f32 %v1059_v42, %v1057_v44  ;;  %v1074_v55 = vld [vmem:[#allocation4 + $0xe4] sm:$0xff]  ;;  %v1073_v56 = vld [vmem:[#allocation4 + $0xdc] sm:$0xff] }
 0x17d   : > { %v1077_v2 = vmul.f32 %v1075_v52, %v1074_v55  ;;  %v1076_v3 = vmul.f32 %v1075_v52, %v1073_v56  ;;  %v1137_v44 = vld [vmem:[#allocation4 + $0xf5] sm:$0xff] }
 0x17e   : > { %v998_v8 = vadd.f32 %v996_v62, %v990_v60  ;;  %v999_v9 = vadd.f32 %v997_v63, %v991_v61  ;;  %v1082_v60 = vld [vmem:[#allocation4 + $0xfc] sm:$0xff]  ;;  %v1083_v61 = vstv %s2223_s26  ;;  %v1069_v62 = vmul.f32 %v1067_v49, %v1066_v50  ;;  %s2275_s26 = sld [smem:[#allocation9 + $0x61]] }
 0x17f   : > { %v1068_v63 = vmul.f32 %v1067_v49, %v1065_v51 }
 0x180   : > { %v1006_v15 = vadd.f32 %v1004_v5, %v998_v8  ;;  %v1007_v16 = vadd.f32 %v1005_v4, %v999_v9  ;;  %v1084_v4 = vmul.f32 %v1083_v61, %v1081_v59  ;;  %v1085_v5 = vmul.f32 %v1083_v61, %v1082_v60  ;;  %v1090_v9 = vld [vmem:[#allocation4 + $0x114] sm:$0xff] }
 0x181   : > { %v1091_v8 = vstv %s2227_s27  ;;  %v1145_v59 = vld [vmem:[#allocation4 + $0x10d] sm:$0xff]  ;;  %s1359_s27 = sshll.u32 %s1874_s4, 4 }
 0x182   : > { %v1014_v21 = vadd.f32 %v1012_v14, %v1006_v15  ;;  %v1015_v22 = vadd.f32 %v1013_v13, %v1007_v16  ;;  %v1099_v13 = vstv %s2231_s19  ;;  %v1098_v14 = vld [vmem:[#allocation4 + $0x12c] sm:$0xff]  ;;  %v1097_v15 = vld [vmem:[#allocation4 + $0x124] sm:$0xff]  ;;  %v1093_v16 = vmul.f32 %v1091_v8, %v1090_v9  ;;  %s1472_s19 = sshll.u32 %s1689_s12, 8 }
 0x183   : > { %v1101_v23 = vmul.f32 %v1099_v13, %v1098_v14  ;;  %v1100_v24 = vmul.f32 %v1099_v13, %v1097_v15  ;;  %v1170_v13 = vld [vmem:[#allocation4 + $0xb6] sm:$0xff]  ;;  %v1169_v14 = vld [vmem:[#allocation4 + $0xae] sm:$0xff] }
 0x184   : > { %v1022_v26 = vadd.f32 %v1020_v18, %v1014_v21  ;;  %v1023_v27 = vadd.f32 %v1021_v17, %v1015_v22  ;;  %v1092_v17 = vmul.f32 %v1091_v8, %v1089_v10  ;;  %v1106_v21 = vld [vmem:[#allocation4 + $0x144] sm:$0xff]  ;;  %v1105_v22 = vld [vmem:[#allocation4 + $0x13c] sm:$0xff] }
 0x186   : > { %v1030_v33 = vadd.f32 %v1028_v19, %v1022_v26  ;;  %v1031_v34 = vadd.f32 %v1029_v20, %v1023_v27  ;;  %v1107_v20 = vstv %s2233_s24  ;;  %v1115_v27 = vstv %s2236_s28  ;;  %s192_s24 = scalar_lea.vmem [#allocation10], %s1359_s27 }
 0x187   : > { %v1109_v30 = vmul.f32 %v1107_v20, %v1106_v21  ;;  %v1177_v21 = vld [vmem:[#allocation4 + $0xc6] sm:$0xff]  ;;  %s1252_s28 = sshll.u32 %s192_s24, 4  ;;  %s2288_s28 = int_to_ptr.vmem [resolvable:$true] %s1252_s28 }
 0x188   : > { %v1038_v40 = vadd.f32 %v1036_v32, %v1030_v33  ;;  %v1039_v41 = vadd.f32 %v1037_v31, %v1031_v34  ;;  %v1108_v33 = vmul.f32 %v1107_v20, %v1105_v22  ;;  %v1123_v34 = vstv %s2238_s8  ;;  %v1178_v20 = vld [vmem:[#allocation4 + $0xce] sm:$0xff]  ;;  %s1611_s12 = scalar_lea.vmem %s2288_s28, 256 }
 0x189   : > { %v1187_v22 = vstv %s2261_s6  ;;  %p1612_p12 = scmp.ne.s32.totalorder %s2288_s28, %s1611_s12 }
 0x18a   : > { %v1046_v46 = vadd.f32 %v1044_v39, %v1038_v40  ;;  %v1047_v47 = vadd.f32 %v1045_v38, %v1039_v41  ;;  %v1117_v38 = vmul.f32 %v1115_v27, %v1114_v28  ;;  %v1116_v39 = vmul.f32 %v1115_v27, %v1113_v29  ;;  %v1130_v40 = vld [vmem:[#allocation4 + $0xe5] sm:$0xff]  ;;  %v1129_v41 = vld [vmem:[#allocation4 + $0xdd] sm:$0xff] }
 0x18b   : > { %v1133_v51 = vmul.f32 %v1131_v37, %v1130_v40  ;;  %v1132_v52 = vmul.f32 %v1131_v37, %v1129_v41  ;;  %v1193_v29 = vld [vmem:[#allocation4 + $0xf6] sm:$0xff]  ;;  %p1613_p13 = pnand %p1612_p12, %p2357_p2 }
 0x18c   : > { %v1054_v57 = vadd.f32 %v1052_v48, %v1046_v46  ;;  %v1055_v58 = vadd.f32 %v1053_v45, %v1047_v47  ;;  %v1138_v45 = vld [vmem:[#allocation4 + $0xfd] sm:$0xff]  ;;  %v1139_v46 = vstv %s2244_s3  ;;  %v1125_v47 = vmul.f32 %v1123_v34, %v1122_v35  ;;  %s2286_s3 = scalar_lea.hbm %s2341_s2, %s1472_s19 }
 0x18d   : > { %v1124_v48 = vmul.f32 %v1123_v34, %v1121_v36  ;;  %p1614_p6 = pneg %p1613_p13 }
 0x18e   : > { %v1062_v0 = vadd.f32 %v1060_v54, %v1054_v57  ;;  %v1063_v1 = vadd.f32 %v1061_v53, %v1055_v58  ;;  %v1140_v53 = vmul.f32 %v1139_v46, %v1137_v44  ;;  %v1141_v54 = vmul.f32 %v1139_v46, %v1138_v45  ;;  %v1146_v58 = vld [vmem:[#allocation4 + $0x115] sm:$0xff] }
 0x18f   : > { %v1147_v57 = vstv %s2248_s15  ;;  %v1201_v44 = vld [vmem:[#allocation4 + $0x10e] sm:$0xff]  ;;  %s1239_s15 = scalar_lea.sflag [#allocation7], %s1874_s4 }
 0x190   : > { %v1070_v6 = vadd.f32 %v1068_v63, %v1062_v0  ;;  %v1071_v7 = vadd.f32 %v1069_v62, %v1063_v1  ;;  %v1155_v62 = vstv %s2252_s16  ;;  %v1154_v63 = vld [vmem:[#allocation4 + $0x12d] sm:$0xff]  ;;  %v1153_v0 = vld [vmem:[#allocation4 + $0x125] sm:$0xff]  ;;  %v1149_v1 = vmul.f32 %v1147_v57, %v1146_v58  ;;  %s1711_s16 = smov [#allocation10]  }
 0x191   : > { %v1157_v8 = vmul.f32 %v1155_v62, %v1154_v63  ;;  %v1156_v9 = vmul.f32 %v1155_v62, %v1153_v0 }
 0x192   : > { %v1078_v11 = vadd.f32 %v1076_v3, %v1070_v6  ;;  %v1079_v12 = vadd.f32 %v1077_v2, %v1071_v7  ;;  %v1148_v2 = vmul.f32 %v1147_v57, %v1145_v59  ;;  %v1162_v6 = vld [vmem:[#allocation4 + $0x145] sm:$0xff]  ;;  %v1161_v7 = vld [vmem:[#allocation4 + $0x13d] sm:$0xff] }
 0x194   : > { %v1086_v18 = vadd.f32 %v1084_v4, %v1078_v11  ;;  %v1087_v19 = vadd.f32 %v1085_v5, %v1079_v12  ;;  %v1163_v5 = vstv %s2254_s23  ;;  %v1171_v12 = vstv %s2257_s30  ;;  %s1615_s23 = sshll.u32 %s1711_s16, 4  ;;  %s1616_s23 = int_to_ptr.vmem [resolvable:$false] %s1615_s23 }
 0x195   : > { %v1165_v15 = vmul.f32 %v1163_v5, %v1162_v6  ;;  %s1617_s30 = scalar_lea.vmem %s1616_s23, 512  ;;  %p1618_p0 = scmp.lt.s32.totalorder %s2288_s28, %s1616_s23 }
 0x196   : > { %v1094_v25 = vadd.f32 %v1092_v17, %v1086_v18  ;;  %v1095_v26 = vadd.f32 %v1093_v16, %v1087_v19  ;;  %v1164_v18 = vmul.f32 %v1163_v5, %v1161_v7  ;;  %v1179_v19 = vstv %s2259_s5  ;;  %p1619_p1 = scmp.lt.s32.totalorder %s1617_s30, %s1611_s12 }
 0x198   : > { %v1102_v31 = vadd.f32 %v1100_v24, %v1094_v25  ;;  %v1103_v32 = vadd.f32 %v1101_v23, %v1095_v26  ;;  %v1173_v23 = vmul.f32 %v1171_v12, %v1170_v13  ;;  %v1172_v24 = vmul.f32 %v1171_v12, %v1169_v14  ;;  %v1186_v25 = vld [vmem:[#allocation4 + $0xe6] sm:$0xff]  ;;  %v1185_v26 = vld [vmem:[#allocation4 + $0xde] sm:$0xff]  ;;  %p1620_p9 = por %p1619_p1, %p1618_p0 }
 0x199   : > { %v1189_v36 = vmul.f32 %v1187_v22, %v1186_v25  ;;  %v1188_v37 = vmul.f32 %v1187_v22, %v1185_v26 }
 0x19a   : > { %v1110_v42 = vadd.f32 %v1108_v33, %v1102_v31  ;;  %v1111_v43 = vadd.f32 %v1109_v30, %v1103_v32  ;;  %v1195_v30 = vstv %s2265_s7  ;;  %v1194_v31 = vld [vmem:[#allocation4 + $0xfe] sm:$0xff]  ;;  %v1181_v32 = vmul.f32 %v1179_v19, %v1178_v20  ;;  %p1621_p8 = pnand %p1620_p9, %p1614_p6 }
 0x19b   : > { %v1180_v33 = vmul.f32 %v1179_v19, %v1177_v21  ;;  %v1197_v41 = vmul.f32 %v1195_v30, %v1194_v31 }
 0x19c   : > { %v1118_v49 = vadd.f32 %v1116_v39, %v1110_v42  ;;  %v1119_v50 = vadd.f32 %v1117_v38, %v1111_v43  ;;  %v1196_v38 = vmul.f32 %v1195_v30, %v1193_v29  ;;  %v1203_v42 = vstv %s2269_s18  ;;  %v1202_v43 = vld [vmem:[#allocation4 + $0x116] sm:$0xff] }
 0x19e   : > { %v1126_v55 = vadd.f32 %v1124_v48, %v1118_v49  ;;  %v1127_v56 = vadd.f32 %v1125_v47, %v1119_v50  ;;  %v1211_v47 = vstv %s2273_s20  ;;  %v1210_v48 = vld [vmem:[#allocation4 + $0x12e] sm:$0xff]  ;;  %v1209_v49 = vld [vmem:[#allocation4 + $0x126] sm:$0xff]  ;;  %v1205_v50 = vmul.f32 %v1203_v42, %v1202_v43 }
 0x19f   : > { %v1213_v57 = vmul.f32 %v1211_v47, %v1210_v48  ;;  %v1212_v58 = vmul.f32 %v1211_v47, %v1209_v49 }
 0x1a0   : > { %v1134_v60 = vadd.f32 %v1132_v52, %v1126_v55  ;;  %v1135_v61 = vadd.f32 %v1133_v51, %v1127_v56  ;;  %v1204_v51 = vmul.f32 %v1203_v42, %v1201_v44  ;;  %v1218_v55 = vld [vmem:[#allocation4 + $0x146] sm:$0xff]  ;;  %v1217_v56 = vld [vmem:[#allocation4 + $0x13e] sm:$0xff] }
 0x1a2   : > { %v1142_v3 = vadd.f32 %v1140_v53, %v1134_v60  ;;  %v1143_v4 = vadd.f32 %v1141_v54, %v1135_v61  ;;  %v1219_v54 = vstv %s2275_s26 }
 0x1a3   : > { %v1221_v61 = vmul.f32 %v1219_v54, %v1218_v55  ;;  %v1220_v63 = vmul.f32 %v1219_v54, %v1217_v56 }
 0x1a4   : > { %v1150_v10 = vadd.f32 %v1148_v2, %v1142_v3  ;;  %v1151_v11 = vadd.f32 %v1149_v1, %v1143_v4 }
 0x1a6   : > { %v1158_v16 = vadd.f32 %v1156_v9, %v1150_v10  ;;  %v1159_v17 = vadd.f32 %v1157_v8, %v1151_v11 }
 0x1a8   : > { %v1166_v27 = vadd.f32 %v1164_v18, %v1158_v16  ;;  %v1167_v28 = vadd.f32 %v1165_v15, %v1159_v17 }
 0x1aa   : > { %v1174_v34 = vadd.f32 %v1172_v24, %v1166_v27  ;;  %v1175_v35 = vadd.f32 %v1173_v23, %v1167_v28 }
 0x1ac   : > { %v1182_v39 = vadd.f32 %v1180_v33, %v1174_v34  ;;  %v1183_v40 = vadd.f32 %v1181_v32, %v1175_v35 }
 0x1ae   : > { %v1190_v45 = vadd.f32 %v1188_v37, %v1182_v39  ;;  %v1191_v46 = vadd.f32 %v1189_v36, %v1183_v40 }
 0x1b0   : > { %v1198_v52 = vadd.f32 %v1196_v38, %v1190_v45  ;;  %v1199_v53 = vadd.f32 %v1197_v41, %v1191_v46 }
 0x1b2   : > { %v1206_v59 = vadd.f32 %v1204_v51, %v1198_v52  ;;  %v1207_v60 = vadd.f32 %v1205_v50, %v1199_v53 }
 0x1b4   : > { %v1214_v62 = vadd.f32 %v1212_v58, %v1206_v59  ;;  %v1215_v0 = vadd.f32 %v1213_v57, %v1207_v60 }
 0x1b6   : > { %v1222_v1 = vadd.f32 %v1220_v63, %v1214_v62  ;;  %v1223_v2 = vadd.f32 %v1221_v61, %v1215_v0 }
 0x1b8   : > { %v1464_v3 = vmul.f32 -1.442695, %v1222_v1  ;;  %v1465_v4 = vmul.f32 -1.442695, %v1223_v2 }
 0x1ba   : > { %1558 = vpow2.f32 %v1464_v3 }
 0x1bb   : > { %1560 = vpow2.f32 %v1465_v4 }
 0x1c4   : > { %v1559_v5 = vpop.eup %1558 }
 0x1c5   : > { %v1561_v6 = vpop.eup %1560  ;;  %v1230_v7 = vadd.f32 1.0, %v1559_v5 }
 0x1c6   : > { %v1231_v8 = vadd.f32 1.0, %v1561_v6 }
 0x1c7   : > { %1562 = vrcp.f32 %v1230_v7 }
 0x1c8   : > { %1564 = vrcp.f32 %v1231_v8 }
 0x1d1   : > { %v1563_v9 = vpop.eup %1562 }
 0x1d2   : > { %v1565_v10 = vpop.eup %1564  ;;  %1236 = vst.msk [vmem:[%s192_s24] sm:$0xff] %vm198_vm0, %v1563_v9 }
 0x1d3   : > { %1237 = vst.msk [vmem:[%s192_s24 + $0x8] sm:$0xff] %vm198_vm0, %v1565_v10 }
 0x1d4   : > { %1624 = shalt.err (!%p1621_p8)
}
 0x1d5   : > { %s1625_s5 = scalar_lea.hbm %s2286_s3, 256  ;;  %s1629_s18 = scalar_lea.hbm %s2341_s2, 512 }
 0x1d6   : > { %p1626_p4 = scmp.ne.s32.totalorder %s2286_s3, %s1625_s5  ;;  %p1630_p5 = scmp.lt.u32.totalorder %s2286_s3, %s2341_s2 }
 0x1d7   : > { %p1631_p3 = scmp.lt.u32.totalorder %s1629_s18, %s1625_s5  ;;  %p1633_p12 = scmp.lt.u32.totalorder %s1625_s5, %s2286_s3 }
 0x1d8   : > { %p1627_p10 = pnand %p1626_p4, %p2357_p2 }
 0x1d9   : > { %p1632_p7 = por %p1631_p3, %p1630_p5 }
 0x1da   : > { %p1628_p11 = pneg %p1627_p10 }
 0x1db   : > { %p1634_p13 = por %p1633_p12, %p1632_p7 }
 0x1dd   : > { %p1635_p6 = pnand %p1634_p13, %p1628_p11 }
 0x1df   : > { %1638 = shalt.err (!%p1635_p6)
}
 0x1e0   : > { %s1712_s27 = smov 128   ;;  %s1713_s19 = smov 8  }
 0x1e1   : > { %1479 = dma.vmem_to_hbm [thread:$0]  (%p2357_p2), %s2288_s28, 256, %s2286_s3, %s1239_s15, %s1712_s27, %s1712_s27, %s1713_s19  }
 0x1e2 PF: > { %s1267_s24 = sand.u32 1, %s1677_s9   ;;  %p2358_p0 = scmp.ne.s32.totalorder %s2350_s22, 0 }
 0x1e3   : > { %p2359_p1 = scmp.ge.s32.totalorder %s1697_s14, 2  ;;  %s1268_s8 = scalar_lea.sflag [#allocation7], %s1267_s24 }
 0x1e5   : > { %p1490_p9 = pnand %p2359_p1, %p2358_p0 }
 0x1e7   : > { %1672 = dma.done.wait (!%p1490_p9), %s1268_s8, 256  }
 0x1e8   : > { %1674 = vsyncadd (!%p1490_p9), %s1268_s8, 4294967040  ;;  %s19_s14 = sadd.s32 1, %s1697_s14   ;;  %s2360_s9 = smov %s1681_s10 }
 0x1e9   : > { %p16_p8 = scmp.ge.s32.totalorder %s19_s14, 4   ;;  %s2361_s10 = smov %s1685_s11 }
 0x1ea   : > { %s2362_s11 = smov %s1839_s25  ;;  %s2363_s12 = smov %s1693_s13 }
 0x1eb   : > { %s2364_s13 = smov %s2366_s29  ;;  %18 = sbr.rel (!%p16_p8) target bundleno = 7 (0x7), region = 102 }
 0x1f2   :  { %1273 = vsyncpa [#allocation6], 1 }
 0x1f3   :  { %1275 = vsyncpa [#allocation6 + $0x1], 1 }
 0x1f4   :  { %1276 = vsyncpa [#allocation7], 1 }
 0x1f5   :  { %1278 = vsyncpa [#allocation7 + $0x1], 1 }
 0x1f6   :  { %1279 = vsyncpa [#allocation8], 1 }
 0x1f7   :  { %1281 = vsyncpa [#allocation8 + $0x1], 1 }

</bundles_post_ra>
